<compile_context>
chip_gen: v5e
topology: v5e:2x2
jax: 0.10.0
libtpu: 0.0.40
codegen_flags: <defaults>
</compile_context>

<pallas_src>
import functools

import jax
import jax.numpy as jnp
from jax.experimental import pallas as pl
from jax.experimental.pallas import tpu as pltpu


def _round_up(x, m):
    return ((x + m - 1) // m) * m


# ---------------------------------------------------------------------------
# Fused bottleneck kernel (one grid step == one image of the batch)
# ---------------------------------------------------------------------------
def _bottleneck_kernel(x_ref, w1_ref, w2_ref, w3_ref,
                       s1_ref, b1_ref, s2_ref, b2_ref, s3_ref, b3_ref,
                       o_ref, t1p_ref, *, H, W, Wp, P, packed_kx):
    cdt = t1p_ref.dtype          # MXU operand dtype (f32 or bf16)
    HW = H * W

    x2d = x_ref[0]               # (H*W, Cin), original input dtype (residual)

    # ---- conv1 (1x1) + bn1 + relu: single MXU matmul, f32 accumulate ----
    t1 = jnp.dot(x2d.astype(cdt), w1_ref[...],
                 preferred_element_type=jnp.float32)
    t1 = jnp.maximum(t1 * s1_ref[...] + b1_ref[...], 0.0)

    # ---- stage conv1 output into the padded VMEM scratch (halo = 1) ----
    # Zero only the halo ring + right padding; the interior is fully rewritten
    # each step, so every scratch element is written every step (no reliance
    # on persistence across grid steps -> megacore-safe).
    t1p_ref[0:1, :, :] = jnp.zeros((1, Wp, P), cdt)
    t1p_ref[H + 1:H + 2, :, :] = jnp.zeros((1, Wp, P), cdt)
    t1p_ref[1:H + 1, 0:1, :] = jnp.zeros((H, 1, P), cdt)
    t1p_ref[1:H + 1, W + 1:Wp, :] = jnp.zeros((H, Wp - W - 1, P), cdt)
    t1p_ref[1:H + 1, 1:W + 1, :] = t1.reshape(H, W, P).astype(cdt)

    # ---- conv2 (3x3, stride 1, pad 1) + bn2 + relu ----
    acc = None
    if packed_kx:
        # kx taps packed along the weight output dim: three fat matmuls
        # (K=P, N=3P); lane slices kx*P are aligned because P % 128 == 0.
        for ky in range(3):
            rows = t1p_ref[ky:ky + H, :, :].reshape(H * Wp, P)   # free view
            y = jnp.dot(rows, w2_ref[ky], preferred_element_type=jnp.float32)
            y = y.reshape(H, Wp, 3 * P)                          # free view
            for kx in range(3):
                tap = y[:, kx:kx + W, kx * P:(kx + 1) * P]
                acc = tap if acc is None else acc + tap
    else:
        # P % 128 != 0: per-tap (P, P) matmuls keep every result lane-aligned.
        for ky in range(3):
            rows = t1p_ref[ky:ky + H, :, :].reshape(H * Wp, P)   # free view
            for kx in range(3):
                y = jnp.dot(rows, w2_ref[3 * ky + kx],
                            preferred_element_type=jnp.float32)
                y = y.reshape(H, Wp, P)                          # free view
                tap = y[:, kx:kx + W, :]
                acc = tap if acc is None else acc + tap
    t2 = jnp.maximum(acc.reshape(HW, P) * s2_ref[...] + b2_ref[...], 0.0)

    # ---- conv3 (1x1) + bn3 + identity residual (f32) + relu ----
    out = jnp.dot(t2.astype(cdt), w3_ref[...],
                  preferred_element_type=jnp.float32)
    out = out * s3_ref[...] + b3_ref[...] + x2d.astype(jnp.float32)
    o_ref[0] = jnp.maximum(out, 0.0).astype(o_ref.dtype)


def _build_call(N, H, W, Cin, P, C4, x_dtype, out_dtype, compute_dtype,
                packed_kx):
    HW = H * W
    Wp = _round_up(W + 2, 8)      # sublane-multiple width -> free reshapes
    cbytes = jnp.dtype(compute_dtype).itemsize
    xbytes = jnp.dtype(x_dtype).itemsize
    obytes = jnp.dtype(out_dtype).itemsize

    # Per-step VMEM footprint: double-buffered activation blocks, constants
    # (also double-buffered by the pipeline), the padded scratch and the f32
    # temporaries (t1, y, acc, conv3 output).  1.5x headroom.
    w_elems = Cin * P + 9 * P * P + P * C4
    est = (2 * HW * (Cin * xbytes + C4 * obytes)
           + 2 * (w_elems * cbytes + (4 * P + 2 * C4) * 4)
           + (H + 2) * Wp * P * cbytes
           + (HW * P + H * Wp * (3 * P if packed_kx else P)
              + HW * P + HW * C4) * 4)
    vmem_limit = int(min(max(int(1.5 * est), 32 * 1024 * 1024),
                         96 * 1024 * 1024))

    flops = 2 * N * HW * w_elems
    bytes_accessed = (N * HW * (Cin * xbytes + C4 * obytes)
                      + w_elems * cbytes + (4 * P + 2 * C4) * 4)

    if packed_kx:
        w2_spec = pl.BlockSpec((3, P, 3 * P), lambda n: (0, 0, 0))
    else:
        w2_spec = pl.BlockSpec((9, P, P), lambda n: (0, 0, 0))

    kernel = functools.partial(_bottleneck_kernel, H=H, W=W, Wp=Wp, P=P,
                               packed_kx=packed_kx)
    return pl.pallas_call(
        kernel,
        out_shape=jax.ShapeDtypeStruct((N, HW, C4), out_dtype),
        grid_spec=pltpu.PrefetchScalarGridSpec(
            num_scalar_prefetch=0,
            grid=(N,),
            in_specs=[
                pl.BlockSpec((1, HW, Cin), lambda n: (n, 0, 0)),   # x (+residual)
                pl.BlockSpec((Cin, P), lambda n: (0, 0)),          # w1
                w2_spec,                                           # w2
                pl.BlockSpec((P, C4), lambda n: (0, 0)),           # w3
                pl.BlockSpec((1, P), lambda n: (0, 0)),            # s1
                pl.BlockSpec((1, P), lambda n: (0, 0)),            # b1
                pl.BlockSpec((1, P), lambda n: (0, 0)),            # s2
                pl.BlockSpec((1, P), lambda n: (0, 0)),            # b2
                pl.BlockSpec((1, C4), lambda n: (0, 0)),           # s3
                pl.BlockSpec((1, C4), lambda n: (0, 0)),           # b3
            ],
            out_specs=pl.BlockSpec((1, HW, C4), lambda n: (n, 0, 0)),
            scratch_shapes=[pltpu.VMEM((H + 2, Wp, P), compute_dtype)],
        ),
        compiler_params=pltpu.CompilerParams(
            dimension_semantics=("parallel",),
            vmem_limit_bytes=vmem_limit),
        cost_estimate=pl.CostEstimate(flops=flops, transcendentals=0,
                                      bytes_accessed=bytes_accessed),
    )


# ---------------------------------------------------------------------------
# Wrappers (BN folding + weight repacking in plain JAX, done once)
# ---------------------------------------------------------------------------
def fold_bn(gamma, beta, mean, var, eps=1e-5):
    scale = gamma * jax.lax.rsqrt(var + eps)
    bias = beta - mean * scale
    return scale[None, :].astype(jnp.float32), bias[None, :].astype(jnp.float32)


def bottleneck_forward_nhwc(x_nhwc, params, *, compute_dtype=jnp.float32):
    """NHWC-in / NHWC-out fused bottleneck (use this form inside a network)."""
    N, H, W, Cin = x_nhwc.shape
    P = params["w1"].shape[1]
    C4 = params["w3"].shape[1]
    assert Cin == C4 == 4 * P, "identity residual requires inplanes == 4*planes"

    s1, b1 = fold_bn(*params["bn1"])
    s2, b2 = fold_bn(*params["bn2"])
    s3, b3 = fold_bn(*params["bn3"])

    packed_kx = (P % 128 == 0)
    if packed_kx:
        # w2k[ky, c, kx*P + o] = w2[ky*3 + kx, c, o]
        w2 = (params["w2"].reshape(3, 3, P, P).transpose(0, 2, 1, 3)
              .reshape(3, P, 3 * P)).astype(compute_dtype)
    else:
        w2 = params["w2"].astype(compute_dtype)            # (9, P, P)
    w1 = params["w1"].astype(compute_dtype)
    w3 = params["w3"].astype(compute_dtype)
    # x keeps its original dtype: the identity residual is not quantized to the
    # (possibly bf16) compute dtype; only the conv1 operand is cast in-kernel.
    x2d = x_nhwc.reshape(N, H * W, Cin)

    call = _build_call(N, H, W, Cin, P, C4, x_nhwc.dtype, x_nhwc.dtype,
                       compute_dtype, packed_kx)
    out2d = call(x2d, w1, w2, w3, s1, b1, s2, b2, s3, b3)
    return out2d.reshape(N, H, W, C4)


def bottleneck_forward(x_nchw, params, *, compute_dtype=jnp.float32):
    """NCHW-in / NCHW-out wrapper matching the PyTorch module interface."""
    x = jnp.transpose(x_nchw, (0, 2, 3, 1))
    out = bottleneck_forward_nhwc(x, params, compute_dtype=compute_dtype)
    return jnp.transpose(out, (0, 3, 1, 2))


# ---------------------------------------------------------------------------
# Pure-JAX reference for verification
# ---------------------------------------------------------------------------
def bottleneck_reference(x_nchw, params):
    x = jnp.transpose(x_nchw, (0, 2, 3, 1))
    s1, b1 = fold_bn(*params["bn1"])
    s2, b2 = fold_bn(*params["bn2"])
    s3, b3 = fold_bn(*params["bn3"])
    P = params["w1"].shape[1]

    def conv(inp, w_hwio):
        return jax.lax.conv_general_dilated(
            inp, w_hwio, (1, 1), "SAME",
            dimension_numbers=("NHWC", "HWIO", "NHWC"))

    w1 = params["w1"][None, None]                 # [1,1,Cin,P]
    w2 = params["w2"].reshape(3, 3, P, P)         # [3,3,P,P]
    w3 = params["w3"][None, None]                 # [1,1,P,4P]

    out = jnp.maximum(conv(x, w1) * s1 + b1, 0.0)
    out = jnp.maximum(conv(out, w2) * s2 + b2, 0.0)
    out = conv(out, w3) * s3 + b3
    out = jnp.maximum(out + x, 0.0)
    return jnp.transpose(out, (0, 3, 1, 2))


if __name__ == "__main__":
    def bn_params(key, c):
        ks = jax.random.split(key, 4)
        gamma = 1.0 + 0.1 * jax.random.normal(ks[0], (c,), jnp.float32)
        beta = 0.1 * jax.random.normal(ks[1], (c,), jnp.float32)
        mean = 0.1 * jax.random.normal(ks[2], (c,), jnp.float32)
        var = jnp.abs(1.0 + 0.1 * jax.random.normal(ks[3], (c,), jnp.float32))
        return (gamma, beta, mean, var)

    def make_case(key, N, H, W, planes):
        inplanes = planes * 4
        k = jax.random.split(key, 7)
        x = jax.random.normal(k[0], (N, inplanes, H, W), jnp.float32)  # NCHW
        params = {
            "w1": 0.1 * jax.random.normal(k[1], (inplanes, planes), jnp.float32),
            "w2": 0.1 * jax.random.normal(k[2], (9, planes, planes), jnp.float32),
            "w3": 0.1 * jax.random.normal(k[3], (planes, planes * 4), jnp.float32),
            "bn1": bn_params(k[4], planes),
            "bn2": bn_params(k[5], planes),
            "bn3": bn_params(k[6], planes * 4),
        }
        return x, params

    key = jax.random.PRNGKey(0)
    k_a, k_b = jax.random.split(key)

    # Case A: planes=32 -> Cin=C4=128 (lane-dense input/output blocks);
    # exercises the per-tap conv2 path (P % 128 != 0).
    x_a, p_a = make_case(k_a, N=2, H=16, W=16, planes=32)
    ref_a = jax.block_until_ready(bottleneck_reference(x_a, p_a))

    out_a = jax.block_until_ready(bottleneck_forward(x_a, p_a))
    assert out_a.shape == x_a.shape
    assert jnp.allclose(out_a, ref_a, atol=5e-4, rtol=5e-4), \
        "case A f32 mismatch vs reference"

    # bf16 MXU operands (f32 accumulation, f32 residual / BN / ReLU epilogue).
    out_a_bf16 = jax.block_until_ready(
        bottleneck_forward(x_a, p_a, compute_dtype=jnp.bfloat16))
    assert out_a_bf16.shape == x_a.shape
    assert jnp.allclose(out_a_bf16, ref_a, atol=1e-1, rtol=1e-1), \
        "case A bf16 mismatch vs reference"

    # Case B: planes=128 -> exercises the kx-packed fat-matmul conv2 path.
    x_b, p_b = make_case(k_b, N=1, H=8, W=8, planes=128)
    ref_b = jax.block_until_ready(bottleneck_reference(x_b, p_b))
    out_b = jax.block_until_ready(bottleneck_forward(x_b, p_b))
    assert out_b.shape == x_b.shape
    assert jnp.allclose(out_b, ref_b, atol=5e-4, rtol=5e-4), \
        "case B f32 mismatch vs reference"

    print("KERNEL_OK")
</pallas_src>

<mosaic_0001>
module attributes {stable_mosaic.version = 11 : i64} {
  func.func @_bottleneck_kernel(%arg0: i32, %arg1: memref<1x256x128xf32, #tpu.memory_space<vmem>>, %arg2: memref<128x32xf32, #tpu.memory_space<vmem>>, %arg3: memref<9x32x32xf32, #tpu.memory_space<vmem>>, %arg4: memref<32x128xf32, #tpu.memory_space<vmem>>, %arg5: memref<1x32xf32, #tpu.memory_space<vmem>>, %arg6: memref<1x32xf32, #tpu.memory_space<vmem>>, %arg7: memref<1x32xf32, #tpu.memory_space<vmem>>, %arg8: memref<1x32xf32, #tpu.memory_space<vmem>>, %arg9: memref<1x128xf32, #tpu.memory_space<vmem>>, %arg10: memref<1x128xf32, #tpu.memory_space<vmem>>, %arg11: memref<1x256x128xf32, #tpu.memory_space<vmem>>, %arg12: memref<18x24x32xf32, #tpu.memory_space<vmem>>) attributes {dimension_semantics = [#tpu.dimension_semantics<parallel>], iteration_bounds = array<i64: 2>, scalar_prefetch = 0 : i64, scratch_operands = 1 : i64, tpu.core_type = #tpu.core_type<tc>, window_params = [{transform_indices = @transform_0, window_bounds = array<i64: 1, 256, 128>}, {pipeline_mode = #tpu.pipeline_mode<synchronous>, transform_indices = @transform_1, window_bounds = array<i64: 128, 32>}, {pipeline_mode = #tpu.pipeline_mode<synchronous>, transform_indices = @transform_2, window_bounds = array<i64: 9, 32, 32>}, {pipeline_mode = #tpu.pipeline_mode<synchronous>, transform_indices = @transform_3, window_bounds = array<i64: 32, 128>}, {pipeline_mode = #tpu.pipeline_mode<synchronous>, transform_indices = @transform_4, window_bounds = array<i64: 1, 32>}, {pipeline_mode = #tpu.pipeline_mode<synchronous>, transform_indices = @transform_5, window_bounds = array<i64: 1, 32>}, {pipeline_mode = #tpu.pipeline_mode<synchronous>, transform_indices = @transform_6, window_bounds = array<i64: 1, 32>}, {pipeline_mode = #tpu.pipeline_mode<synchronous>, transform_indices = @transform_7, window_bounds = array<i64: 1, 32>}, {pipeline_mode = #tpu.pipeline_mode<synchronous>, transform_indices = @transform_8, window_bounds = array<i64: 1, 128>}, {pipeline_mode = #tpu.pipeline_mode<synchronous>, transform_indices = @transform_9, window_bounds = array<i64: 1, 128>}, {transform_indices = @transform_10, window_bounds = array<i64: 1, 256, 128>}]} {
    %c0 = arith.constant 0 : index
    %c0_0 = arith.constant 0 : index
    %c0_1 = arith.constant 0 : index
    %0 = vector.load %arg1[%c0, %c0_0, %c0_1] : memref<1x256x128xf32, #tpu.memory_space<vmem>>, vector<1x256x128xf32>
    %1 = vector.shape_cast %0 : vector<1x256x128xf32> to vector<256x128xf32>
    %c0_2 = arith.constant 0 : index
    %c0_3 = arith.constant 0 : index
    %2 = vector.load %arg2[%c0_2, %c0_3] : memref<128x32xf32, #tpu.memory_space<vmem>>, vector<128x32xf32>
    %cst = arith.constant dense<0.000000e+00> : vector<256x32xf32>
    %3 = tpu.matmul %1, %2, %cst {dimension_numbers = #tpu.dot_dimension_numbers<[1], [0], [0], [1], [0, 0, 1, 1], [], []>} : vector<256x128xf32>, vector<128x32xf32>, vector<256x32xf32> -> vector<256x32xf32>
    %c0_4 = arith.constant 0 : index
    %c0_5 = arith.constant 0 : index
    %4 = vector.load %arg5[%c0_4, %c0_5] : memref<1x32xf32, #tpu.memory_space<vmem>>, vector<1x32xf32>
    %5 = vector.broadcast %4 : vector<1x32xf32> to vector<256x32xf32>
    %6 = arith.mulf %3, %5 : vector<256x32xf32>
    %c0_6 = arith.constant 0 : index
    %c0_7 = arith.constant 0 : index
    %7 = vector.load %arg6[%c0_6, %c0_7] : memref<1x32xf32, #tpu.memory_space<vmem>>, vector<1x32xf32>
    %8 = vector.broadcast %7 : vector<1x32xf32> to vector<256x32xf32>
    %9 = arith.addf %6, %8 : vector<256x32xf32>
    %cst_8 = arith.constant 0.000000e+00 : f32
    %10 = vector.broadcast %cst_8 : f32 to vector<256x32xf32>
    %11 = arith.maximumf %9, %10 : vector<256x32xf32>
    %cst_9 = arith.constant 0.000000e+00 : f32
    %12 = vector.broadcast %cst_9 : f32 to vector<1x24x32xf32>
    %c0_10 = arith.constant 0 : index
    %c0_11 = arith.constant 0 : index
    %c0_12 = arith.constant 0 : index
    %13 = vector.load %arg12[%c0_10, %c0_11, %c0_12] : memref<18x24x32xf32, #tpu.memory_space<vmem>>, vector<1x24x32xf32>
    tpu.vector_store %arg12[%c0_10, %c0_11, %c0_12], %12 {strides = array<i32>} : memref<18x24x32xf32, #tpu.memory_space<vmem>>, vector<1x24x32xf32>,
    %cst_13 = arith.constant 0.000000e+00 : f32
    %14 = vector.broadcast %cst_13 : f32 to vector<1x24x32xf32>
    %c17 = arith.constant 17 : index
    %c0_14 = arith.constant 0 : index
    %c0_15 = arith.constant 0 : index
    %15 = vector.load %arg12[%c17, %c0_14, %c0_15] : memref<18x24x32xf32, #tpu.memory_space<vmem>>, vector<1x24x32xf32>
    tpu.vector_store %arg12[%c17, %c0_14, %c0_15], %14 {strides = array<i32>} : memref<18x24x32xf32, #tpu.memory_space<vmem>>, vector<1x24x32xf32>,
    %cst_16 = arith.constant 0.000000e+00 : f32
    %16 = vector.broadcast %cst_16 : f32 to vector<16x1x32xf32>
    %c1 = arith.constant 1 : index
    %c0_17 = arith.constant 0 : index
    %c0_18 = arith.constant 0 : index
    %17 = vector.load %arg12[%c1, %c0_17, %c0_18] : memref<18x24x32xf32, #tpu.memory_space<vmem>>, vector<16x1x32xf32>
    tpu.vector_store %arg12[%c1, %c0_17, %c0_18], %16 {strides = array<i32>} : memref<18x24x32xf32, #tpu.memory_space<vmem>>, vector<16x1x32xf32>,
    %cst_19 = arith.constant 0.000000e+00 : f32
    %18 = vector.broadcast %cst_19 : f32 to vector<16x7x32xf32>
    %c1_20 = arith.constant 1 : index
    %c17_21 = arith.constant 17 : index
    %c0_22 = arith.constant 0 : index
    %19 = vector.load %arg12[%c1_20, %c17_21, %c0_22] : memref<18x24x32xf32, #tpu.memory_space<vmem>>, vector<16x7x32xf32>
    tpu.vector_store %arg12[%c1_20, %c17_21, %c0_22], %18 {strides = array<i32>} : memref<18x24x32xf32, #tpu.memory_space<vmem>>, vector<16x7x32xf32>,
    %20 = vector.shape_cast %11 : vector<256x32xf32> to vector<16x16x32xf32>
    %c1_23 = arith.constant 1 : index
    %c1_24 = arith.constant 1 : index
    %c0_25 = arith.constant 0 : index
    %21 = vector.load %arg12[%c1_23, %c1_24, %c0_25] : memref<18x24x32xf32, #tpu.memory_space<vmem>>, vector<16x16x32xf32>
    tpu.vector_store %arg12[%c1_23, %c1_24, %c0_25], %20 {strides = array<i32>} : memref<18x24x32xf32, #tpu.memory_space<vmem>>, vector<16x16x32xf32>,
    %c0_26 = arith.constant 0 : index
    %c0_27 = arith.constant 0 : index
    %c0_28 = arith.constant 0 : index
    %22 = vector.load %arg12[%c0_26, %c0_27, %c0_28] : memref<18x24x32xf32, #tpu.memory_space<vmem>>, vector<16x24x32xf32>
    %23 = vector.shape_cast %22 : vector<16x24x32xf32> to vector<384x32xf32>
    %c0_29 = arith.constant 0 : index
    %c0_30 = arith.constant 0 : index
    %c0_31 = arith.constant 0 : index
    %24 = vector.load %arg3[%c0_29, %c0_30, %c0_31] : memref<9x32x32xf32, #tpu.memory_space<vmem>>, vector<1x32x32xf32>
    %25 = vector.shape_cast %24 : vector<1x32x32xf32> to vector<32x32xf32>
    %cst_32 = arith.constant dense<0.000000e+00> : vector<384x32xf32>
    %26 = tpu.matmul %23, %25, %cst_32 {dimension_numbers = #tpu.dot_dimension_numbers<[1], [0], [0], [1], [0, 0, 1, 1], [], []>} : vector<384x32xf32>, vector<32x32xf32>, vector<384x32xf32> -> vector<384x32xf32>
    %27 = vector.shape_cast %26 : vector<384x32xf32> to vector<16x24x32xf32>
    %28 = vector.extract_strided_slice %27 {offsets = [0, 0, 0], sizes = [16, 16, 32], strides = [1, 1, 1]} : vector<16x24x32xf32> to vector<16x16x32xf32>
    %c1_33 = arith.constant 1 : index
    %c0_34 = arith.constant 0 : index
    %c0_35 = arith.constant 0 : index
    %29 = vector.load %arg3[%c1_33, %c0_34, %c0_35] : memref<9x32x32xf32, #tpu.memory_space<vmem>>, vector<1x32x32xf32>
    %30 = vector.shape_cast %29 : vector<1x32x32xf32> to vector<32x32xf32>
    %cst_36 = arith.constant dense<0.000000e+00> : vector<384x32xf32>
    %31 = tpu.matmul %23, %30, %cst_36 {dimension_numbers = #tpu.dot_dimension_numbers<[1], [0], [0], [1], [0, 0, 1, 1], [], []>} : vector<384x32xf32>, vector<32x32xf32>, vector<384x32xf32> -> vector<384x32xf32>
    %32 = vector.shape_cast %31 : vector<384x32xf32> to vector<16x24x32xf32>
    %33 = vector.extract_strided_slice %32 {offsets = [0, 1, 0], sizes = [16, 16, 32], strides = [1, 1, 1]} : vector<16x24x32xf32> to vector<16x16x32xf32>
    %34 = arith.addf %28, %33 : vector<16x16x32xf32>
    %c2 = arith.constant 2 : index
    %c0_37 = arith.constant 0 : index
    %c0_38 = arith.constant 0 : index
    %35 = vector.load %arg3[%c2, %c0_37, %c0_38] : memref<9x32x32xf32, #tpu.memory_space<vmem>>, vector<1x32x32xf32>
    %36 = vector.shape_cast %35 : vector<1x32x32xf32> to vector<32x32xf32>
    %cst_39 = arith.constant dense<0.000000e+00> : vector<384x32xf32>
    %37 = tpu.matmul %23, %36, %cst_39 {dimension_numbers = #tpu.dot_dimension_numbers<[1], [0], [0], [1], [0, 0, 1, 1], [], []>} : vector<384x32xf32>, vector<32x32xf32>, vector<384x32xf32> -> vector<384x32xf32>
    %38 = vector.shape_cast %37 : vector<384x32xf32> to vector<16x24x32xf32>
    %39 = vector.extract_strided_slice %38 {offsets = [0, 2, 0], sizes = [16, 16, 32], strides = [1, 1, 1]} : vector<16x24x32xf32> to vector<16x16x32xf32>
    %40 = arith.addf %34, %39 : vector<16x16x32xf32>
    %c1_40 = arith.constant 1 : index
    %c0_41 = arith.constant 0 : index
    %c0_42 = arith.constant 0 : index
    %41 = vector.load %arg12[%c1_40, %c0_41, %c0_42] : memref<18x24x32xf32, #tpu.memory_space<vmem>>, vector<16x24x32xf32>
    %42 = vector.shape_cast %41 : vector<16x24x32xf32> to vector<384x32xf32>
    %c3 = arith.constant 3 : index
    %c0_43 = arith.constant 0 : index
    %c0_44 = arith.constant 0 : index
    %43 = vector.load %arg3[%c3, %c0_43, %c0_44] : memref<9x32x32xf32, #tpu.memory_space<vmem>>, vector<1x32x32xf32>
    %44 = vector.shape_cast %43 : vector<1x32x32xf32> to vector<32x32xf32>
    %cst_45 = arith.constant dense<0.000000e+00> : vector<384x32xf32>
    %45 = tpu.matmul %42, %44, %cst_45 {dimension_numbers = #tpu.dot_dimension_numbers<[1], [0], [0], [1], [0, 0, 1, 1], [], []>} : vector<384x32xf32>, vector<32x32xf32>, vector<384x32xf32> -> vector<384x32xf32>
    %46 = vector.shape_cast %45 : vector<384x32xf32> to vector<16x24x32xf32>
    %47 = vector.extract_strided_slice %46 {offsets = [0, 0, 0], sizes = [16, 16, 32], strides = [1, 1, 1]} : vector<16x24x32xf32> to vector<16x16x32xf32>
    %48 = arith.addf %40, %47 : vector<16x16x32xf32>
    %c4 = arith.constant 4 : index
    %c0_46 = arith.constant 0 : index
    %c0_47 = arith.constant 0 : index
    %49 = vector.load %arg3[%c4, %c0_46, %c0_47] : memref<9x32x32xf32, #tpu.memory_space<vmem>>, vector<1x32x32xf32>
    %50 = vector.shape_cast %49 : vector<1x32x32xf32> to vector<32x32xf32>
    %cst_48 = arith.constant dense<0.000000e+00> : vector<384x32xf32>
    %51 = tpu.matmul %42, %50, %cst_48 {dimension_numbers = #tpu.dot_dimension_numbers<[1], [0], [0], [1], [0, 0, 1, 1], [], []>} : vector<384x32xf32>, vector<32x32xf32>, vector<384x32xf32> -> vector<384x32xf32>
    %52 = vector.shape_cast %51 : vector<384x32xf32> to vector<16x24x32xf32>
    %53 = vector.extract_strided_slice %52 {offsets = [0, 1, 0], sizes = [16, 16, 32], strides = [1, 1, 1]} : vector<16x24x32xf32> to vector<16x16x32xf32>
    %54 = arith.addf %48, %53 : vector<16x16x32xf32>
    %c5 = arith.constant 5 : index
    %c0_49 = arith.constant 0 : index
    %c0_50 = arith.constant 0 : index
    %55 = vector.load %arg3[%c5, %c0_49, %c0_50] : memref<9x32x32xf32, #tpu.memory_space<vmem>>, vector<1x32x32xf32>
    %56 = vector.shape_cast %55 : vector<1x32x32xf32> to vector<32x32xf32>
    %cst_51 = arith.constant dense<0.000000e+00> : vector<384x32xf32>
    %57 = tpu.matmul %42, %56, %cst_51 {dimension_numbers = #tpu.dot_dimension_numbers<[1], [0], [0], [1], [0, 0, 1, 1], [], []>} : vector<384x32xf32>, vector<32x32xf32>, vector<384x32xf32> -> vector<384x32xf32>
    %58 = vector.shape_cast %57 : vector<384x32xf32> to vector<16x24x32xf32>
    %59 = vector.extract_strided_slice %58 {offsets = [0, 2, 0], sizes = [16, 16, 32], strides = [1, 1, 1]} : vector<16x24x32xf32> to vector<16x16x32xf32>
    %60 = arith.addf %54, %59 : vector<16x16x32xf32>
    %c2_52 = arith.constant 2 : index
    %c0_53 = arith.constant 0 : index
    %c0_54 = arith.constant 0 : index
    %61 = vector.load %arg12[%c2_52, %c0_53, %c0_54] : memref<18x24x32xf32, #tpu.memory_space<vmem>>, vector<16x24x32xf32>
    %62 = vector.shape_cast %61 : vector<16x24x32xf32> to vector<384x32xf32>
    %c6 = arith.constant 6 : index
    %c0_55 = arith.constant 0 : index
    %c0_56 = arith.constant 0 : index
    %63 = vector.load %arg3[%c6, %c0_55, %c0_56] : memref<9x32x32xf32, #tpu.memory_space<vmem>>, vector<1x32x32xf32>
    %64 = vector.shape_cast %63 : vector<1x32x32xf32> to vector<32x32xf32>
    %cst_57 = arith.constant dense<0.000000e+00> : vector<384x32xf32>
    %65 = tpu.matmul %62, %64, %cst_57 {dimension_numbers = #tpu.dot_dimension_numbers<[1], [0], [0], [1], [0, 0, 1, 1], [], []>} : vector<384x32xf32>, vector<32x32xf32>, vector<384x32xf32> -> vector<384x32xf32>
    %66 = vector.shape_cast %65 : vector<384x32xf32> to vector<16x24x32xf32>
    %67 = vector.extract_strided_slice %66 {offsets = [0, 0, 0], sizes = [16, 16, 32], strides = [1, 1, 1]} : vector<16x24x32xf32> to vector<16x16x32xf32>
    %68 = arith.addf %60, %67 : vector<16x16x32xf32>
    %c7 = arith.constant 7 : index
    %c0_58 = arith.constant 0 : index
    %c0_59 = arith.constant 0 : index
    %69 = vector.load %arg3[%c7, %c0_58, %c0_59] : memref<9x32x32xf32, #tpu.memory_space<vmem>>, vector<1x32x32xf32>
    %70 = vector.shape_cast %69 : vector<1x32x32xf32> to vector<32x32xf32>
    %cst_60 = arith.constant dense<0.000000e+00> : vector<384x32xf32>
    %71 = tpu.matmul %62, %70, %cst_60 {dimension_numbers = #tpu.dot_dimension_numbers<[1], [0], [0], [1], [0, 0, 1, 1], [], []>} : vector<384x32xf32>, vector<32x32xf32>, vector<384x32xf32> -> vector<384x32xf32>
    %72 = vector.shape_cast %71 : vector<384x32xf32> to vector<16x24x32xf32>
    %73 = vector.extract_strided_slice %72 {offsets = [0, 1, 0], sizes = [16, 16, 32], strides = [1, 1, 1]} : vector<16x24x32xf32> to vector<16x16x32xf32>
    %74 = arith.addf %68, %73 : vector<16x16x32xf32>
    %c8 = arith.constant 8 : index
    %c0_61 = arith.constant 0 : index
    %c0_62 = arith.constant 0 : index
    %75 = vector.load %arg3[%c8, %c0_61, %c0_62] : memref<9x32x32xf32, #tpu.memory_space<vmem>>, vector<1x32x32xf32>
    %76 = vector.shape_cast %75 : vector<1x32x32xf32> to vector<32x32xf32>
    %cst_63 = arith.constant dense<0.000000e+00> : vector<384x32xf32>
    %77 = tpu.matmul %62, %76, %cst_63 {dimension_numbers = #tpu.dot_dimension_numbers<[1], [0], [0], [1], [0, 0, 1, 1], [], []>} : vector<384x32xf32>, vector<32x32xf32>, vector<384x32xf32> -> vector<384x32xf32>
    %78 = vector.shape_cast %77 : vector<384x32xf32> to vector<16x24x32xf32>
    %79 = vector.extract_strided_slice %78 {offsets = [0, 2, 0], sizes = [16, 16, 32], strides = [1, 1, 1]} : vector<16x24x32xf32> to vector<16x16x32xf32>
    %80 = arith.addf %74, %79 : vector<16x16x32xf32>
    %81 = vector.shape_cast %80 : vector<16x16x32xf32> to vector<256x32xf32>
    %c0_64 = arith.constant 0 : index
    %c0_65 = arith.constant 0 : index
    %82 = vector.load %arg7[%c0_64, %c0_65] : memref<1x32xf32, #tpu.memory_space<vmem>>, vector<1x32xf32>
    %83 = vector.broadcast %82 : vector<1x32xf32> to vector<256x32xf32>
    %84 = arith.mulf %81, %83 : vector<256x32xf32>
    %c0_66 = arith.constant 0 : index
    %c0_67 = arith.constant 0 : index
    %85 = vector.load %arg8[%c0_66, %c0_67] : memref<1x32xf32, #tpu.memory_space<vmem>>, vector<1x32xf32>
    %86 = vector.broadcast %85 : vector<1x32xf32> to vector<256x32xf32>
    %87 = arith.addf %84, %86 : vector<256x32xf32>
    %cst_68 = arith.constant 0.000000e+00 : f32
    %88 = vector.broadcast %cst_68 : f32 to vector<256x32xf32>
    %89 = arith.maximumf %87, %88 : vector<256x32xf32>
    %c0_69 = arith.constant 0 : index
    %c0_70 = arith.constant 0 : index
    %90 = vector.load %arg4[%c0_69, %c0_70] : memref<32x128xf32, #tpu.memory_space<vmem>>, vector<32x128xf32>
    %cst_71 = arith.constant dense<0.000000e+00> : vector<256x128xf32>
    %91 = tpu.matmul %89, %90, %cst_71 {dimension_numbers = #tpu.dot_dimension_numbers<[1], [0], [0], [1], [0, 0, 1, 1], [], []>} : vector<256x32xf32>, vector<32x128xf32>, vector<256x128xf32> -> vector<256x128xf32>
    %c0_72 = arith.constant 0 : index
    %c0_73 = arith.constant 0 : index
    %92 = vector.load %arg9[%c0_72, %c0_73] : memref<1x128xf32, #tpu.memory_space<vmem>>, vector<1x128xf32>
    %93 = vector.broadcast %92 : vector<1x128xf32> to vector<256x128xf32>
    %94 = arith.mulf %91, %93 : vector<256x128xf32>
    %c0_74 = arith.constant 0 : index
    %c0_75 = arith.constant 0 : index
    %95 = vector.load %arg10[%c0_74, %c0_75] : memref<1x128xf32, #tpu.memory_space<vmem>>, vector<1x128xf32>
    %96 = vector.broadcast %95 : vector<1x128xf32> to vector<256x128xf32>
    %97 = arith.addf %94, %96 : vector<256x128xf32>
    %98 = arith.addf %97, %1 : vector<256x128xf32>
    %cst_76 = arith.constant 0.000000e+00 : f32
    %99 = vector.broadcast %cst_76 : f32 to vector<256x128xf32>
    %100 = arith.maximumf %98, %99 : vector<256x128xf32>
    %c0_77 = arith.constant 0 : index
    %c0_78 = arith.constant 0 : index
    %c0_79 = arith.constant 0 : index
    %101 = vector.load %arg11[%c0_77, %c0_78, %c0_79] : memref<1x256x128xf32, #tpu.memory_space<vmem>>, vector<1x256x128xf32>
    %102 = vector.shape_cast %101 : vector<1x256x128xf32> to vector<256x128xf32>
    %103 = vector.shape_cast %100 : vector<256x128xf32> to vector<1x256x128xf32>
    tpu.vector_store %arg11[%c0_77, %c0_78, %c0_79], %103 {strides = array<i32>} : memref<1x256x128xf32, #tpu.memory_space<vmem>>, vector<1x256x128xf32>,
    return
  }
  func.func @transform_0(%arg0: i32) -> (i32, i32, i32) {
    %c0_i32 = arith.constant 0 : i32
    %c0_i32_0 = arith.constant 0 : i32
    %c0_i32_1 = arith.constant 0 : i32
    return %arg0, %c0_i32, %c0_i32_0 : i32, i32, i32
  }
  func.func @transform_1(%arg0: i32) -> (i32, i32) {
    %c0_i32 = arith.constant 0 : i32
    %c0_i32_0 = arith.constant 0 : i32
    %c0_i32_1 = arith.constant 0 : i32
    return %c0_i32, %c0_i32_0 : i32, i32
  }
  func.func @transform_2(%arg0: i32) -> (i32, i32, i32) {
    %c0_i32 = arith.constant 0 : i32
    %c0_i32_0 = arith.constant 0 : i32
    %c0_i32_1 = arith.constant 0 : i32
    %c0_i32_2 = arith.constant 0 : i32
    return %c0_i32, %c0_i32_0, %c0_i32_1 : i32, i32, i32
  }
  func.func @transform_3(%arg0: i32) -> (i32, i32) {
    %c0_i32 = arith.constant 0 : i32
    %c0_i32_0 = arith.constant 0 : i32
    %c0_i32_1 = arith.constant 0 : i32
    return %c0_i32, %c0_i32_0 : i32, i32
  }
  func.func @transform_4(%arg0: i32) -> (i32, i32) {
    %c0_i32 = arith.constant 0 : i32
    %c0_i32_0 = arith.constant 0 : i32
    %c0_i32_1 = arith.constant 0 : i32
    return %c0_i32, %c0_i32_0 : i32, i32
  }
  func.func @transform_5(%arg0: i32) -> (i32, i32) {
    %c0_i32 = arith.constant 0 : i32
    %c0_i32_0 = arith.constant 0 : i32
    %c0_i32_1 = arith.constant 0 : i32
    return %c0_i32, %c0_i32_0 : i32, i32
  }
  func.func @transform_6(%arg0: i32) -> (i32, i32) {
    %c0_i32 = arith.constant 0 : i32
    %c0_i32_0 = arith.constant 0 : i32
    %c0_i32_1 = arith.constant 0 : i32
    return %c0_i32, %c0_i32_0 : i32, i32
  }
  func.func @transform_7(%arg0: i32) -> (i32, i32) {
    %c0_i32 = arith.constant 0 : i32
    %c0_i32_0 = arith.constant 0 : i32
    %c0_i32_1 = arith.constant 0 : i32
    return %c0_i32, %c0_i32_0 : i32, i32
  }
  func.func @transform_8(%arg0: i32) -> (i32, i32) {
    %c0_i32 = arith.constant 0 : i32
    %c0_i32_0 = arith.constant 0 : i32
    %c0_i32_1 = arith.constant 0 : i32
    return %c0_i32, %c0_i32_0 : i32, i32
  }
  func.func @transform_9(%arg0: i32) -> (i32, i32) {
    %c0_i32 = arith.constant 0 : i32
    %c0_i32_0 = arith.constant 0 : i32
    %c0_i32_1 = arith.constant 0 : i32
    return %c0_i32, %c0_i32_0 : i32, i32
  }
  func.func @transform_10(%arg0: i32) -> (i32, i32, i32) {
    %c0_i32 = arith.constant 0 : i32
    %c0_i32_0 = arith.constant 0 : i32
    %c0_i32_1 = arith.constant 0 : i32
    return %arg0, %c0_i32, %c0_i32_0 : i32, i32, i32
  }
}

</mosaic_0001>

<bundles_post_ra>
// kernel: tpu_custom_call.1
= control target key start
LH: loop header
LB: loop body
LE: loop exit
PB: predicated region body
PF: predicated region fallthrough
CT: control target
= control target key end

     0   :  { %s8039_s0 = inlined_call_operand.hbm [shape: f32[2,256,128], index: 0, kind: input, shape index: {}]   ;;  %s8040_s1 = inlined_call_operand.vmem [shape: f32[128,32], index: 1, kind: input, shape index: {}]   ;;  %s8041_s2 = inlined_call_operand.hbm [shape: f32[9,32,32], index: 2, kind: input, shape index: {}]   ;;  %s8042_s3 = inlined_call_operand.vmem [shape: f32[32,128], index: 3, kind: input, shape index: {}]   ;;  %s8043_s4 = inlined_call_operand.vmem [shape: f32[1,32], index: 4, kind: input, shape index: {}]   ;;  %s8044_s5 = inlined_call_operand.vmem [shape: f32[1,32], index: 5, kind: input, shape index: {}]   ;;  %s8045_s6 = inlined_call_operand.vmem [shape: f32[1,32], index: 6, kind: input, shape index: {}]   ;;  %s8046_s7 = inlined_call_operand.vmem [shape: f32[1,32], index: 7, kind: input, shape index: {}]   ;;  %s8047_s8 = inlined_call_operand.vmem [shape: f32[1,128], index: 8, kind: input, shape index: {}]   ;;  %s8048_s9 = inlined_call_operand.vmem [shape: f32[1,128], index: 9, kind: input, shape index: {}]   ;;  %s8049_s10 = inlined_call_operand.hbm [shape: f32[2,256,128], index: 10, kind: output, shape index: {}]  }
   0x1   :  { %8057 = sst [smem:[#allocation100_spill]] %s8041_s2 }
   0x2   :  { %15 = vsyncpa [#allocation4], 0 }
   0x3   :  { %17 = vsyncpa [#allocation4 + $0x1], 0 }
   0x4   :  { %18 = vsyncpa [#allocation7], 0 }
   0x5   :  { %19 = vsyncpa [#allocation5], 0 }
   0x6   :  { %21 = vsyncpa [#allocation5 + $0x1], 0  ;;  %s5410_s13 = smov 0   ;;  %s5412_s14 = smov 0  }
   0x7   :  { %s5414_s15 = smov 0   ;;  %s5416_s16 = smov 0  }
   0x8 LB: > { %8058 = sst [smem:[#allocation12_spill]] %s5343_s15  ;;  %s5431_s17 = sadd.s32 4294967295, %s5347_s16   ;;  %s5347_s16 = sphi %s5416_s16, %s8333_s16   ;;  %s5343_s15 = sphi %s5414_s15, %s8330_s15   ;;  %s5339_s14 = sphi %s5412_s14, %s8332_s14   ;;  %s5335_s13 = sphi %s5410_s13, %s8331_s13  }
   0x9   : > { %s4561_s18 = sadd.s32 4294967294, %s5347_s16   ;;  %p47_p0 = scmp.ne.s32.totalorder %s5339_s14, %s5335_s13 }
   0xa   : > { %p48_p1 = scmp.eq.s32.totalorder %s5431_s17, 0  ;;  %p260_p2 = scmp.eq.s32.totalorder %s5431_s17, 1 }
   0xb   : > { %p266_p3 = scmp.eq.s32.totalorder %s4561_s18, 1  ;;  %p4562_p5 = scmp.ge.s32.totalorder %s5347_s16, 1 }
   0xc   : > { %p5440_p4 = por %p48_p1, %p47_p0  ;;  %p273_p7 = scmp.lt.s32.totalorder %s5347_s16, 3 }
   0xd   : > { %p5445_p6 = por %p266_p3, %p47_p0  ;;  %s8062_s2 = sld [smem:[#allocation100_spill]] }
   0xe   : > { %p5453_p8 = pnand %p4562_p5, %p273_p7  ;;  %s5349_s25 = smov [#allocation6]  }
   0xf   : > { %s8060_s20 = scalar_select %p5445_p6, 1, 0 }
  0x10   : > { %p5063_p9 = pneg %p5453_p8  ;;  %s289_s26 = sshll.u32 %s5349_s25, 4  ;;  %s290_s26 = int_to_ptr.vmem [resolvable:$true] %s289_s26 }
  0x11   : > { %8061 = sst [smem:[#allocation13_spill]] %s8060_s20  ;;  %s5463_s27 = sadd.s32 1, %s5347_s16  }
  0x12   : > { %p5064_p10 = pnand %p5063_p9, %p48_p1  ;;  %s8051_s28 = smov 128  }
  0x13   : > { %s287_s23 = sshll.u32 %s8062_s2, 4  ;;  %s8052_s29 = smov 8   ;;  %s288_s23 = int_to_ptr.hbm [resolvable:$true] %s287_s23 }
  0x14   : > { %5066 = dma.hbm_to_vmem [thread:$0]  (!%p5064_p10), %s288_s23, 4608, %s290_s26, [#allocation7], %s8051_s28, %s8051_s28, %s8052_s29  }
  0x15   : > { %s31_s30 = ssub.s32 %s5347_s16, %s5463_s27  ;;  %s34_s11 = sadd.s32 1, %s5343_s15 }
  0x16   : > { %p32_p12 = scmp.eq.s32.totalorder %s31_s30, 0  ;;  %p41_p13 = scmp.ne.s32.totalorder %s5343_s15, %s5339_s14 }
  0x17   : > { %p42_p0 = scmp.eq.s32.totalorder %s5347_s16, 0  ;;  %p5076_p5 = scmp.lt.s32.totalorder %s5347_s16, 2 }
  0x18   : > { %s5475_s12 = scalar_select %p32_p12, %s5343_s15, %s34_s11  }
  0x19   : > { %p5479_p3 = por %p260_p2, %p41_p13  ;;  %s324_s21 = sand.u32 1, %s5343_s15  }
  0x1a   : > { %8064 = sst [smem:[#allocation14_spill]] %s5475_s12  ;;  %s5041_s22 = sshll.u32 %s5347_s16, 8 }
  0x1b   : > { %p43_p7 = por %p42_p0, %p41_p13  ;;  %s4565_s25 = sshll.u32 %s324_s21, 8 }
  0x1c   : > { %s333_s23 = scalar_lea.hbm %s8039_s0, %s5041_s22  ;;  %s328_s30 = scalar_lea.vmem [#allocation3], %s4565_s25 }
  0x1d   : > { %s334_s26 = sshll.u32 %s333_s23, 4  ;;  %s336_s28 = sshll.u32 %s328_s30, 4  ;;  %s335_s26 = int_to_ptr.hbm [resolvable:$true] %s334_s26  ;;  %s337_s28 = int_to_ptr.vmem [resolvable:$true] %s336_s28 }
  0x1e   : > { %p5489_p9 = pnand %p5076_p5, %p43_p7  ;;  %s325_s29 = scalar_lea.sflag [#allocation4], %s324_s21 }
  0x1f   : > { %s5247_s12 = sshra.s32 %s335_s26, 4  ;;  %s5254_s22 = scalar_lea.hbm %s8039_s0, 512  ;;  %s5248_s12 = int_to_ptr.hbm [resolvable:$true] %s5247_s12 }
  0x20   : > { %s5249_s15 = scalar_lea.hbm %s5248_s12, 256  ;;  %p5251_p10 = pneg %p5489_p9 }
  0x21   : > { %p5250_p2 = scmp.ne.s32.totalorder %s5248_s12, %s5249_s15  ;;  %p5255_p0 = scmp.lt.s32.totalorder %s5248_s12, %s8039_s0 }
  0x22   : > { %p5256_p5 = scmp.lt.s32.totalorder %s5254_s22, %s5249_s15 }
  0x23   : > { %p5252_p12 = pnand %p5251_p10, %p5250_p2 }
  0x24   : > { %p5257_p7 = por %p5256_p5, %p5255_p0 }
  0x25   : > { %p5253_p13 = pneg %p5252_p12 }
  0x27   : > { %p5258_p11 = pnand %p5257_p7, %p5253_p13 }
  0x29   : > { %5261 = shalt.err (!%p5258_p11)
}
  0x2a   : > { %s8067_s21 = smov 8   ;;  %s8068_s30 = smov 128  }
  0x2b   : > { %5070 = dma.hbm_to_vmem [thread:$0]  (!%p5489_p9), %s335_s26, 4096, %s337_s28, %s325_s29, %s8068_s30, %s8068_s30, %s8067_s21  }
  0x2c   : > { %348 = sbr.rel (%p5453_p8) target bundleno = 1627 (0x65b), region = 60 }
  0x31   : > { %s5509_s2 = sand.u32 1, %s5339_s14  }
  0x32   : > { %s4569_s15 = sshll.u32 %s5509_s2, 8  ;;  %s351_s12 = scalar_lea.sflag [#allocation4], %s5509_s2 }
  0x33   : > { %s5515_s20 = scalar_lea.vmem [#allocation3], %s4569_s15 }
  0x34   : > { %5322 = dma.done.wait (%p5440_p4), %s351_s12, 4096  }
  0x35   : > { %5324 = vsyncadd (%p5440_p4), %s351_s12, 4294963200 }
  0x36   : > { %5326 = dma.done.wait (%p48_p1), [#allocation7], 4608  }
  0x37   : > { %5328 = vsyncadd (%p48_p1), [#allocation7], 4294962688  ;;  %v444_v0 = vld [vmem:[%s8040_s1 + $0x78] sm:$0xff]  ;;  %v443_v1 = vld [vmem:[%s8040_s1 + $0x70] sm:$0xff]  ;;  %vm662_vm0 = vcmask 261120   ;;  %v5352_v30 = vmov 0.0  }
  0x38   : > { %445 = vmatpush.msra.mxu0 %v444_v0  ;;  %v442_v2 = vld [vmem:[%s8040_s1 + $0x68] sm:$0xff]  ;;  %v441_v3 = vld [vmem:[%s8040_s1 + $0x60] sm:$0xff]  ;;  %v440_v4 = vld [vmem:[%s8040_s1 + $0x58] sm:$0xff]  ;;  %663 = vst.msk [vmem:[#allocation2] sm:$0xff] %vm662_vm0, %v5352_v30  ;;  %vm671_vm1 = vcmask 253952   ;;  %vm688_vm2 = vcmask 260096  }
  0x39   : > { %v439_v5 = vld [vmem:[%s8040_s1 + $0x50] sm:$0xff]  ;;  %v438_v6 = vld [vmem:[%s8040_s1 + $0x48] sm:$0xff]  ;;  %v437_v7 = vld [vmem:[%s8040_s1 + $0x40] sm:$0xff]  ;;  %664 = vst.msk [vmem:[#allocation2 + $0x8] sm:$0xff] %vm662_vm0, %v5352_v30  ;;  %vm1292_vm3 = vcmask 1046528   ;;  %vm1651_vm4 = vcmask 1045504  }
  0x3a   : > { %446 = vmatpush.msra.mxu0 %v443_v1  ;;  %v436_v8 = vld [vmem:[%s8040_s1 + $0x38] sm:$0xff]  ;;  %v435_v9 = vld [vmem:[%s8040_s1 + $0x30] sm:$0xff]  ;;  %v434_v10 = vld [vmem:[%s8040_s1 + $0x28] sm:$0xff]  ;;  %665 = vst.msk [vmem:[#allocation2 + $0x10] sm:$0xff] %vm662_vm0, %v5352_v30  ;;  %s7507_s11 = scalar_lea.vmem [#allocation8], %s4569_s15  ;;  %s5042_s24 = sshll.u32 %s5431_s17, 8 }
  0x3b   : > { %v433_v11 = vld [vmem:[%s8040_s1 + $0x20] sm:$0xff]  ;;  %v432_v12 = vld [vmem:[%s8040_s1 + $0x18] sm:$0xff]  ;;  %v431_v13 = vld [vmem:[%s8040_s1 + $0x10] sm:$0xff]  ;;  %667 = vst.msk [vmem:[#allocation2 + $0x198] sm:$0xff] %vm662_vm0, %v5352_v30  ;;  %s4474_s26 = scalar_lea.hbm %s8049_s10, %s5042_s24  ;;  %s4475_s15 = sshll.u32 %s7507_s11, 4  ;;  %s4476_s15 = int_to_ptr.vmem [resolvable:$true] %s4475_s15 }
  0x3c   : > { %447 = vmatpush.msra.mxu0 %v442_v2  ;;  %v430_v14 = vld [vmem:[%s8040_s1 + $0x8] sm:$0xff]  ;;  %v429_v15 = vld [vmem:[%s8040_s1] sm:$0xff]  ;;  %v397_v16 = vld [vmem:[%s5515_s20] sm:$0xff]  ;;  %668 = vst.msk [vmem:[#allocation2 + $0x1a0] sm:$0xff] %vm662_vm0, %v5352_v30  ;;  %s4477_s22 = sshll.u32 %s4474_s26, 4  ;;  %s4463_s17 = scalar_lea.sflag [#allocation5], %s5509_s2  ;;  %s4478_s22 = int_to_ptr.hbm [resolvable:$true] %s4477_s22 }
  0x3d   : > { %v398_v17 = vld [vmem:[%s5515_s20 + $0x8] sm:$0xff]  ;;  %v399_v18 = vld [vmem:[%s5515_s20 + $0x10] sm:$0xff]  ;;  %v400_v19 = vld [vmem:[%s5515_s20 + $0x18] sm:$0xff]  ;;  %669 = vst.msk [vmem:[#allocation2 + $0x1a8] sm:$0xff] %vm662_vm0, %v5352_v30  ;;  %s5291_s19 = sshra.s32 %s4478_s22, 4  ;;  %s5297_s30 = scalar_lea.hbm %s8049_s10, 512  ;;  %s5292_s19 = int_to_ptr.hbm [resolvable:$true] %s5291_s19 }
  0x3e   : > { %448 = vmatpush.msra.mxu0 %v441_v3  ;;  %v401_v20 = vld [vmem:[%s5515_s20 + $0x20] sm:$0xff]  ;;  %v402_v21 = vld [vmem:[%s5515_s20 + $0x28] sm:$0xff]  ;;  %v403_v22 = vld [vmem:[%s5515_s20 + $0x30] sm:$0xff]  ;;  %672 = vst.msk [vmem:[#allocation2 + $0x18] sm:$0x1] %vm671_vm1, %v5352_v30  ;;  %s5293_s25 = scalar_lea.hbm %s5292_s19, 256  ;;  %p5298_p11 = scmp.lt.s32.totalorder %s5292_s19, %s8049_s10 }
  0x3f   : > { %v404_v23 = vld [vmem:[%s5515_s20 + $0x38] sm:$0xff]  ;;  %v405_v24 = vld [vmem:[%s5515_s20 + $0x40] sm:$0xff]  ;;  %v406_v25 = vld [vmem:[%s5515_s20 + $0x48] sm:$0xff]  ;;  %673 = vst.msk [vmem:[#allocation2 + $0x30] sm:$0x1] %vm671_vm1, %v5352_v30  ;;  %p5294_p1 = scmp.ne.s32.totalorder %s5292_s19, %s5293_s25  ;;  %p5299_p9 = scmp.lt.s32.totalorder %s5297_s30, %s5293_s25 }
  0x40   : > { %449 = vmatpush.msra.mxu0 %v440_v4  ;;  %v788_v26 = vld [vmem:[#allocation6 + $0x18] sm:$0xff]  ;;  %v787_v28 = vld [vmem:[#allocation6 + $0x10] sm:$0xff]  ;;  %v786_v32 = vld [vmem:[#allocation6 + $0x8] sm:$0xff]  ;;  %674 = vst.msk [vmem:[#allocation2 + $0x48] sm:$0x1] %vm671_vm1, %v5352_v30 }
  0x41   : > { %v1082_v27 = vld [vmem:[#allocation6 + $0x38] sm:$0xff]  ;;  %945 = vmatpush.msra.mxu1 %v788_v26  ;;  %v1081_v29 = vld [vmem:[#allocation6 + $0x30] sm:$0xff]  ;;  %5043 = vmatpush.msra.mxu3 %v788_v26  ;;  %v1080_v33 = vld [vmem:[#allocation6 + $0x28] sm:$0xff]  ;;  %675 = vst.msk [vmem:[#allocation2 + $0x60] sm:$0x1] %vm671_vm1, %v5352_v30  ;;  %p5295_p4 = pnand %p5294_p1, %p5479_p3  ;;  %p5300_p2 = por %p5299_p9, %p5298_p11 }
  0x42   : > { %450 = vmatpush.msra.mxu0 %v439_v5  ;;  %1095 = vmatpush.msra.mxu2 %v1082_v27  ;;  %v407_v31 = vld [vmem:[%s5515_s20 + $0x50] sm:$0xff]  ;;  %v785_v34 = vld [vmem:[#allocation6] sm:$0xff]  ;;  %v408_v37 = vld [vmem:[%s5515_s20 + $0x58] sm:$0xff]  ;;  %676 = vst.msk [vmem:[#allocation2 + $0x78] sm:$0x1] %vm671_vm1, %v5352_v30 }
  0x43   : > { %946 = vmatpush.msra.mxu1 %v787_v28  ;;  %5044 = vmatpush.msra.mxu3 %v787_v28  ;;  %v1079_v35 = vld [vmem:[#allocation6 + $0x20] sm:$0xff]  ;;  %v737_v36 = vld [vmem:[#allocation2] sm:$0xff]  ;;  %v738_v38 = vld [vmem:[#allocation2 + $0x8] sm:$0xff]  ;;  %677 = vst.msk [vmem:[#allocation2 + $0x90] sm:$0x1] %vm671_vm1, %v5352_v30  ;;  %p5296_p8 = pneg %p5295_p4 }
  0x44   : > { %451 = vmatpush.msra.mxu0 %v438_v6  ;;  %1096 = vmatpush.msra.mxu2 %v1081_v29  ;;  %v409_v39 = vld [vmem:[%s5515_s20 + $0x60] sm:$0xff]  ;;  %v410_v41 = vld [vmem:[%s5515_s20 + $0x68] sm:$0xff]  ;;  %678 = vst.msk [vmem:[#allocation2 + $0xa8] sm:$0x1] %vm671_vm1, %v5352_v30  ;;  %v411_v42 = vld [vmem:[%s5515_s20 + $0x70] sm:$0xff] }
  0x45   : > { %947 = vmatpush.msra.mxu1 %v786_v32  ;;  %5045 = vmatpush.msra.mxu3 %v786_v32  ;;  %v739_v40 = vld [vmem:[#allocation2 + $0x10] sm:$0xff]  ;;  %679 = vst.msk [vmem:[#allocation2 + $0xc0] sm:$0x1] %vm671_vm1, %v5352_v30  ;;  %v412_v43 = vld [vmem:[%s5515_s20 + $0x78] sm:$0xff]  ;;  %v5654_v44 = vld [vmem:[%s8043_s4] ss:$0 sm:$0xff]  ;;  %p5301_p10 = pnand %p5300_p2, %p5296_p8 }
  0x46   : > { %452 = vmatpush.msra.mxu0 %v437_v7  ;;  %1097 = vmatpush.msra.mxu2 %v1080_v33  ;;  %680 = vst.msk [vmem:[#allocation2 + $0xd8] sm:$0x1] %vm671_vm1, %v5352_v30  ;;  %v5663_v45 = vld [vmem:[%s8044_s5] ss:$0 sm:$0xff]  ;;  %v413_v47 = vld [vmem:[%s5515_s20 + $0x80] sm:$0xff]  ;;  %v414_v52 = vld [vmem:[%s5515_s20 + $0x88] sm:$0xff] }
  0x47   : > { %948 = vmatpush.msra.mxu1 %v785_v34  ;;  %5046 = vmatpush.msra.mxu3 %v785_v34  ;;  %681 = vst.msk [vmem:[#allocation2 + $0xf0] sm:$0x1] %vm671_vm1, %v5352_v30  ;;  %v415_v58 = vld [vmem:[%s5515_s20 + $0x90] sm:$0xff]  ;;  %v416_v0 = vld [vmem:[%s5515_s20 + $0x98] sm:$0xff]  ;;  %v417_v6 = vld [vmem:[%s5515_s20 + $0xa0] sm:$0xff] }
  0x48   : > { %453 = vmatpush.msra.mxu0 %v436_v8  ;;  %1098 = vmatpush.msra.mxu2 %v1079_v35  ;;  %682 = vst.msk [vmem:[#allocation2 + $0x108] sm:$0x1] %vm671_vm1, %v5352_v30 }
  0x49   : > { %4572 = vmatmul.msk.f32.vlgmr.msra.gmra.mxu1 %vm662_vm0, %v737_v36  ;;  %4620 = vmatmul.msk.f32.vlgmr.msra.gmra.mxu2 %vm662_vm0, %v737_v36  ;;  %683 = vst.msk [vmem:[#allocation2 + $0x120] sm:$0x1] %vm671_vm1, %v5352_v30  ;;  %v422_v36 = vld [vmem:[%s5515_s20 + $0xc8] sm:$0xff] }
  0x4a   : > { %454 = vmatpush.msra.mxu0 %v435_v9  ;;  %5047 = vmatpush.msrb.mxu3 %v1082_v27  ;;  %684 = vst.msk [vmem:[#allocation2 + $0x138] sm:$0x1] %vm671_vm1, %v5352_v30 }
  0x4b   : > { %685 = vst.msk [vmem:[#allocation2 + $0x150] sm:$0x1] %vm671_vm1, %v5352_v30 }
  0x4c   : > { %455 = vmatpush.msra.mxu0 %v434_v10  ;;  %5048 = vmatpush.msrb.mxu3 %v1081_v29  ;;  %686 = vst.msk [vmem:[#allocation2 + $0x168] sm:$0x1] %vm671_vm1, %v5352_v30 }
  0x4d   : > { %687 = vst.msk [vmem:[#allocation2 + $0x180] sm:$0x1] %vm671_vm1, %v5352_v30 }
  0x4e   : > { %456 = vmatpush.msra.mxu0 %v433_v11  ;;  %5049 = vmatpush.msrb.mxu3 %v1080_v33  ;;  %689 = vst.msk [vmem:[#allocation2 + $0x29] sm:$0x7f] %vm688_vm2, %v5352_v30 }
  0x4f   : > { %690 = vst.msk [vmem:[#allocation2 + $0x41] sm:$0x7f] %vm688_vm2, %v5352_v30 }
  0x50   : > { %457 = vmatpush.msra.mxu0 %v432_v12  ;;  %5050 = vmatpush.msrb.mxu3 %v1079_v35  ;;  %691 = vst.msk [vmem:[#allocation2 + $0x59] sm:$0x7f] %vm688_vm2, %v5352_v30  ;;  %v418_v12 = vld [vmem:[%s5515_s20 + $0xa8] sm:$0xff] }
  0x51   : > { %4573 = vmatmul.msk.f32.gmra.mxu1 %vm662_vm0, %v738_v38  ;;  %4621 = vmatmul.msk.f32.gmra.mxu2 %vm662_vm0, %v738_v38  ;;  %692 = vst.msk [vmem:[#allocation2 + $0x71] sm:$0x7f] %vm688_vm2, %v5352_v30 }
  0x52   : > { %458 = vmatpush.msra.mxu0 %v431_v13  ;;  %693 = vst.msk [vmem:[#allocation2 + $0x89] sm:$0x7f] %vm688_vm2, %v5352_v30 }
  0x53   : > { %694 = vst.msk [vmem:[#allocation2 + $0xa1] sm:$0x7f] %vm688_vm2, %v5352_v30 }
  0x54   : > { %459 = vmatpush.msra.mxu0 %v430_v14  ;;  %695 = vst.msk [vmem:[#allocation2 + $0xb9] sm:$0x7f] %vm688_vm2, %v5352_v30 }
  0x55   : > { %696 = vst.msk [vmem:[#allocation2 + $0xd1] sm:$0x7f] %vm688_vm2, %v5352_v30 }
  0x56   : > { %460 = vmatpush.msra.mxu0 %v429_v15  ;;  %697 = vst.msk [vmem:[#allocation2 + $0xe9] sm:$0x7f] %vm688_vm2, %v5352_v30 }
  0x57   : > { %461 = vmatmul.f32.vlgmr.msra.gmra.mxu0 %v397_v16  ;;  %698 = vst.msk [vmem:[#allocation2 + $0x101] sm:$0x7f] %vm688_vm2, %v5352_v30 }
  0x58   : > { %699 = vst.msk [vmem:[#allocation2 + $0x119] sm:$0x7f] %vm688_vm2, %v5352_v30 }
  0x59   : > { %4574 = vmatmul.msk.f32.gmra.mxu1 %vm662_vm0, %v739_v40  ;;  %4622 = vmatmul.msk.f32.gmra.mxu2 %vm662_vm0, %v739_v40  ;;  %700 = vst.msk [vmem:[#allocation2 + $0x131] sm:$0x7f] %vm688_vm2, %v5352_v30 }
  0x5a   : > { %701 = vst.msk [vmem:[#allocation2 + $0x149] sm:$0x7f] %vm688_vm2, %v5352_v30 }
  0x5b   : > { %702 = vst.msk [vmem:[#allocation2 + $0x161] sm:$0x7f] %vm688_vm2, %v5352_v30 }
  0x5c   : > { %703 = vst.msk [vmem:[#allocation2 + $0x179] sm:$0x7f] %vm688_vm2, %v5352_v30 }
  0x5d   : > { %704 = vst.msk [vmem:[#allocation2 + $0x191] sm:$0x7f] %vm688_vm2, %v5352_v30  ;;  %v421_v30 = vld [vmem:[%s5515_s20 + $0xc0] sm:$0xff] }
  0x5f   : > { %464 = vmatmul.f32.gmra.mxu0 %v398_v17 }
  0x67   : > { %467 = vmatmul.f32.gmra.mxu0 %v399_v18  ;;  %v419_v18 = vld [vmem:[%s5515_s20 + $0xb0] sm:$0xff] }
  0x6f   : > { %470 = vmatmul.f32.gmra.mxu0 %v400_v19 }
  0x77   : > { %473 = vmatmul.f32.gmra.mxu0 %v401_v20 }
  0x7f   : > { %476 = vmatmul.f32.gmra.mxu0 %v402_v21 }
  0x87   : > { %479 = vmatmul.f32.gmra.mxu0 %v403_v22 }
  0x8f   : > { %482 = vmatmul.f32.gmra.mxu0 %v404_v23 }
  0x97   : > { %485 = vmatmul.f32.gmra.mxu0 %v405_v24  ;;  %v420_v24 = vld [vmem:[%s5515_s20 + $0xb8] sm:$0xff] }
  0x9f   : > { %488 = vmatmul.f32.gmra.mxu0 %v406_v25 }
  0xa7   : > { %491 = vmatmul.f32.gmra.mxu0 %v407_v31 }
  0xaf   : > { %494 = vmatmul.f32.gmra.mxu0 %v408_v37 }
  0xb7   : > { %497 = vmatmul.f32.gmra.mxu0 %v409_v39 }
  0xbf   : > { %500 = vmatmul.f32.gmra.mxu0 %v410_v41 }
  0xc7   : > { %503 = vmatmul.f32.gmra.mxu0 %v411_v42  ;;  %v423_v42 = vld [vmem:[%s5515_s20 + $0xd0] sm:$0xff] }
  0xcf   : > { %506 = vmatmul.f32.gmra.mxu0 %v412_v43 }
  0xd4   : > { %v462_v46 = vpop.f32.mrf.mxu0 }
  0xd5   : > { %v562_v48 = vmul.f32 %v5654_v44, %v462_v46 }
  0xd7   : > { %v598_v49 = vadd.f32 %v5663_v45, %v562_v48  ;;  %509 = vmatmul.f32.gmra.mxu0 %v413_v47  ;;  %v5778_v47 = vpop.f32.mrf.mxu1 }
  0xd9   : > { %v630_v50 = vmax.f32 %v598_v49, 0.0 }
  0xdb   : > { %705 = vst.msk [vmem:[#allocation2 + $0x19] sm:$0xff] %vm662_vm0, %v630_v50 }
  0xdc   : > { %v465_v51 = vpop.f32.mrf.mxu0 }
  0xdd   : > { %v563_v53 = vmul.f32 %v5654_v44, %v465_v51  ;;  %v424_v51 = vld [vmem:[%s5515_s20 + $0xd8] sm:$0xff] }
  0xdf   : > { %v599_v54 = vadd.f32 %v5663_v45, %v563_v53  ;;  %512 = vmatmul.f32.gmra.mxu0 %v414_v52 }
  0xe1   : > { %v631_v55 = vmax.f32 %v599_v54, 0.0  ;;  %v5790_v54 = vld [vmem:[#allocation6 + $0x78] sm:$0xff] }
  0xe2   : > { %v5688_v56 = vld [vmem:[#allocation2 + $0x18] sm:$0xff]  ;;  %2005 = vmatpush.msrb.mxu0 %v5790_v54 }
  0xe3   : > { %706 = vst.msk [vmem:[#allocation2 + $0x21] sm:$0xff] %vm662_vm0, %v631_v55  ;;  %4575 = vmatmul.msk.f32.gmra.mxu1 %vm662_vm0, %v5688_v56  ;;  %4623 = vmatmul.msk.f32.gmra.mxu2 %vm662_vm0, %v5688_v56  ;;  %v5792_v55 = vpop.f32.mrf.mxu1 }
  0xe4   : > { %v468_v57 = vpop.f32.mrf.mxu0 }
  0xe5   : > { %v564_v59 = vmul.f32 %v5654_v44, %v468_v57 }
  0xe7   : > { %v600_v60 = vadd.f32 %v5663_v45, %v564_v59  ;;  %515 = vmatmul.f32.gmra.mxu0 %v415_v58  ;;  %v5795_v58 = vld [vmem:[#allocation6 + $0x70] sm:$0xff] }
  0xe8   : > { %2006 = vmatpush.msrb.mxu0 %v5795_v58 }
  0xe9   : > { %v632_v61 = vmax.f32 %v600_v60, 0.0  ;;  %v5805_v60 = vld [vmem:[#allocation6 + $0x68] sm:$0xff] }
  0xea   : > { %v5698_v62 = vld [vmem:[#allocation2 + $0x20] sm:$0xff]  ;;  %v5708_v4 = vld [vmem:[#allocation2 + $0x28] sm:$0xff]  ;;  %2007 = vmatpush.msrb.mxu0 %v5805_v60 }
  0xeb   : > { %707 = vst.msk [vmem:[#allocation2 + $0x31] sm:$0xff] %vm662_vm0, %v632_v61  ;;  %4576 = vmatmul.msk.f32.gmra.mxu1 %vm662_vm0, %v5698_v62  ;;  %4624 = vmatmul.msk.f32.gmra.mxu2 %vm662_vm0, %v5698_v62 }
  0xec   : > { %v471_v63 = vpop.f32.mrf.mxu0 }
  0xed   : > { %v565_v1 = vmul.f32 %v5654_v44, %v471_v63  ;;  %v425_v63 = vld [vmem:[%s5515_s20 + $0xe0] sm:$0xff] }
  0xef   : > { %v601_v2 = vadd.f32 %v5663_v45, %v565_v1  ;;  %518 = vmatmul.f32.gmra.mxu0 %v416_v0  ;;  %v5810_v1 = vld [vmem:[#allocation6 + $0x60] sm:$0xff] }
  0xf0   : > { %2008 = vmatpush.msrb.mxu0 %v5810_v1 }
  0xf1   : > { %v633_v3 = vmax.f32 %v601_v2, 0.0 }
  0xf2   : > { %v5718_v10 = vld [vmem:[#allocation2 + $0x30] sm:$0xff] }
  0xf3   : > { %708 = vst.msk [vmem:[#allocation2 + $0x39] sm:$0xff] %vm662_vm0, %v633_v3  ;;  %4577 = vmatmul.msk.f32.gmra.mxu1 %vm662_vm0, %v5708_v4  ;;  %4625 = vmatmul.msk.f32.gmra.mxu2 %vm662_vm0, %v5708_v4  ;;  %v956_v3 = vpop.f32.mrf.mxu1 }
  0xf4   : > { %v474_v5 = vpop.f32.mrf.mxu0 }
  0xf5   : > { %v566_v7 = vmul.f32 %v5654_v44, %v474_v5 }
  0xf7   : > { %v602_v8 = vadd.f32 %v5663_v45, %v566_v7  ;;  %521 = vmatmul.f32.gmra.mxu0 %v417_v6 }
  0xf9   : > { %v634_v9 = vmax.f32 %v602_v8, 0.0  ;;  %v426_v8 = vld [vmem:[%s5515_s20 + $0xe8] sm:$0xff] }
  0xfa   : > { %v5728_v16 = vld [vmem:[#allocation2 + $0x38] sm:$0xff]  ;;  %v5738_v22 = vld [vmem:[#allocation2 + $0x40] sm:$0xff] }
  0xfb   : > { %709 = vst.msk [vmem:[#allocation2 + $0x49] sm:$0xff] %vm662_vm0, %v634_v9  ;;  %4578 = vmatmul.msk.f32.gmra.mxu1 %vm662_vm0, %v5718_v10  ;;  %4626 = vmatmul.msk.f32.gmra.mxu2 %vm662_vm0, %v5718_v10 }
  0xfc   : > { %v477_v11 = vpop.f32.mrf.mxu0 }
  0xfd   : > { %v567_v13 = vmul.f32 %v5654_v44, %v477_v11 }
  0xff   : > { %v603_v14 = vadd.f32 %v5663_v45, %v567_v13  ;;  %524 = vmatmul.f32.gmra.mxu0 %v418_v12 }
 0x101   : > { %v635_v15 = vmax.f32 %v603_v14, 0.0  ;;  %v2174_v14 = vld [vmem:[#allocation6 + $0x98] sm:$0xff] }
 0x102   : > { %v5748_v28 = vld [vmem:[#allocation2 + $0x48] sm:$0xff]  ;;  %2187 = vmatpush.msrb.mxu1 %v2174_v14 }
 0x103   : > { %710 = vst.msk [vmem:[#allocation2 + $0x51] sm:$0xff] %vm662_vm0, %v635_v15  ;;  %4579 = vmatmul.msk.f32.gmra.mxu1 %vm662_vm0, %v5728_v16  ;;  %4627 = vmatmul.msk.f32.gmra.mxu2 %vm662_vm0, %v5728_v16 }
 0x104   : > { %v480_v17 = vpop.f32.mrf.mxu0 }
 0x105   : > { %v568_v19 = vmul.f32 %v5654_v44, %v480_v17  ;;  %v427_v17 = vld [vmem:[%s5515_s20 + $0xf0] sm:$0xff] }
 0x107   : > { %v604_v20 = vadd.f32 %v5663_v45, %v568_v19  ;;  %527 = vmatmul.f32.gmra.mxu0 %v419_v18 }
 0x109   : > { %v636_v21 = vmax.f32 %v604_v20, 0.0  ;;  %v5834_v20 = vpop.f32.mrf.mxu2 }
 0x10a   : > { %v5758_v34 = vld [vmem:[#allocation2 + $0x50] sm:$0xff]  ;;  %v5768_v40 = vld [vmem:[#allocation2 + $0x58] sm:$0xff] }
 0x10b   : > { %711 = vst.msk [vmem:[#allocation2 + $0x61] sm:$0xff] %vm662_vm0, %v636_v21  ;;  %4580 = vmatmul.msk.f32.gmra.mxu1 %vm662_vm0, %v5738_v22  ;;  %4628 = vmatmul.msk.f32.gmra.mxu2 %vm662_vm0, %v5738_v22 }
 0x10c   : > { %v483_v23 = vpop.f32.mrf.mxu0 }
 0x10d   : > { %v569_v25 = vmul.f32 %v5654_v44, %v483_v23 }
 0x10f   : > { %v605_v26 = vadd.f32 %v5663_v45, %v569_v25  ;;  %530 = vmatmul.f32.gmra.mxu0 %v420_v24  ;;  %v428_v25 = vld [vmem:[%s5515_s20 + $0xf8] sm:$0xff] }
 0x111   : > { %v637_v27 = vmax.f32 %v605_v26, 0.0 }
 0x112   : > { %v5780_v49 = vld [vmem:[#allocation2 + $0x60] sm:$0xff] }
 0x113   : > { %712 = vst.msk [vmem:[#allocation2 + $0x69] sm:$0xff] %vm662_vm0, %v637_v27  ;;  %4581 = vmatmul.msk.f32.gmra.mxu1 %vm662_vm0, %v5748_v28  ;;  %4629 = vmatmul.msk.f32.gmra.mxu2 %vm662_vm0, %v5748_v28 }
 0x114   : > { %v486_v29 = vpop.f32.mrf.mxu0 }
 0x115   : > { %v570_v31 = vmul.f32 %v5654_v44, %v486_v29 }
 0x117   : > { %v606_v32 = vadd.f32 %v5663_v45, %v570_v31  ;;  %533 = vmatmul.f32.gmra.mxu0 %v421_v30  ;;  %v5848_v31 = vpop.f32.mrf.mxu2 }
 0x119   : > { %v638_v33 = vmax.f32 %v606_v32, 0.0 }
 0x11a   : > { %v5797_v59 = vld [vmem:[#allocation2 + $0x68] sm:$0xff]  ;;  %v5814_v6 = vld [vmem:[#allocation2 + $0x70] sm:$0xff] }
 0x11b   : > { %713 = vst.msk [vmem:[#allocation2 + $0x79] sm:$0xff] %vm662_vm0, %v638_v33  ;;  %4582 = vmatmul.msk.f32.gmra.mxu1 %vm662_vm0, %v5758_v34  ;;  %4630 = vmatmul.msk.f32.gmra.mxu2 %vm662_vm0, %v5758_v34 }
 0x11c   : > { %v489_v35 = vpop.f32.mrf.mxu0 }
 0x11d   : > { %v571_v37 = vmul.f32 %v5654_v44, %v489_v35 }
 0x11f   : > { %v607_v38 = vadd.f32 %v5663_v45, %v571_v37  ;;  %536 = vmatmul.f32.gmra.mxu0 %v422_v36 }
 0x121   : > { %v639_v39 = vmax.f32 %v607_v38, 0.0 }
 0x122   : > { %v5824_v13 = vld [vmem:[#allocation2 + $0x78] sm:$0xff] }
 0x123   : > { %714 = vst.msk [vmem:[#allocation2 + $0x81] sm:$0xff] %vm662_vm0, %v639_v39  ;;  %4583 = vmatmul.msk.f32.gmra.mxu1 %vm662_vm0, %v5768_v40  ;;  %4631 = vmatmul.msk.f32.gmra.mxu2 %vm662_vm0, %v5768_v40  ;;  %v5866_v39 = vpop.f32.mrf.mxu2 }
 0x124   : > { %v492_v41 = vpop.f32.mrf.mxu0 }
 0x125   : > { %v572_v43 = vmul.f32 %v5654_v44, %v492_v41 }
 0x127   : > { %v608_v46 = vadd.f32 %v5663_v45, %v572_v43  ;;  %539 = vmatmul.f32.gmra.mxu0 %v423_v42 }
 0x129   : > { %v640_v48 = vmax.f32 %v608_v46, 0.0 }
 0x12a   : > { %v5836_v23 = vld [vmem:[#allocation2 + $0x80] sm:$0xff]  ;;  %v5846_v30 = vld [vmem:[#allocation2 + $0x88] sm:$0xff] }
 0x12b   : > { %715 = vst.msk [vmem:[#allocation2 + $0x91] sm:$0xff] %vm662_vm0, %v640_v48  ;;  %4584 = vmatmul.msk.f32.gmra.mxu1 %vm662_vm0, %v5780_v49  ;;  %4632 = vmatmul.msk.f32.gmra.mxu2 %vm662_vm0, %v5780_v49 }
 0x12c   : > { %v495_v50 = vpop.f32.mrf.mxu0 }
 0x12d   : > { %v573_v52 = vmul.f32 %v5654_v44, %v495_v50 }
 0x12f   : > { %v609_v53 = vadd.f32 %v5663_v45, %v573_v52  ;;  %542 = vmatmul.f32.gmra.mxu0 %v424_v51 }
 0x131   : > { %v641_v57 = vmax.f32 %v609_v53, 0.0 }
 0x132   : > { %v5859_v37 = vld [vmem:[#allocation2 + $0x90] sm:$0xff] }
 0x133   : > { %716 = vst.msk [vmem:[#allocation2 + $0x99] sm:$0xff] %vm662_vm0, %v641_v57  ;;  %4585 = vmatmul.msk.f32.gmra.mxu1 %vm662_vm0, %v5797_v59  ;;  %4633 = vmatmul.msk.f32.gmra.mxu2 %vm662_vm0, %v5797_v59 }
 0x134   : > { %v498_v61 = vpop.f32.mrf.mxu0 }
 0x135   : > { %v574_v0 = vmul.f32 %v5654_v44, %v498_v61 }
 0x137   : > { %v610_v2 = vadd.f32 %v5663_v45, %v574_v0  ;;  %545 = vmatmul.f32.gmra.mxu0 %v425_v63 }
 0x139   : > { %v642_v5 = vmax.f32 %v610_v2, 0.0 }
 0x13a   : > { %v5872_v48 = vld [vmem:[#allocation2 + $0x98] sm:$0xff]  ;;  %v5883_v63 = vld [vmem:[#allocation2 + $0xa0] sm:$0xff] }
 0x13b   : > { %717 = vst.msk [vmem:[#allocation2 + $0xa9] sm:$0xff] %vm662_vm0, %v642_v5  ;;  %4586 = vmatmul.msk.f32.gmra.mxu1 %vm662_vm0, %v5814_v6  ;;  %4634 = vmatmul.msk.f32.gmra.mxu2 %vm662_vm0, %v5814_v6 }
 0x13c   : > { %v501_v7 = vpop.f32.mrf.mxu0 }
 0x13d   : > { %v575_v9 = vmul.f32 %v5654_v44, %v501_v7 }
 0x13f   : > { %v611_v11 = vadd.f32 %v5663_v45, %v575_v9  ;;  %548 = vmatmul.f32.gmra.mxu0 %v426_v8 }
 0x141   : > { %v643_v12 = vmax.f32 %v611_v11, 0.0 }
 0x143   : > { %718 = vst.msk [vmem:[#allocation2 + $0xb1] sm:$0xff] %vm662_vm0, %v643_v12  ;;  %4587 = vmatmul.msk.f32.gmra.mxu1 %vm662_vm0, %v5824_v13  ;;  %4635 = vmatmul.msk.f32.gmra.mxu2 %vm662_vm0, %v5824_v13 }
 0x144   : > { %v504_v15 = vpop.f32.mrf.mxu0 }
 0x145   : > { %v576_v18 = vmul.f32 %v5654_v44, %v504_v15 }
 0x147   : > { %v612_v19 = vadd.f32 %v5663_v45, %v576_v18  ;;  %551 = vmatmul.f32.gmra.mxu0 %v427_v17  ;;  %v5901_v17 = vld [vmem:[#allocation2 + $0xa8] sm:$0xff] }
 0x149   : > { %v644_v21 = vmax.f32 %v612_v19, 0.0 }
 0x14b   : > { %719 = vst.msk [vmem:[#allocation2 + $0xc1] sm:$0xff] %vm662_vm0, %v644_v21  ;;  %4588 = vmatmul.msk.f32.gmra.mxu1 %vm662_vm0, %v5836_v23  ;;  %4636 = vmatmul.msk.f32.gmra.mxu2 %vm662_vm0, %v5836_v23 }
 0x14c   : > { %v507_v24 = vpop.f32.mrf.mxu0 }
 0x14d   : > { %v577_v26 = vmul.f32 %v5654_v44, %v507_v24 }
 0x14f   : > { %v613_v27 = vadd.f32 %v5663_v45, %v577_v26  ;;  %554 = vmatmul.f32.gmra.mxu0 %v428_v25 }
 0x151   : > { %v645_v29 = vmax.f32 %v613_v27, 0.0 }
 0x153   : > { %720 = vst.msk [vmem:[#allocation2 + $0xc9] sm:$0xff] %vm662_vm0, %v645_v29  ;;  %4589 = vmatmul.msk.f32.gmra.mxu1 %vm662_vm0, %v5846_v30  ;;  %4637 = vmatmul.msk.f32.gmra.mxu2 %vm662_vm0, %v5846_v30 }
 0x154   : > { %v510_v32 = vpop.f32.mrf.mxu0 }
 0x155   : > { %v578_v33 = vmul.f32 %v5654_v44, %v510_v32 }
 0x157   : > { %v614_v35 = vadd.f32 %v5663_v45, %v578_v33  ;;  %4716 = vmatmul.msk.f32.vlgmr.msrb.gmra.mxu0 %vm662_vm0, %v5688_v56 }
 0x159   : > { %v646_v36 = vmax.f32 %v614_v35, 0.0  ;;  %v5919_v35 = vld [vmem:[#allocation2 + $0xb0] sm:$0xff] }
 0x15b   : > { %721 = vst.msk [vmem:[#allocation2 + $0xd9] sm:$0xff] %vm662_vm0, %v646_v36  ;;  %4590 = vmatmul.msk.f32.gmra.mxu1 %vm662_vm0, %v5859_v37  ;;  %4638 = vmatmul.msk.f32.gmra.mxu2 %vm662_vm0, %v5859_v37 }
 0x15c   : > { %v513_v38 = vpop.f32.mrf.mxu0 }
 0x15d   : > { %v579_v41 = vmul.f32 %v5654_v44, %v513_v38 }
 0x15f   : > { %v615_v42 = vadd.f32 %v5663_v45, %v579_v41  ;;  %4717 = vmatmul.msk.f32.gmra.mxu0 %vm662_vm0, %v5698_v62 }
 0x160   : > { %v958_v43 = vpop.f32.mrf.mxu1 }
 0x161   : > { %v647_v46 = vmax.f32 %v615_v42, 0.0 }
 0x163   : > { %722 = vst.msk [vmem:[#allocation2 + $0xe1] sm:$0xff] %vm662_vm0, %v647_v46  ;;  %4591 = vmatmul.msk.f32.gmra.mxu1 %vm662_vm0, %v5872_v48  ;;  %4639 = vmatmul.msk.f32.gmra.mxu2 %vm662_vm0, %v5872_v48 }
 0x164   : > { %v516_v50 = vpop.f32.mrf.mxu0 }
 0x165   : > { %v580_v51 = vmul.f32 %v5654_v44, %v516_v50 }
 0x166   : > { %v1109_v52 = vpop.f32.mrf.mxu2 }
 0x167   : > { %v616_v53 = vadd.f32 %v5663_v45, %v580_v51  ;;  %4718 = vmatmul.msk.f32.gmra.mxu0 %vm662_vm0, %v5708_v4  ;;  %v1298_v7 = vrot.slane %v1109_v52, 1  ;;  %v5934_v51 = vld [vmem:[#allocation2 + $0xb8] sm:$0xff] }
 0x168   : > { %v961_v57 = vpop.f32.mrf.mxu1 }
 0x169   : > { %v648_v61 = vmax.f32 %v616_v53, 0.0  ;;  %v2173_v53 = vld [vmem:[#allocation6 + $0x90] sm:$0xff] }
 0x16a   : > { %v5885_v0 = vld [vmem:[#allocation2 + $0xe8] sm:$0xff]  ;;  %2188 = vmatpush.msrb.mxu1 %v2173_v53  ;;  %v2171_v53 = vld [vmem:[#allocation6 + $0x80] sm:$0xff] }
 0x16b   : > { %723 = vst.msk [vmem:[#allocation2 + $0xf1] sm:$0xff] %vm662_vm0, %v648_v61  ;;  %4592 = vmatmul.msk.f32.gmra.mxu1 %vm662_vm0, %v5883_v63  ;;  %4601 = vmatmul.msk.f32.vlgmr.msra.gmra.mxu3 %vm662_vm0, %v5885_v0 }
 0x16c   : > { %4640 = vmatmul.msk.f32.gmra.mxu2 %vm662_vm0, %v5883_v63  ;;  %v519_v2 = vpop.f32.mrf.mxu0 }
 0x16d   : > { %v581_v3 = vmul.f32 %v5654_v44, %v519_v2 }
 0x16e   : > { %v1112_v5 = vpop.f32.mrf.mxu2 }
 0x16f   : > { %v617_v8 = vadd.f32 %v5663_v45, %v581_v3  ;;  %v1299_v9 = vrot.slane %v1112_v5, 1  ;;  %4719 = vmatmul.msk.f32.gmra.mxu0 %vm662_vm0, %v5718_v10 }
 0x170   : > { %v964_v11 = vpop.f32.mrf.mxu1 }
 0x171   : > { %v649_v12 = vmax.f32 %v617_v8, 0.0  ;;  %v1300_v14 = vsel %vm1292_vm3, %v1298_v7, %v1299_v9 }
 0x172   : > { %v5899_v15 = vadd.f32 %v1300_v14, %v958_v43  ;;  %v5903_v18 = vld [vmem:[#allocation2 + $0xf0] sm:$0xff] }
 0x173   : > { %724 = vst.msk [vmem:[#allocation2 + $0xf9] sm:$0xff] %vm662_vm0, %v649_v12  ;;  %4593 = vmatmul.msk.f32.gmra.mxu1 %vm662_vm0, %v5901_v17  ;;  %4602 = vmatmul.msk.f32.gmra.mxu3 %vm662_vm0, %v5903_v18 }
 0x174   : > { %4641 = vmatmul.msk.f32.gmra.mxu2 %vm662_vm0, %v5901_v17  ;;  %v522_v19 = vpop.f32.mrf.mxu0 }
 0x175   : > { %v582_v21 = vmul.f32 %v5654_v44, %v522_v19  ;;  %v5954_v19 = vld [vmem:[#allocation2 + $0xc0] sm:$0xff] }
 0x176   : > { %v1115_v24 = vpop.f32.mrf.mxu2 }
 0x177   : > { %v618_v25 = vadd.f32 %v5663_v45, %v582_v21  ;;  %v1301_v26 = vrot.slane %v1115_v24, 1  ;;  %4720 = vmatmul.msk.f32.gmra.mxu0 %vm662_vm0, %v5728_v16 }
 0x178   : > { %v966_v27 = vpop.f32.mrf.mxu1 }
 0x179   : > { %v650_v29 = vmax.f32 %v618_v25, 0.0  ;;  %v1302_v32 = vsel %vm1292_vm3, %v1299_v9, %v1301_v26 }
 0x17a   : > { %v5917_v33 = vadd.f32 %v1302_v32, %v961_v57  ;;  %v5921_v36 = vld [vmem:[#allocation2 + $0xf8] sm:$0xff]  ;;  %v5936_v52 = vld [vmem:[#allocation2 + $0x100] sm:$0xff] }
 0x17b   : > { %725 = vst.msk [vmem:[#allocation2 + $0x109] sm:$0xff] %vm662_vm0, %v650_v29  ;;  %4594 = vmatmul.msk.f32.gmra.mxu1 %vm662_vm0, %v5919_v35  ;;  %4603 = vmatmul.msk.f32.gmra.mxu3 %vm662_vm0, %v5921_v36  ;;  %v2172_v32 = vld [vmem:[#allocation6 + $0x88] sm:$0xff] }
 0x17c   : > { %4642 = vmatmul.msk.f32.gmra.mxu2 %vm662_vm0, %v5919_v35  ;;  %v525_v38 = vpop.f32.mrf.mxu0  ;;  %2189 = vmatpush.msrb.mxu1 %v2172_v32 }
 0x17d   : > { %v583_v41 = vmul.f32 %v5654_v44, %v525_v38 }
 0x17e   : > { %v1118_v42 = vpop.f32.mrf.mxu2  ;;  %2190 = vmatpush.msrb.mxu1 %v2171_v53 }
 0x17f   : > { %v619_v43 = vadd.f32 %v5663_v45, %v583_v41  ;;  %4721 = vmatmul.msk.f32.gmra.mxu0 %vm662_vm0, %v5738_v22  ;;  %v1303_v3 = vrot.slane %v1118_v42, 1 }
 0x180   : > { %v969_v46 = vpop.f32.mrf.mxu1 }
 0x181   : > { %v651_v50 = vmax.f32 %v619_v43, 0.0  ;;  %v5970_v43 = vld [vmem:[#allocation2 + $0xc8] sm:$0xff] }
 0x182   : > { %v5949_v9 = vld [vmem:[#allocation2 + $0x108] sm:$0xff] }
 0x183   : > { %726 = vst.msk [vmem:[#allocation2 + $0x111] sm:$0xff] %vm662_vm0, %v651_v50  ;;  %4595 = vmatmul.msk.f32.gmra.mxu1 %vm662_vm0, %v5934_v51  ;;  %4604 = vmatmul.msk.f32.gmra.mxu3 %vm662_vm0, %v5936_v52 }
 0x184   : > { %4643 = vmatmul.msk.f32.gmra.mxu2 %vm662_vm0, %v5934_v51  ;;  %v528_v57 = vpop.f32.mrf.mxu0 }
 0x185   : > { %v584_v61 = vmul.f32 %v5654_v44, %v528_v57 }
 0x186   : > { %v1121_v2 = vpop.f32.mrf.mxu2 }
 0x187   : > { %v620_v5 = vadd.f32 %v5663_v45, %v584_v61  ;;  %v1304_v7 = vrot.slane %v1121_v2, 1  ;;  %4722 = vmatmul.msk.f32.gmra.mxu0 %vm662_vm0, %v5748_v28 }
 0x188   : > { %v972_v8 = vpop.f32.mrf.mxu1 }
 0x189   : > { %v652_v11 = vmax.f32 %v620_v5, 0.0  ;;  %v1305_v12 = vsel %vm1292_vm3, %v1303_v3, %v1304_v7 }
 0x18a   : > { %v5952_v14 = vadd.f32 %v1305_v12, %v966_v27  ;;  %v5972_v50 = vld [vmem:[#allocation2 + $0x110] sm:$0xff]  ;;  %v5987_v8 = vld [vmem:[#allocation2 + $0x118] sm:$0xff] }
 0x18b   : > { %727 = vst.msk [vmem:[#allocation2 + $0x121] sm:$0xff] %vm662_vm0, %v652_v11  ;;  %4596 = vmatmul.msk.f32.gmra.mxu1 %vm662_vm0, %v5954_v19  ;;  %4605 = vmatmul.msk.f32.gmra.mxu3 %vm662_vm0, %v5949_v9 }
 0x18c   : > { %4644 = vmatmul.msk.f32.gmra.mxu2 %vm662_vm0, %v5954_v19  ;;  %v531_v21 = vpop.f32.mrf.mxu0 }
 0x18d   : > { %v585_v24 = vmul.f32 %v5654_v44, %v531_v21 }
 0x18e   : > { %v1124_v25 = vpop.f32.mrf.mxu2 }
 0x18f   : > { %v621_v26 = vadd.f32 %v5663_v45, %v585_v24  ;;  %v1306_v27 = vrot.slane %v1124_v25, 1  ;;  %4723 = vmatmul.msk.f32.gmra.mxu0 %vm662_vm0, %v5758_v34 }
 0x190   : > { %v974_v29 = vpop.f32.mrf.mxu1 }
 0x191   : > { %v653_v38 = vmax.f32 %v621_v26, 0.0  ;;  %v1307_v41 = vsel %vm1292_vm3, %v1304_v7, %v1306_v27  ;;  %v5985_v7 = vld [vmem:[#allocation2 + $0xd0] sm:$0xff] }
 0x192   : > { %v5968_v42 = vadd.f32 %v1307_v41, %v969_v46  ;;  %v6000_v32 = vld [vmem:[#allocation2 + $0x120] sm:$0xff] }
 0x193   : > { %728 = vst.msk [vmem:[#allocation2 + $0x129] sm:$0xff] %vm662_vm0, %v653_v38  ;;  %4597 = vmatmul.msk.f32.gmra.mxu1 %vm662_vm0, %v5970_v43  ;;  %4606 = vmatmul.msk.f32.gmra.mxu3 %vm662_vm0, %v5972_v50 }
 0x194   : > { %8069 = vst [vmem:[#allocation15_spill] sm:$0xff] %v5968_v42  ;;  %4645 = vmatmul.msk.f32.gmra.mxu2 %vm662_vm0, %v5970_v43  ;;  %v534_v57 = vpop.f32.mrf.mxu0 }
 0x195   : > { %v586_v46 = vmul.f32 %v5654_v44, %v534_v57  ;;  %v6005_v57 = vld [vmem:[#allocation2 + $0xd8] sm:$0xff] }
 0x196   : > { %v1127_v61 = vpop.f32.mrf.mxu2 }
 0x197   : > { %v622_v2 = vadd.f32 %v5663_v45, %v586_v46  ;;  %4724 = vmatmul.msk.f32.gmra.mxu0 %vm662_vm0, %v5768_v40  ;;  %v1308_v24 = vrot.slane %v1127_v61, 1 }
 0x198   : > { %v977_v3 = vpop.f32.mrf.mxu1 }
 0x199   : > { %v654_v5 = vmax.f32 %v622_v2, 0.0 }
 0x19b   : > { %729 = vst.msk [vmem:[#allocation2 + $0x139] sm:$0xff] %vm662_vm0, %v654_v5  ;;  %4598 = vmatmul.msk.f32.gmra.mxu1 %vm662_vm0, %v5985_v7  ;;  %4607 = vmatmul.msk.f32.gmra.mxu3 %vm662_vm0, %v5987_v8 }
 0x19c   : > { %4646 = vmatmul.msk.f32.gmra.mxu2 %vm662_vm0, %v5985_v7  ;;  %v537_v11 = vpop.f32.mrf.mxu0 }
 0x19d   : > { %v587_v12 = vmul.f32 %v5654_v44, %v537_v11 }
 0x19e   : > { %v1130_v21 = vpop.f32.mrf.mxu2 }
 0x19f   : > { %v623_v25 = vadd.f32 %v5663_v45, %v587_v12  ;;  %v1309_v26 = vrot.slane %v1130_v21, 1  ;;  %4725 = vmatmul.msk.f32.gmra.mxu0 %vm662_vm0, %v5780_v49 }
 0x1a0   : > { %v980_v27 = vpop.f32.mrf.mxu1 }
 0x1a1   : > { %v655_v38 = vmax.f32 %v623_v25, 0.0  ;;  %v1310_v41 = vsel %vm1292_vm3, %v1308_v24, %v1309_v26  ;;  %v6021_v25 = vld [vmem:[#allocation2 + $0xe0] sm:$0xff]  ;;  %v6023_v27 = vld [vmem:[#allocation2 + $0x128] sm:$0xff] }
 0x1a2   : > { %v6003_v53 = vadd.f32 %v1310_v41, %v974_v29 }
 0x1a3   : > { %730 = vst.msk [vmem:[#allocation2 + $0x141] sm:$0xff] %vm662_vm0, %v655_v38  ;;  %4599 = vmatmul.msk.f32.gmra.mxu1 %vm662_vm0, %v6005_v57  ;;  %4608 = vmatmul.msk.f32.gmra.mxu3 %vm662_vm0, %v6000_v32 }
 0x1a4   : > { %8070 = vst [vmem:[#allocation16_spill] sm:$0xff] %v6003_v53  ;;  %4647 = vmatmul.msk.f32.gmra.mxu2 %vm662_vm0, %v6005_v57  ;;  %v540_v46 = vpop.f32.mrf.mxu0 }
 0x1a5   : > { %v588_v61 = vmul.f32 %v5654_v44, %v540_v46 }
 0x1a6   : > { %v1133_v2 = vpop.f32.mrf.mxu2 }
 0x1a7   : > { %v624_v29 = vadd.f32 %v5663_v45, %v588_v61  ;;  %v1311_v5 = vrot.slane %v1133_v2, 1  ;;  %4726 = vmatmul.msk.f32.gmra.mxu0 %vm662_vm0, %v5797_v59  ;;  %v6036_v2 = vld [vmem:[#allocation2 + $0x130] sm:$0xff] }
 0x1a8   : > { %v982_v11 = vpop.f32.mrf.mxu1 }
 0x1a9   : > { %v656_v12 = vmax.f32 %v624_v29, 0.0  ;;  %v1312_v21 = vsel %vm1292_vm3, %v1309_v26, %v1311_v5 }
 0x1aa   : > { %v6019_v24 = vadd.f32 %v1312_v21, %v977_v3 }
 0x1ab   : > { %731 = vst.msk [vmem:[#allocation2 + $0x151] sm:$0xff] %vm662_vm0, %v656_v12  ;;  %4600 = vmatmul.msk.f32.gmra.mxu1 %vm662_vm0, %v6021_v25  ;;  %4609 = vmatmul.msk.f32.gmra.mxu3 %vm662_vm0, %v6023_v27 }
 0x1ac   : > { %8071 = vst [vmem:[#allocation17_spill] sm:$0xff] %v6019_v24  ;;  %4648 = vmatmul.msk.f32.gmra.mxu2 %vm662_vm0, %v6021_v25  ;;  %v543_v38 = vpop.f32.mrf.mxu0 }
 0x1ad   : > { %v589_v26 = vmul.f32 %v5654_v44, %v543_v38 }
 0x1ae   : > { %v1136_v3 = vpop.f32.mrf.mxu2 }
 0x1af   : > { %v625_v41 = vadd.f32 %v5663_v45, %v589_v26  ;;  %4727 = vmatmul.msk.f32.gmra.mxu0 %vm662_vm0, %v5814_v6  ;;  %v1313_v21 = vrot.slane %v1136_v3, 1 }
 0x1b0   : > { %v985_v46 = vpop.f32.mrf.mxu1 }
 0x1b1   : > { %v657_v61 = vmax.f32 %v625_v41, 0.0 }
 0x1b3   : > { %732 = vst.msk [vmem:[#allocation2 + $0x159] sm:$0xff] %vm662_vm0, %v657_v61  ;;  %4610 = vmatmul.msk.f32.gmra.mxu3 %vm662_vm0, %v6036_v2  ;;  %4764 = vmatmul.msk.f32.vlgmr.msrb.gmra.mxu1 %vm662_vm0, %v5688_v56  ;;  %v6049_v61 = vld [vmem:[#allocation2 + $0x138] sm:$0xff] }
 0x1b4   : > { %4649 = vmatmul.msk.f32.gmra.mxu2 %vm662_vm0, %v5885_v0  ;;  %v546_v29 = vpop.f32.mrf.mxu0 }
 0x1b5   : > { %v590_v5 = vmul.f32 %v5654_v44, %v546_v29 }
 0x1b6   : > { %v1139_v12 = vpop.f32.mrf.mxu2 }
 0x1b7   : > { %v626_v38 = vadd.f32 %v5663_v45, %v590_v5  ;;  %v1314_v26 = vrot.slane %v1139_v12, 1  ;;  %4728 = vmatmul.msk.f32.gmra.mxu0 %vm662_vm0, %v5824_v13 }
 0x1b8   : > { %v988_v41 = vpop.f32.mrf.mxu1 }
 0x1b9   : > { %v658_v24 = vmax.f32 %v626_v38, 0.0  ;;  %v1315_v56 = vsel %vm1292_vm3, %v1313_v21, %v1314_v26 }
 0x1ba   : > { %v6052_v53 = vadd.f32 %v1315_v56, %v982_v11 }
 0x1bb   : > { %733 = vst.msk [vmem:[#allocation2 + $0x169] sm:$0xff] %vm662_vm0, %v658_v24  ;;  %4611 = vmatmul.msk.f32.gmra.mxu3 %vm662_vm0, %v6049_v61  ;;  %4765 = vmatmul.msk.f32.gmra.mxu1 %vm662_vm0, %v5698_v62  ;;  %v6068_v62 = vld [vmem:[#allocation2 + $0x140] sm:$0xff] }
 0x1bc   : > { %8072 = vst [vmem:[#allocation18_spill] sm:$0xff] %v6052_v53  ;;  %4650 = vmatmul.msk.f32.gmra.mxu2 %vm662_vm0, %v5903_v18  ;;  %v549_v3 = vpop.f32.mrf.mxu0 }
 0x1bd   : > { %v591_v29 = vmul.f32 %v5654_v44, %v549_v3 }
 0x1be   : > { %v1142_v5 = vpop.f32.mrf.mxu2 }
 0x1bf   : > { %v627_v12 = vadd.f32 %v5663_v45, %v591_v29  ;;  %v1316_v21 = vrot.slane %v1142_v5, 1  ;;  %4729 = vmatmul.msk.f32.gmra.mxu0 %vm662_vm0, %v5836_v23 }
 0x1c0   : > { %v990_v11 = vpop.f32.mrf.mxu1 }
 0x1c1   : > { %v659_v24 = vmax.f32 %v627_v12, 0.0  ;;  %v1317_v38 = vsel %vm1292_vm3, %v1314_v26, %v1316_v21  ;;  %v6081_v12 = vld [vmem:[#allocation2 + $0x148] sm:$0xff] }
 0x1c2   : > { %v6066_v41 = vadd.f32 %v1317_v38, %v985_v46  ;;  %v2532_v21 = vld [vmem:[#allocation6 + $0xb8] sm:$0xff] }
 0x1c3   : > { %734 = vst.msk [vmem:[#allocation2 + $0x171] sm:$0xff] %vm662_vm0, %v659_v24  ;;  %4612 = vmatmul.msk.f32.gmra.mxu3 %vm662_vm0, %v6068_v62  ;;  %4766 = vmatmul.msk.f32.gmra.mxu1 %vm662_vm0, %v5708_v4 }
 0x1c4   : > { %8073 = vst [vmem:[#allocation19_spill] sm:$0xff] %v6066_v41  ;;  %4651 = vmatmul.msk.f32.gmra.mxu2 %vm662_vm0, %v5921_v36  ;;  %v552_v56 = vpop.f32.mrf.mxu0  ;;  %v6094_v41 = vld [vmem:[#allocation2 + $0x150] sm:$0xff] }
 0x1c5   : > { %v592_v3 = vmul.f32 %v5654_v44, %v552_v56  ;;  %2545 = vmatpush.msrb.mxu2 %v2532_v21  ;;  %v6113_v21 = vld [vmem:[#allocation2 + $0x158] sm:$0xff] }
 0x1c6   : > { %v1145_v29 = vpop.f32.mrf.mxu2 }
 0x1c7   : > { %v628_v46 = vadd.f32 %v5663_v45, %v592_v3  ;;  %4730 = vmatmul.msk.f32.gmra.mxu0 %vm662_vm0, %v5846_v30  ;;  %v1318_v56 = vrot.slane %v1145_v29, 1 }
 0x1c8   : > { %v993_v26 = vpop.f32.mrf.mxu1 }
 0x1c9   : > { %v660_v5 = vmax.f32 %v628_v46, 0.0 }
 0x1cb   : > { %735 = vst.msk [vmem:[#allocation2 + $0x181] sm:$0xff] %vm662_vm0, %v660_v5  ;;  %4613 = vmatmul.msk.f32.gmra.mxu3 %vm662_vm0, %v6081_v12  ;;  %4767 = vmatmul.msk.f32.gmra.mxu1 %vm662_vm0, %v5718_v10 }
 0x1cc   : > { %4652 = vmatmul.msk.f32.gmra.mxu2 %vm662_vm0, %v5936_v52  ;;  %v555_v4 = vpop.f32.mrf.mxu0 }
 0x1cd   : > { %v593_v24 = vmul.f32 %v5654_v44, %v555_v4 }
 0x1ce   : > { %v1148_v38 = vpop.f32.mrf.mxu2 }
 0x1cf   : > { %v629_v3 = vadd.f32 %v5663_v45, %v593_v24  ;;  %v1319_v46 = vrot.slane %v1148_v38, 1  ;;  %4731 = vmatmul.msk.f32.gmra.mxu0 %vm662_vm0, %v5859_v37 }
 0x1d0   : > { %v996_v5 = vpop.f32.mrf.mxu1 }
 0x1d1   : > { %v661_v10 = vmax.f32 %v629_v3, 0.0  ;;  %v1320_v53 = vsel %vm1292_vm3, %v1318_v56, %v1319_v46  ;;  %v1441_v56 = vld [vmem:[#allocation6 + $0x58] sm:$0xff] }
 0x1d2   : > { %v6097_v42 = vadd.f32 %v1320_v53, %v990_v11  ;;  %1454 = vmatpush.msra.mxu3 %v1441_v56 }
 0x1d3   : > { %736 = vst.msk [vmem:[#allocation2 + $0x189] sm:$0xff] %vm662_vm0, %v661_v10  ;;  %4614 = vmatmul.msk.f32.gmra.mxu3 %vm662_vm0, %v6094_v41  ;;  %4768 = vmatmul.msk.f32.gmra.mxu1 %vm662_vm0, %v5728_v16 }
 0x1d4   : > { %4653 = vmatmul.msk.f32.gmra.mxu2 %vm662_vm0, %v5949_v9  ;;  %v6106_v44 = vpop.f32.mrf.mxu0 }
 0x1d6   : > { %v1151_v45 = vpop.f32.mrf.mxu2 }
 0x1d7   : > { %v1321_v29 = vrot.slane %v1151_v45, 1  ;;  %4732 = vmatmul.msk.f32.gmra.mxu0 %vm662_vm0, %v5872_v48  ;;  %v6135_v45 = vld [vmem:[#allocation2 + $0x168] sm:$0xff] }
 0x1d8   : > { %v998_v53 = vpop.f32.mrf.mxu1 }
 0x1d9   : > { %v1322_v11 = vsel %vm1292_vm3, %v1319_v46, %v1321_v29 }
 0x1da   : > { %v6111_v4 = vadd.f32 %v1322_v11, %v993_v26  ;;  %v6125_v26 = vld [vmem:[#allocation2 + $0x160] sm:$0xff] }
 0x1db   : > { %4615 = vmatmul.msk.f32.gmra.mxu3 %vm662_vm0, %v6113_v21  ;;  %4769 = vmatmul.msk.f32.gmra.mxu1 %vm662_vm0, %v5738_v22 }
 0x1dc   : > { %8074 = vst [vmem:[#allocation20_spill] sm:$0xff] %v6111_v4  ;;  %4654 = vmatmul.msk.f32.gmra.mxu2 %vm662_vm0, %v5972_v50  ;;  %v6121_v16 = vpop.f32.mrf.mxu0 }
 0x1de   : > { %v1154_v24 = vpop.f32.mrf.mxu2 }
 0x1df   : > { %4733 = vmatmul.msk.f32.gmra.mxu0 %vm662_vm0, %v5883_v63  ;;  %v1323_v46 = vrot.slane %v1154_v24, 1 }
 0x1e0   : > { %v1001_v38 = vpop.f32.mrf.mxu1 }
 0x1e3   : > { %4616 = vmatmul.msk.f32.gmra.mxu3 %vm662_vm0, %v6125_v26  ;;  %4770 = vmatmul.msk.f32.gmra.mxu1 %vm662_vm0, %v5748_v28  ;;  %v1440_v28 = vld [vmem:[#allocation6 + $0x50] sm:$0xff] }
 0x1e4   : > { %4655 = vmatmul.msk.f32.gmra.mxu2 %vm662_vm0, %v5987_v8  ;;  %v2016_v22 = vpop.f32.mrf.mxu0  ;;  %1455 = vmatpush.msra.mxu3 %v1440_v28 }
 0x1e6   : > { %v1157_v3 = vpop.f32.mrf.mxu2 }
 0x1e7   : > { %v1324_v5 = vrot.slane %v1157_v3, 1  ;;  %4734 = vmatmul.msk.f32.gmra.mxu0 %vm662_vm0, %v5901_v17 }
 0x1e8   : > { %v1004_v10 = vpop.f32.mrf.mxu1 }
 0x1e9   : > { %v1325_v29 = vsel %vm1292_vm3, %v1323_v46, %v1324_v5  ;;  %v1439_v46 = vld [vmem:[#allocation6 + $0x48] sm:$0xff] }
 0x1ea   : > { %v6138_v11 = vadd.f32 %v1325_v29, %v998_v53  ;;  %1456 = vmatpush.msra.mxu3 %v1439_v46  ;;  %v6151_v29 = vld [vmem:[#allocation2 + $0x170] sm:$0xff] }
 0x1eb   : > { %4617 = vmatmul.msk.f32.gmra.mxu3 %vm662_vm0, %v6135_v45  ;;  %4771 = vmatmul.msk.f32.gmra.mxu1 %vm662_vm0, %v5758_v34 }
 0x1ec   : > { %8075 = vst [vmem:[#allocation21_spill] sm:$0xff] %v6138_v11  ;;  %4656 = vmatmul.msk.f32.gmra.mxu2 %vm662_vm0, %v6000_v32  ;;  %v6146_v24 = vpop.f32.mrf.mxu0 }
 0x1ee   : > { %v1028_v22 = vpop.f32.mrf.mxu3 }
 0x1ef   : > { %v1160_v56 = vpop.f32.mrf.mxu2  ;;  %4735 = vmatmul.msk.f32.gmra.mxu0 %vm662_vm0, %v5919_v35  ;;  %v1438_v22 = vld [vmem:[#allocation6 + $0x40] sm:$0xff] }
 0x1f0   : > { %v1326_v53 = vrot.slane %v1160_v56, 1  ;;  %v1006_v3 = vpop.f32.mrf.mxu1  ;;  %1457 = vmatpush.msra.mxu3 %v1438_v22 }
 0x1f2   : > { %v1327_v10 = vsel %vm1292_vm3, %v1324_v5, %v1326_v53  ;;  %v6167_v53 = vld [vmem:[#allocation2 + $0x178] sm:$0xff] }
 0x1f3   : > { %v6153_v34 = vadd.f32 %v1327_v10, %v1001_v38  ;;  %4618 = vmatmul.msk.f32.gmra.mxu3 %vm662_vm0, %v6151_v29  ;;  %4772 = vmatmul.msk.f32.gmra.mxu1 %vm662_vm0, %v5768_v40 }
 0x1f4   : > { %4657 = vmatmul.msk.f32.gmra.mxu2 %vm662_vm0, %v6023_v27  ;;  %v6161_v28 = vpop.f32.mrf.mxu0 }
 0x1f5   : > { %8076 = vst [vmem:[#allocation22_spill] sm:$0xff] %v6153_v34 }
 0x1f6   : > { %v6163_v56 = vpop.f32.mrf.mxu3 }
 0x1f7   : > { %8077 = vst [vmem:[#allocation23_spill] sm:$0xff] %v6163_v56  ;;  %v1163_v5 = vpop.f32.mrf.mxu2  ;;  %4736 = vmatmul.msk.f32.gmra.mxu0 %vm662_vm0, %v5934_v51 }
 0x1f8   : > { %v1009_v38 = vpop.f32.mrf.mxu1  ;;  %v1328_v22 = vrot.slane %v1163_v5, 1 }
 0x1fb   : > { %4619 = vmatmul.msk.f32.gmra.mxu3 %vm662_vm0, %v6167_v53  ;;  %4773 = vmatmul.msk.f32.gmra.mxu1 %vm662_vm0, %v5780_v49 }
 0x1fc   : > { %4658 = vmatmul.msk.f32.gmra.mxu2 %vm662_vm0, %v6036_v2  ;;  %v2024_v40 = vpop.f32.mrf.mxu0 }
 0x1fe   : > { %v6175_v46 = vpop.f32.mrf.mxu3 }
 0x1ff   : > { %8078 = vst [vmem:[#allocation24_spill] sm:$0xff] %v6175_v46  ;;  %v1166_v10 = vpop.f32.mrf.mxu2  ;;  %4737 = vmatmul.msk.f32.gmra.mxu0 %vm662_vm0, %v5954_v19 }
 0x200   : > { %v1329_v56 = vrot.slane %v1166_v10, 1  ;;  %v1012_v34 = vpop.f32.mrf.mxu1 }
 0x202   : > { %v1330_v11 = vsel %vm1292_vm3, %v1328_v22, %v1329_v56 }
 0x203   : > { %v6180_v4 = vadd.f32 %v1330_v11, %v1006_v3  ;;  %4665 = vmatmul.msk.f32.vlgmr.msrb.gmra.mxu3 %vm662_vm0, %v6135_v45  ;;  %4774 = vmatmul.msk.f32.gmra.mxu1 %vm662_vm0, %v5797_v59 }
 0x204   : > { %4659 = vmatmul.msk.f32.gmra.mxu2 %vm662_vm0, %v6049_v61  ;;  %v6188_v49 = vpop.f32.mrf.mxu0  ;;  %5051 = vmatpush.msrb.mxu3 %v5790_v54 }
 0x205   : > { %8079 = vst [vmem:[#allocation25_spill] sm:$0xff] %v6180_v4  ;;  %v5136_v4 = vld [vmem:[#allocation2 + $0x68] sm:$0xff] }
 0x206   : > { %v1036_v5 = vpop.f32.mrf.mxu3  ;;  %5052 = vmatpush.msrb.mxu3 %v5795_v58 }
 0x207   : > { %v1169_v34 = vpop.f32.mrf.mxu2  ;;  %4738 = vmatmul.msk.f32.gmra.mxu0 %vm662_vm0, %v5970_v43 }
 0x208   : > { %v1331_v11 = vrot.slane %v1169_v34, 1  ;;  %v1014_v3 = vpop.f32.mrf.mxu1  ;;  %5053 = vmatpush.msrb.mxu3 %v5805_v60  ;;  %v2531_v60 = vld [vmem:[#allocation6 + $0xb0] sm:$0xff] }
 0x209   : > { %2546 = vmatpush.msrb.mxu2 %v2531_v60 }
 0x20a   : > { %v1332_v59 = vsel %vm1292_vm3, %v1329_v56, %v1331_v11  ;;  %5054 = vmatpush.msrb.mxu3 %v5810_v1  ;;  %v2530_v56 = vld [vmem:[#allocation6 + $0xa8] sm:$0xff] }
 0x20b   : > { %v6197_v40 = vadd.f32 %v1332_v59, %v1009_v38  ;;  %4666 = vmatmul.msk.f32.gmra.mxu3 %vm662_vm0, %v6151_v29  ;;  %4775 = vmatmul.msk.f32.gmra.mxu1 %vm662_vm0, %v5814_v6  ;;  %v2529_v38 = vld [vmem:[#allocation6 + $0xa0] sm:$0xff] }
 0x20c   : > { %4660 = vmatmul.msk.f32.gmra.mxu2 %vm662_vm0, %v6068_v62  ;;  %v6205_v54 = vpop.f32.mrf.mxu0 }
 0x20d   : > { %8080 = vst [vmem:[#allocation26_spill] sm:$0xff] %v6197_v40  ;;  %2547 = vmatpush.msrb.mxu2 %v2530_v56 }
 0x20e   : > { %v6207_v58 = vpop.f32.mrf.mxu3 }
 0x20f   : > { %8081 = vst [vmem:[#allocation27_spill] sm:$0xff] %v6207_v58  ;;  %v1172_v10 = vpop.f32.mrf.mxu2  ;;  %4739 = vmatmul.msk.f32.gmra.mxu0 %vm662_vm0, %v5985_v7  ;;  %2548 = vmatpush.msrb.mxu2 %v2529_v38  ;;  %v5123_v58 = vld [vmem:[#allocation2] sm:$0xff] }
 0x210   : > { %v1017_v1 = vpop.f32.mrf.mxu1  ;;  %v1333_v34 = vrot.slane %v1172_v10, 1 }
 0x213   : > { %4667 = vmatmul.msk.f32.gmra.mxu3 %vm662_vm0, %v6167_v53  ;;  %4776 = vmatmul.msk.f32.gmra.mxu1 %vm662_vm0, %v5824_v13 }
 0x214   : > { %4661 = vmatmul.msk.f32.gmra.mxu2 %vm662_vm0, %v6081_v12  ;;  %v2032_v6 = vpop.f32.mrf.mxu0 }
 0x216   : > { %v6217_v22 = vpop.f32.mrf.mxu3 }
 0x217   : > { %8082 = vst [vmem:[#allocation28_spill] sm:$0xff] %v6217_v22  ;;  %v1175_v5 = vpop.f32.mrf.mxu2  ;;  %4740 = vmatmul.msk.f32.gmra.mxu0 %vm662_vm0, %v6005_v57 }
 0x218   : > { %v1334_v11 = vrot.slane %v1175_v5, 1  ;;  %v1020_v59 = vpop.f32.mrf.mxu1 }
 0x21a   : > { %v1335_v60 = vsel %vm1292_vm3, %v1333_v34, %v1334_v11 }
 0x21b   : > { %v6222_v56 = vadd.f32 %v1335_v60, %v1014_v3  ;;  %4668 = vmatmul.msk.f32.vlgmr.msra.gmra.mxu3 %vm662_vm0, %v5123_v58  ;;  %4777 = vmatmul.msk.f32.gmra.mxu1 %vm662_vm0, %v5836_v23  ;;  %v5124_v58 = vld [vmem:[#allocation2 + $0x8] sm:$0xff] }
 0x21c   : > { %4662 = vmatmul.msk.f32.gmra.mxu2 %vm662_vm0, %v6094_v41  ;;  %v6229_v13 = vpop.f32.mrf.mxu0 }
 0x21d   : > { %8083 = vst [vmem:[#allocation29_spill] sm:$0xff] %v6222_v56  ;;  %v5132_v56 = vld [vmem:[#allocation2 + $0x48] sm:$0xff] }
 0x21e   : > { %v1044_v38 = vpop.f32.mrf.mxu3 }
 0x21f   : > { %v1178_v6 = vpop.f32.mrf.mxu2  ;;  %4741 = vmatmul.msk.f32.gmra.mxu0 %vm662_vm0, %v6021_v25  ;;  %v3623_v38 = vld [vmem:[#allocation6 + $0x118] sm:$0xff] }
 0x220   : > { %v1336_v10 = vrot.slane %v1178_v6, 1  ;;  %v1022_v5 = vpop.f32.mrf.mxu1  ;;  %3636 = vmatpush.msra.mxu1 %v3623_v38 }
 0x222   : > { %v1337_v3 = vsel %vm1292_vm3, %v1334_v11, %v1336_v10 }
 0x223   : > { %v6234_v34 = vadd.f32 %v1337_v3, %v1017_v1  ;;  %4669 = vmatmul.msk.f32.gmra.mxu3 %vm662_vm0, %v5124_v58  ;;  %4778 = vmatmul.msk.f32.gmra.mxu1 %vm662_vm0, %v5846_v30  ;;  %v5125_v1 = vld [vmem:[#allocation2 + $0x10] sm:$0xff] }
 0x224   : > { %4663 = vmatmul.msk.f32.gmra.mxu2 %vm662_vm0, %v6113_v21  ;;  %v6241_v23 = vpop.f32.mrf.mxu0 }
 0x225   : > { %8084 = vst [vmem:[#allocation30_spill] sm:$0xff] %v6234_v34 }
 0x226   : > { %v6243_v59 = vpop.f32.mrf.mxu3 }
 0x227   : > { %8085 = vst [vmem:[#allocation31_spill] sm:$0xff] %v6243_v59  ;;  %v1181_v60 = vpop.f32.mrf.mxu2  ;;  %4742 = vmatmul.msk.f32.gmra.mxu0 %vm662_vm0, %v5885_v0 }
 0x228   : > { %v1025_v11 = vpop.f32.mrf.mxu1  ;;  %v1338_v3 = vrot.slane %v1181_v60, 1 }
 0x22b   : > { %4670 = vmatmul.msk.f32.gmra.mxu3 %vm662_vm0, %v5125_v1  ;;  %4779 = vmatmul.msk.f32.gmra.mxu1 %vm662_vm0, %v5859_v37  ;;  %v5126_v37 = vld [vmem:[#allocation2 + $0x18] sm:$0xff] }
 0x22c   : > { %4664 = vmatmul.msk.f32.gmra.mxu2 %vm662_vm0, %v6125_v26  ;;  %v2040_v30 = vpop.f32.mrf.mxu0 }
 0x22e   : > { %v6252_v6 = vpop.f32.mrf.mxu3 }
 0x22f   : > { %8086 = vst [vmem:[#allocation32_spill] sm:$0xff] %v6252_v6  ;;  %v1184_v10 = vpop.f32.mrf.mxu2  ;;  %4743 = vmatmul.msk.f32.gmra.mxu0 %vm662_vm0, %v5903_v18 }
 0x230   : > { %v1339_v58 = vrot.slane %v1184_v10, 1  ;;  %v6256_v59 = vpop.f32.mrf.mxu1 }
 0x232   : > { %v1340_v1 = vsel %vm1292_vm3, %v1338_v3, %v1339_v58 }
 0x233   : > { %v6259_v22 = vadd.f32 %v1340_v1, %v1022_v5  ;;  %4671 = vmatmul.msk.f32.gmra.mxu3 %vm662_vm0, %v5126_v37  ;;  %4780 = vmatmul.msk.f32.gmra.mxu1 %vm662_vm0, %v5872_v48  ;;  %v5127_v1 = vld [vmem:[#allocation2 + $0x20] sm:$0xff] }
 0x234   : > { %4812 = vmatmul.msk.f32.vlgmr.msrb.gmra.mxu2 %vm662_vm0, %v5126_v37  ;;  %v6265_v38 = vpop.f32.mrf.mxu0 }
 0x235   : > { %8087 = vst [vmem:[#allocation33_spill] sm:$0xff] %v6259_v22 }
 0x236   : > { %v1052_v30 = vpop.f32.mrf.mxu3 }
 0x237   : > { %v1187_v6 = vpop.f32.mrf.mxu2  ;;  %4744 = vmatmul.msk.f32.gmra.mxu0 %vm662_vm0, %v5921_v36 }
 0x238   : > { %v1341_v60 = vrot.slane %v1187_v6, 1  ;;  %v6269_v10 = vpop.f32.mrf.mxu1 }
 0x23a   : > { %v1342_v5 = vsel %vm1292_vm3, %v1339_v58, %v1341_v60 }
 0x23b   : > { %v6272_v3 = vadd.f32 %v1342_v5, %v1025_v11  ;;  %4672 = vmatmul.msk.f32.gmra.mxu3 %vm662_vm0, %v5127_v1  ;;  %4781 = vmatmul.msk.f32.gmra.mxu1 %vm662_vm0, %v5883_v63  ;;  %v5128_v11 = vld [vmem:[#allocation2 + $0x28] sm:$0xff] }
 0x23c   : > { %4813 = vmatmul.msk.f32.gmra.mxu2 %vm662_vm0, %v5127_v1  ;;  %v6278_v48 = vpop.f32.mrf.mxu0 }
 0x23d   : > { %8088 = vst [vmem:[#allocation34_spill] sm:$0xff] %v6272_v3  ;;  %v5129_v3 = vld [vmem:[#allocation2 + $0x30] sm:$0xff] }
 0x23e   : > { %8089 = vst [vmem:[#allocation35_spill] sm:$0xff] %v6278_v48  ;;  %v6280_v37 = vpop.f32.mrf.mxu3 }
 0x23f   : > { %8090 = vst [vmem:[#allocation36_spill] sm:$0xff] %v6280_v37  ;;  %v1190_v30 = vpop.f32.mrf.mxu2  ;;  %4745 = vmatmul.msk.f32.gmra.mxu0 %vm662_vm0, %v5936_v52 }
 0x240   : > { %v6284_v6 = vpop.f32.mrf.mxu1  ;;  %v1343_v5 = vrot.slane %v1190_v30, 1 }
 0x243   : > { %4673 = vmatmul.msk.f32.gmra.mxu3 %vm662_vm0, %v5128_v11  ;;  %4782 = vmatmul.msk.f32.gmra.mxu1 %vm662_vm0, %v5901_v17 }
 0x244   : > { %4814 = vmatmul.msk.f32.gmra.mxu2 %vm662_vm0, %v5128_v11  ;;  %v2048_v63 = vpop.f32.mrf.mxu0 }
 0x246   : > { %v6290_v58 = vpop.f32.mrf.mxu3 }
 0x247   : > { %8091 = vst [vmem:[#allocation37_spill] sm:$0xff] %v6290_v58  ;;  %v1193_v60 = vpop.f32.mrf.mxu2  ;;  %4746 = vmatmul.msk.f32.gmra.mxu0 %vm662_vm0, %v5949_v9  ;;  %v5130_v58 = vld [vmem:[#allocation2 + $0x38] sm:$0xff] }
 0x248   : > { %v1344_v1 = vrot.slane %v1193_v60, 1  ;;  %v6294_v37 = vpop.f32.mrf.mxu1 }
 0x24a   : > { %v6297_v46 = vsel %vm1292_vm3, %v1343_v5, %v1344_v1 }
 0x24b   : > { %8092 = vst [vmem:[#allocation38_spill] sm:$0xff] %v6297_v46  ;;  %4674 = vmatmul.msk.f32.gmra.mxu3 %vm662_vm0, %v5129_v3  ;;  %4783 = vmatmul.msk.f32.gmra.mxu1 %vm662_vm0, %v5919_v35 }
 0x24c   : > { %4815 = vmatmul.msk.f32.gmra.mxu2 %vm662_vm0, %v5129_v3  ;;  %v6303_v17 = vpop.f32.mrf.mxu0 }
 0x24d   : > { %8093 = vst [vmem:[#allocation39_spill] sm:$0xff] %v6303_v17 }
 0x24e   : > { %v1060_v11 = vpop.f32.mrf.mxu3 }
 0x24f   : > { %v1196_v63 = vpop.f32.mrf.mxu2  ;;  %4747 = vmatmul.msk.f32.gmra.mxu0 %vm662_vm0, %v5972_v50 }
 0x250   : > { %v1346_v30 = vrot.slane %v1196_v63, 1  ;;  %v6307_v60 = vpop.f32.mrf.mxu1 }
 0x252   : > { %v6310_v5 = vsel %vm1292_vm3, %v1344_v1, %v1346_v30  ;;  %v5131_v1 = vld [vmem:[#allocation2 + $0x40] sm:$0xff]  ;;  %v3265_v30 = vld [vmem:[#allocation6 + $0xf8] sm:$0xff] }
 0x253   : > { %8094 = vst [vmem:[#allocation40_spill] sm:$0xff] %v6310_v5  ;;  %4675 = vmatmul.msk.f32.gmra.mxu3 %vm662_vm0, %v5130_v58  ;;  %4784 = vmatmul.msk.f32.gmra.mxu1 %vm662_vm0, %v5934_v51 }
 0x254   : > { %4816 = vmatmul.msk.f32.gmra.mxu2 %vm662_vm0, %v5130_v58  ;;  %v6316_v35 = vpop.f32.mrf.mxu0  ;;  %3278 = vmatpush.msra.mxu0 %v3265_v30 }
 0x255   : > { %8095 = vst [vmem:[#allocation41_spill] sm:$0xff] %v6316_v35 }
 0x256   : > { %v6318_v3 = vpop.f32.mrf.mxu3 }
 0x257   : > { %8096 = vst [vmem:[#allocation42_spill] sm:$0xff] %v6318_v3  ;;  %v1199_v11 = vpop.f32.mrf.mxu2  ;;  %4748 = vmatmul.msk.f32.gmra.mxu0 %vm662_vm0, %v5987_v8 }
 0x258   : > { %v6322_v63 = vpop.f32.mrf.mxu1  ;;  %v1348_v5 = vrot.slane %v1199_v11, 1 }
 0x25b   : > { %4676 = vmatmul.msk.f32.gmra.mxu3 %vm662_vm0, %v5131_v1  ;;  %4785 = vmatmul.msk.f32.gmra.mxu1 %vm662_vm0, %v5954_v19 }
 0x25c   : > { %4817 = vmatmul.msk.f32.gmra.mxu2 %vm662_vm0, %v5131_v1  ;;  %v2056_v51 = vpop.f32.mrf.mxu0 }
 0x25d   : > { %v5133_v51 = vld [vmem:[#allocation2 + $0x50] sm:$0xff] }
 0x25e   : > { %v6328_v58 = vpop.f32.mrf.mxu3 }
 0x25f   : > { %8097 = vst [vmem:[#allocation43_spill] sm:$0xff] %v6328_v58  ;;  %v1202_v3 = vpop.f32.mrf.mxu2  ;;  %4749 = vmatmul.msk.f32.gmra.mxu0 %vm662_vm0, %v6000_v32  ;;  %v5134_v58 = vld [vmem:[#allocation2 + $0x58] sm:$0xff] }
 0x260   : > { %v1349_v46 = vrot.slane %v1202_v3, 1  ;;  %v6332_v22 = vpop.f32.mrf.mxu1 }
 0x262   : > { %v6335_v34 = vsel %vm1292_vm3, %v1348_v5, %v1349_v46 }
 0x263   : > { %8098 = vst [vmem:[#allocation44_spill] sm:$0xff] %v6335_v34  ;;  %4677 = vmatmul.msk.f32.gmra.mxu3 %vm662_vm0, %v5132_v56  ;;  %4786 = vmatmul.msk.f32.gmra.mxu1 %vm662_vm0, %v5970_v43 }
 0x264   : > { %4818 = vmatmul.msk.f32.gmra.mxu2 %vm662_vm0, %v5132_v56  ;;  %v6341_v19 = vpop.f32.mrf.mxu0 }
 0x265   : > { %8099 = vst [vmem:[#allocation45_spill] sm:$0xff] %v6341_v19 }
 0x266   : > { %v1068_v1 = vpop.f32.mrf.mxu3 }
 0x267   : > { %v1205_v30 = vpop.f32.mrf.mxu2  ;;  %4750 = vmatmul.msk.f32.gmra.mxu0 %vm662_vm0, %v6023_v27 }
 0x268   : > { %v1351_v3 = vrot.slane %v1205_v30, 1  ;;  %v6345_v11 = vpop.f32.mrf.mxu1 }
 0x26a   : > { %v6348_v5 = vsel %vm1292_vm3, %v1349_v46, %v1351_v3 }
 0x26b   : > { %8100 = vst [vmem:[#allocation46_spill] sm:$0xff] %v6348_v5  ;;  %4678 = vmatmul.msk.f32.gmra.mxu3 %vm662_vm0, %v5133_v51  ;;  %4787 = vmatmul.msk.f32.gmra.mxu1 %vm662_vm0, %v5985_v7 }
 0x26c   : > { %4819 = vmatmul.msk.f32.gmra.mxu2 %vm662_vm0, %v5133_v51  ;;  %v6354_v43 = vpop.f32.mrf.mxu0 }
 0x26d   : > { %8101 = vst [vmem:[#allocation47_spill] sm:$0xff] %v6354_v43  ;;  %v5135_v43 = vld [vmem:[#allocation2 + $0x60] sm:$0xff] }
 0x26e   : > { %v1070_v56 = vpop.f32.mrf.mxu3 }
 0x26f   : > { %v1208_v1 = vpop.f32.mrf.mxu2  ;;  %4751 = vmatmul.msk.f32.gmra.mxu0 %vm662_vm0, %v6036_v2 }
 0x270   : > { %v6358_v30 = vpop.f32.mrf.mxu1  ;;  %v1353_v51 = vrot.slane %v1208_v1, 1 }
 0x273   : > { %4679 = vmatmul.msk.f32.gmra.mxu3 %vm662_vm0, %v5134_v58  ;;  %4788 = vmatmul.msk.f32.gmra.mxu1 %vm662_vm0, %v6005_v57 }
 0x274   : > { %4820 = vmatmul.msk.f32.gmra.mxu2 %vm662_vm0, %v5134_v58  ;;  %v2064_v7 = vpop.f32.mrf.mxu0 }
 0x276   : > { %v6364_v46 = vpop.f32.mrf.mxu3 }
 0x277   : > { %v1211_v3 = vpop.f32.mrf.mxu2  ;;  %4752 = vmatmul.msk.f32.gmra.mxu0 %vm662_vm0, %v6049_v61 }
 0x278   : > { %v1354_v5 = vrot.slane %v1211_v3, 1  ;;  %v6368_v34 = vpop.f32.mrf.mxu1 }
 0x27a   : > { %v6371_v40 = vsel %vm1292_vm3, %v1353_v51, %v1354_v5 }
 0x27b   : > { %8102 = vst [vmem:[#allocation48_spill] sm:$0xff] %v6371_v40  ;;  %4680 = vmatmul.msk.f32.gmra.mxu3 %vm662_vm0, %v5135_v43  ;;  %4789 = vmatmul.msk.f32.gmra.mxu1 %vm662_vm0, %v6021_v25  ;;  %v3264_v40 = vld [vmem:[#allocation6 + $0xf0] sm:$0xff] }
 0x27c   : > { %4821 = vmatmul.msk.f32.gmra.mxu2 %vm662_vm0, %v5135_v43  ;;  %v6377_v57 = vpop.f32.mrf.mxu0  ;;  %3279 = vmatpush.msra.mxu0 %v3264_v40  ;;  %v3263_v43 = vld [vmem:[#allocation6 + $0xe8] sm:$0xff] }
 0x27d   : > { %8103 = vst [vmem:[#allocation49_spill] sm:$0xff] %v6377_v57 }
 0x27e   : > { %v1076_v58 = vpop.f32.mrf.mxu3  ;;  %3280 = vmatpush.msra.mxu0 %v3263_v43 }
 0x27f   : > { %v1214_v7 = vpop.f32.mrf.mxu2  ;;  %4753 = vmatmul.msk.f32.gmra.mxu0 %vm662_vm0, %v6068_v62 }
 0x280   : > { %v1356_v1 = vrot.slane %v1214_v7, 1  ;;  %v6381_v3 = vpop.f32.mrf.mxu1  ;;  %v3262_v7 = vld [vmem:[#allocation6 + $0xe0] sm:$0xff] }
 0x281   : > { %3281 = vmatpush.msra.mxu0 %v3262_v7 }
 0x282   : > { %v6384_v51 = vsel %vm1292_vm3, %v1354_v5, %v1356_v1  ;;  %v3622_v1 = vld [vmem:[#allocation6 + $0x110] sm:$0xff] }
 0x283   : > { %8104 = vst [vmem:[#allocation50_spill] sm:$0xff] %v6384_v51  ;;  %4681 = vmatmul.msk.f32.gmra.mxu3 %vm662_vm0, %v5136_v4  ;;  %4790 = vmatmul.msk.f32.gmra.mxu1 %vm662_vm0, %v5885_v0  ;;  %v5137_v51 = vld [vmem:[#allocation2 + $0x70] sm:$0xff] }
 0x284   : > { %4822 = vmatmul.msk.f32.gmra.mxu2 %vm662_vm0, %v5136_v4  ;;  %v6390_v25 = vpop.f32.mrf.mxu0  ;;  %3637 = vmatpush.msra.mxu1 %v3622_v1 }
 0x285   : > { %8105 = vst [vmem:[#allocation51_spill] sm:$0xff] %v6390_v25 }
 0x286   : > { %v1235_v58 = vpop.f32.mrf.mxu3 }
 0x287   : > { %v1217_v57 = vpop.f32.mrf.mxu2  ;;  %4754 = vmatmul.msk.f32.gmra.mxu0 %vm662_vm0, %v6081_v12  ;;  %v1368_v40 = vrot.slane %v1235_v58, 1 }
 0x288   : > { %v6394_v5 = vpop.f32.mrf.mxu1  ;;  %v1358_v19 = vrot.slane %v1217_v57, 1 }
 0x28b   : > { %4682 = vmatmul.msk.f32.gmra.mxu3 %vm662_vm0, %v5137_v51  ;;  %4791 = vmatmul.msk.f32.gmra.mxu1 %vm662_vm0, %v5903_v18 }
 0x28c   : > { %4823 = vmatmul.msk.f32.gmra.mxu2 %vm662_vm0, %v5137_v51  ;;  %v2072_v0 = vpop.f32.mrf.mxu0  ;;  %v5138_v51 = vld [vmem:[#allocation2 + $0x78] sm:$0xff] }
 0x28e   : > { %v1238_v4 = vpop.f32.mrf.mxu3 }
 0x28f   : > { %v1220_v43 = vpop.f32.mrf.mxu2  ;;  %v1369_v25 = vrot.slane %v1238_v4, 1  ;;  %4755 = vmatmul.msk.f32.gmra.mxu0 %vm662_vm0, %v6094_v41 }
 0x290   : > { %v1359_v7 = vrot.slane %v1220_v43, 1  ;;  %v6402_v35 = vpop.f32.mrf.mxu1 }
 0x291   : > { %v1370_v17 = vsel %vm1292_vm3, %v1368_v40, %v1369_v25  ;;  %v5139_v40 = vld [vmem:[#allocation2 + $0x80] sm:$0xff] }
 0x292   : > { %v6406_v48 = vsel %vm1292_vm3, %v1358_v19, %v1359_v7  ;;  %v6408_v18 = vadd.f32 %v1370_v17, %v1070_v56 }
 0x293   : > { %8106 = vst [vmem:[#allocation52_spill] sm:$0xff] %v6406_v48  ;;  %4683 = vmatmul.msk.f32.gmra.mxu3 %vm662_vm0, %v5138_v51  ;;  %4792 = vmatmul.msk.f32.gmra.mxu1 %vm662_vm0, %v5921_v36 }
 0x294   : > { %8107 = vst [vmem:[#allocation53_spill] sm:$0xff] %v6408_v18  ;;  %4824 = vmatmul.msk.f32.gmra.mxu2 %vm662_vm0, %v5138_v51  ;;  %v6414_v58 = vpop.f32.mrf.mxu0 }
 0x295   : > { %8108 = vst [vmem:[#allocation54_spill] sm:$0xff] %v6414_v58 }
 0x296   : > { %v1241_v57 = vpop.f32.mrf.mxu3 }
 0x297   : > { %v1223_v1 = vpop.f32.mrf.mxu2  ;;  %v1371_v0 = vrot.slane %v1241_v57, 1  ;;  %4756 = vmatmul.msk.f32.gmra.mxu0 %vm662_vm0, %v6113_v21 }
 0x298   : > { %v1361_v19 = vrot.slane %v1223_v1, 1  ;;  %v6418_v4 = vpop.f32.mrf.mxu1  ;;  %v6441_v1 = vld [vmem:[#allocation2 + $0x30] sm:$0xff] }
 0x299   : > { %v1372_v17 = vsel %vm1292_vm3, %v1369_v25, %v1371_v0 }
 0x29a   : > { %v6422_v56 = vsel %vm1292_vm3, %v1359_v7, %v1361_v19  ;;  %v6425_v36 = vadd.f32 %v1372_v17, %v6364_v46  ;;  %v5140_v7 = vld [vmem:[#allocation2 + $0x88] sm:$0xff] }
 0x29b   : > { %8109 = vst [vmem:[#allocation55_spill] sm:$0xff] %v6422_v56  ;;  %4684 = vmatmul.msk.f32.gmra.mxu3 %vm662_vm0, %v5139_v40  ;;  %4793 = vmatmul.msk.f32.gmra.mxu1 %vm662_vm0, %v5936_v52  ;;  %v6492_v56 = vld [vmem:[#allocation2 + $0x48] sm:$0xff] }
 0x29c   : > { %8110 = vst [vmem:[#allocation56_spill] sm:$0xff] %v6425_v36  ;;  %4825 = vmatmul.msk.f32.gmra.mxu2 %vm662_vm0, %v5139_v40  ;;  %v6431_v43 = vpop.f32.mrf.mxu0 }
 0x29d   : > { %8111 = vst [vmem:[#allocation57_spill] sm:$0xff] %v6431_v43 }
 0x29e   : > { %v1459_v51 = vpop.f32.mrf.mxu3 }
 0x29f   : > { %v1226_v57 = vpop.f32.mrf.mxu2  ;;  %4757 = vmatmul.msk.f32.gmra.mxu0 %vm662_vm0, %v6125_v26  ;;  %v1652_v0 = vrot.slane %v1459_v51, 2 }
 0x2a0   : > { %v6435_v25 = vpop.f32.mrf.mxu1  ;;  %v1363_v40 = vrot.slane %v1226_v57, 1  ;;  %v6457_v57 = vld [vmem:[#allocation2 + $0x38] sm:$0xff] }
 0x2a3   : > { %4685 = vmatmul.msk.f32.gmra.mxu3 %vm662_vm0, %v5140_v7  ;;  %4794 = vmatmul.msk.f32.gmra.mxu1 %vm662_vm0, %v5949_v9 }
 0x2a4   : > { %4826 = vmatmul.msk.f32.gmra.mxu2 %vm662_vm0, %v5140_v7  ;;  %v2080_v52 = vpop.f32.mrf.mxu0  ;;  %v5141_v7 = vld [vmem:[#allocation2 + $0x90] sm:$0xff] }
 0x2a6   : > { %v1462_v46 = vpop.f32.mrf.mxu3 }
 0x2a7   : > { %v1229_v19 = vpop.f32.mrf.mxu2  ;;  %v1653_v17 = vrot.slane %v1462_v46, 2  ;;  %4908 = vmatmul.msk.f32.vlgmr.msra.gmra.mxu0 %vm662_vm0, %v6441_v1 }
 0x2a8   : > { %v1364_v43 = vrot.slane %v1229_v19, 1  ;;  %v6445_v58 = vpop.f32.mrf.mxu1 }
 0x2a9   : > { %v1654_v36 = vsel %vm1651_vm4, %v1652_v0, %v1653_v17  ;;  %v1293_v0 = vrot.slane %v5834_v20, 1 }
 0x2aa   : > { %v6449_v9 = vsel %vm1292_vm3, %v1363_v40, %v1364_v43  ;;  %v1294_v40 = vrot.slane %v5848_v31, 1 }
 0x2ab   : > { %8112 = vst [vmem:[#allocation58_spill] sm:$0xff] %v6449_v9  ;;  %4686 = vmatmul.msk.f32.gmra.mxu3 %vm662_vm0, %v5141_v7  ;;  %4795 = vmatmul.msk.f32.gmra.mxu1 %vm662_vm0, %v5972_v50 }
 0x2ac   : > { %4827 = vmatmul.msk.f32.gmra.mxu2 %vm662_vm0, %v5141_v7  ;;  %v6455_v51 = vpop.f32.mrf.mxu0 }
 0x2ad   : > { %8113 = vst [vmem:[#allocation59_spill] sm:$0xff] %v6455_v51  ;;  %v5142_v51 = vld [vmem:[#allocation2 + $0x98] sm:$0xff] }
 0x2ae   : > { %v1465_v52 = vpop.f32.mrf.mxu3 }
 0x2af   : > { %v1232_v46 = vpop.f32.mrf.mxu2  ;;  %v1655_v19 = vrot.slane %v1465_v52, 2  ;;  %4909 = vmatmul.msk.f32.gmra.mxu0 %vm662_vm0, %v6457_v57  ;;  %v1295_v52 = vsel %vm1292_vm3, %v1293_v0, %v1294_v40  ;;  %v2385_v0 = vrot.slane %v6269_v10, 1 }
 0x2b0   : > { %v1366_v18 = vrot.slane %v1232_v46, 1  ;;  %v6463_v9 = vpop.f32.mrf.mxu1  ;;  %v6476_v46 = vld [vmem:[#allocation2 + $0x40] sm:$0xff] }
 0x2b1   : > { %v1656_v50 = vsel %vm1651_vm4, %v1653_v17, %v1655_v19  ;;  %8116 = vst [vmem:[#allocation62_spill] sm:$0xff] %v6476_v46  ;;  %v1405_v17 = vadd.f32 %v1295_v52, %v5778_v47 }
 0x2b2   : > { %v6467_v7 = vsel %vm1292_vm3, %v1364_v43, %v1366_v18  ;;  %v1296_v18 = vrot.slane %v5866_v39, 1  ;;  %v2384_v39 = vrot.slane %v6256_v59, 1 }
 0x2b3   : > { %8114 = vst [vmem:[#allocation60_spill] sm:$0xff] %v6467_v7  ;;  %4687 = vmatmul.msk.f32.gmra.mxu3 %vm662_vm0, %v5142_v51  ;;  %4796 = vmatmul.msk.f32.gmra.mxu1 %vm662_vm0, %v5987_v8  ;;  %v1764_v8 = vadd.f32 %v1654_v36, %v1405_v17  ;;  %v5143_v7 = vld [vmem:[#allocation2 + $0xa0] sm:$0xff] }
 0x2b4   : > { %4828 = vmatmul.msk.f32.gmra.mxu2 %vm662_vm0, %v5142_v51  ;;  %v6474_v20 = vpop.f32.mrf.mxu0  ;;  %v1297_v51 = vsel %vm1292_vm3, %v1294_v40, %v1296_v18 }
 0x2b5   : > { %8115 = vst [vmem:[#allocation61_spill] sm:$0xff] %v6474_v20  ;;  %v2138_v52 = vadd.f32 %v6106_v44, %v1764_v8  ;;  %v1406_v36 = vadd.f32 %v1297_v51, %v5792_v55 }
 0x2b6   : > { %v1468_v31 = vpop.f32.mrf.mxu3 }
 0x2b7   : > { %v2550_v19 = vpop.f32.mrf.mxu2  ;;  %4910 = vmatmul.msk.f32.gmra.mxu0 %vm662_vm0, %v6476_v46  ;;  %v1657_v17 = vrot.slane %v1468_v31, 2  ;;  %v1765_v44 = vadd.f32 %v1656_v50, %v1406_v36  ;;  %v5144_v31 = vld [vmem:[#allocation2 + $0xa8] sm:$0xff] }
 0x2b8   : > { %v6482_v43 = vpop.f32.mrf.mxu1  ;;  %v2742_v10 = vrot.slane %v2550_v19, 2 }
 0x2b9   : > { %v2139_v19 = vadd.f32 %v6121_v16, %v1765_v44 }
 0x2bb   : > { %4688 = vmatmul.msk.f32.gmra.mxu3 %vm662_vm0, %v5143_v7  ;;  %4797 = vmatmul.msk.f32.gmra.mxu1 %vm662_vm0, %v6000_v32  ;;  %v2386_v32 = vsel %vm1292_vm3, %v2384_v39, %v2385_v0 }
 0x2bc   : > { %4829 = vmatmul.msk.f32.gmra.mxu2 %vm662_vm0, %v5143_v7  ;;  %v2088_v47 = vpop.f32.mrf.mxu0  ;;  %v2496_v18 = vadd.f32 %v2386_v32, %v2138_v52 }
 0x2be   : > { %v1471_v20 = vpop.f32.mrf.mxu3 }
 0x2bf   : > { %v1658_v48 = vrot.slane %v1471_v20, 2  ;;  %v2553_v46 = vpop.f32.mrf.mxu2  ;;  %4911 = vmatmul.msk.f32.gmra.mxu0 %vm662_vm0, %v6492_v56 }
 0x2c0   : > { %v2743_v40 = vrot.slane %v2553_v46, 2  ;;  %v6498_v7 = vpop.f32.mrf.mxu1  ;;  %v2387_v46 = vrot.slane %v6284_v6, 1 }
 0x2c1   : > { %v1659_v59 = vsel %vm1651_vm4, %v1657_v17, %v1658_v48 }
 0x2c2   : > { %v1766_v8 = vadd.f32 %v1659_v59, %v5899_v15  ;;  %v2744_v55 = vsel %vm1651_vm4, %v2742_v10, %v2743_v40  ;;  %v6513_v15 = vld [vmem:[#allocation2 + $0x50] sm:$0xff] }
 0x2c3   : > { %4689 = vmatmul.msk.f32.gmra.mxu3 %vm662_vm0, %v5144_v31  ;;  %4798 = vmatmul.msk.f32.gmra.mxu1 %vm662_vm0, %v6023_v27  ;;  %v6506_v20 = vadd.f32 %v2744_v55, %v2496_v18  ;;  %v2388_v27 = vsel %vm1292_vm3, %v2385_v0, %v2387_v46  ;;  %v5145_v10 = vld [vmem:[#allocation2 + $0xb0] sm:$0xff]  ;;  %v6531_v18 = vld [vmem:[#allocation2 + $0x58] sm:$0xff]  ;;  %v2389_v46 = vrot.slane %v6294_v37, 1 }
 0x2c4   : > { %4830 = vmatmul.msk.f32.gmra.mxu2 %vm662_vm0, %v5144_v31  ;;  %v6510_v50 = vpop.f32.mrf.mxu0  ;;  %v2497_v17 = vadd.f32 %v2388_v27, %v2139_v19  ;;  %v2140_v31 = vadd.f32 %v6146_v24, %v1766_v8 }
 0x2c5   : > { %8117 = vst [vmem:[#allocation63_spill] sm:$0xff] %v6510_v50  ;;  %v5159_v50 = vld [vmem:[#allocation2 + $0x120] sm:$0xff] }
 0x2c6   : > { %v1474_v51 = vpop.f32.mrf.mxu3 }
 0x2c7   : > { %v1660_v47 = vrot.slane %v1474_v51, 2  ;;  %v2556_v52 = vpop.f32.mrf.mxu2  ;;  %4912 = vmatmul.msk.f32.gmra.mxu0 %vm662_vm0, %v6513_v15  ;;  %v6544_v51 = vld [vmem:[#allocation2 + $0x60] sm:$0xff] }
 0x2c8   : > { %v2745_v39 = vrot.slane %v2556_v52, 2  ;;  %v6518_v36 = vpop.f32.mrf.mxu1 }
 0x2c9   : > { %v1661_v6 = vsel %vm1651_vm4, %v1658_v48, %v1660_v47 }
 0x2ca   : > { %v1767_v32 = vadd.f32 %v1661_v6, %v5917_v33  ;;  %v2746_v16 = vsel %vm1651_vm4, %v2743_v40, %v2745_v39  ;;  %v5146_v40 = vld [vmem:[#allocation2 + $0xb8] sm:$0xff] }
 0x2cb   : > { %4690 = vmatmul.msk.f32.gmra.mxu3 %vm662_vm0, %v5145_v10  ;;  %4799 = vmatmul.msk.f32.gmra.mxu1 %vm662_vm0, %v6036_v2  ;;  %v6526_v44 = vadd.f32 %v2746_v16, %v2497_v17  ;;  %v2390_v2 = vrot.slane %v6307_v60, 1  ;;  %v5147_v16 = vld [vmem:[#allocation2 + $0xc0] sm:$0xff] }
 0x2cc   : > { %4831 = vmatmul.msk.f32.gmra.mxu2 %vm662_vm0, %v5145_v10  ;;  %v6529_v0 = vpop.f32.mrf.mxu0 }
 0x2cd   : > { %8118 = vst [vmem:[#allocation64_spill] sm:$0xff] %v6529_v0 }
 0x2ce   : > { %v1477_v59 = vpop.f32.mrf.mxu3 }
 0x2cf   : > { %v2559_v48 = vpop.f32.mrf.mxu2  ;;  %4913 = vmatmul.msk.f32.gmra.mxu0 %vm662_vm0, %v6531_v18  ;;  %v1662_v47 = vrot.slane %v1477_v59, 2  ;;  %v2392_v59 = vrot.slane %v6322_v63, 1 }
 0x2d0   : > { %v6535_v33 = vpop.f32.mrf.mxu1  ;;  %v2747_v39 = vrot.slane %v2559_v48, 2 }
 0x2d3   : > { %4691 = vmatmul.msk.f32.gmra.mxu3 %vm662_vm0, %v5146_v40  ;;  %4800 = vmatmul.msk.f32.gmra.mxu1 %vm662_vm0, %v6049_v61  ;;  %v2391_v61 = vsel %vm1292_vm3, %v2389_v46, %v2390_v2 }
 0x2d4   : > { %4832 = vmatmul.msk.f32.gmra.mxu2 %vm662_vm0, %v5146_v40  ;;  %v2096_v55 = vpop.f32.mrf.mxu0  ;;  %v2498_v24 = vadd.f32 %v2391_v61, %v2140_v31  ;;  %v2141_v40 = vadd.f32 %v6161_v28, %v1767_v32  ;;  %v8120_v61 = vld [vmem:[#allocation15_spill] sm:$0xff]  ;;  %v5148_v32 = vld [vmem:[#allocation2 + $0xc8] sm:$0xff] }
 0x2d6   : > { %v1480_v19 = vpop.f32.mrf.mxu3 }
 0x2d7   : > { %v1663_v52 = vrot.slane %v1480_v19, 2  ;;  %v2562_v27 = vpop.f32.mrf.mxu2  ;;  %4914 = vmatmul.msk.f32.gmra.mxu0 %vm662_vm0, %v6544_v51 }
 0x2d8   : > { %v2748_v60 = vrot.slane %v2562_v27, 2  ;;  %v6549_v6 = vpop.f32.mrf.mxu1 }
 0x2d9   : > { %v1664_v17 = vsel %vm1651_vm4, %v1662_v47, %v1663_v52 }
 0x2da   : > { %v1768_v37 = vadd.f32 %v1664_v17, %v5952_v14  ;;  %v2749_v8 = vsel %vm1651_vm4, %v2747_v39, %v2748_v60  ;;  %v6564_v14 = vld [vmem:[#allocation2 + $0x68] sm:$0xff] }
 0x2db   : > { %4692 = vmatmul.msk.f32.gmra.mxu3 %vm662_vm0, %v5147_v16  ;;  %4801 = vmatmul.msk.f32.gmra.mxu1 %vm662_vm0, %v6068_v62  ;;  %v6557_v10 = vadd.f32 %v2749_v8, %v2498_v24  ;;  %v2393_v62 = vsel %vm1292_vm3, %v2390_v2, %v2392_v59  ;;  %v6582_v8 = vld [vmem:[#allocation2 + $0x70] sm:$0xff] }
 0x2dc   : > { %4833 = vmatmul.msk.f32.gmra.mxu2 %vm662_vm0, %v5147_v16  ;;  %v6561_v48 = vpop.f32.mrf.mxu0  ;;  %v2499_v27 = vadd.f32 %v2393_v62, %v2141_v40  ;;  %v3621_v16 = vld [vmem:[#allocation6 + $0x108] sm:$0xff]  ;;  %v5149_v59 = vld [vmem:[#allocation2 + $0xd0] sm:$0xff] }
 0x2dd   : > { %8119 = vst [vmem:[#allocation65_spill] sm:$0xff] %v6561_v48  ;;  %3638 = vmatpush.msra.mxu1 %v3621_v16  ;;  %v6595_v62 = vld [vmem:[#allocation2 + $0x78] sm:$0xff]  ;;  %v6728_v48 = vld [vmem:[#allocation2 + $0x190] sm:$0xff] }
 0x2de   : > { %v1483_v55 = vpop.f32.mrf.mxu3 }
 0x2df   : > { %v1665_v31 = vrot.slane %v1483_v55, 2  ;;  %v2565_v46 = vpop.f32.mrf.mxu2  ;;  %4915 = vmatmul.msk.f32.gmra.mxu0 %vm662_vm0, %v6564_v14  ;;  %v2142_v55 = vadd.f32 %v6188_v49, %v1768_v37  ;;  %v8123_v37 = vld [vmem:[#allocation16_spill] sm:$0xff] }
 0x2e0   : > { %v2750_v19 = vrot.slane %v2565_v46, 2  ;;  %v6569_v47 = vpop.f32.mrf.mxu1 }
 0x2e1   : > { %v1666_v63 = vsel %vm1651_vm4, %v1663_v52, %v1665_v31  ;;  %v2394_v31 = vrot.slane %v6332_v22, 1 }
 0x2e2   : > { %v1769_v39 = vadd.f32 %v1666_v63, %v8120_v61  ;;  %v2751_v28 = vsel %vm1651_vm4, %v2748_v60, %v2750_v19 }
 0x2e3   : > { %4693 = vmatmul.msk.f32.gmra.mxu3 %vm662_vm0, %v5148_v32  ;;  %4802 = vmatmul.msk.f32.gmra.mxu1 %vm662_vm0, %v6081_v12  ;;  %v6577_v17 = vadd.f32 %v2751_v28, %v2499_v27  ;;  %v2395_v12 = vrot.slane %v6345_v11, 1 }
 0x2e4   : > { %4834 = vmatmul.msk.f32.gmra.mxu2 %vm662_vm0, %v5148_v32  ;;  %v6580_v2 = vpop.f32.mrf.mxu0 }
 0x2e5   : > { %8121 = vst [vmem:[#allocation15_spill] sm:$0xff] %v6580_v2 }
 0x2e6   : > { %v1486_v24 = vpop.f32.mrf.mxu3 }
 0x2e7   : > { %v2568_v52 = vpop.f32.mrf.mxu2  ;;  %4916 = vmatmul.msk.f32.gmra.mxu0 %vm662_vm0, %v6582_v8  ;;  %v1667_v19 = vrot.slane %v1486_v24, 2 }
 0x2e8   : > { %v6586_v60 = vpop.f32.mrf.mxu1  ;;  %v2752_v11 = vrot.slane %v2568_v52, 2  ;;  %v2397_v52 = vrot.slane %v6358_v30, 1 }
 0x2eb   : > { %4694 = vmatmul.msk.f32.gmra.mxu3 %vm662_vm0, %v5149_v59  ;;  %4803 = vmatmul.msk.f32.gmra.mxu1 %vm662_vm0, %v6094_v41  ;;  %v2396_v41 = vsel %vm1292_vm3, %v2394_v31, %v2395_v12 }
 0x2ec   : > { %4835 = vmatmul.msk.f32.gmra.mxu2 %vm662_vm0, %v5149_v59  ;;  %v2104_v40 = vpop.f32.mrf.mxu0  ;;  %v2500_v49 = vadd.f32 %v2396_v41, %v2142_v55  ;;  %v5150_v59 = vld [vmem:[#allocation2 + $0xd8] sm:$0xff]  ;;  %v2143_v55 = vadd.f32 %v6205_v54, %v1769_v39  ;;  %v5151_v39 = vld [vmem:[#allocation2 + $0xe0] sm:$0xff] }
 0x2ee   : > { %v1489_v46 = vpop.f32.mrf.mxu3 }
 0x2ef   : > { %v1668_v63 = vrot.slane %v1489_v46, 2  ;;  %v2571_v27 = vpop.f32.mrf.mxu2  ;;  %4917 = vmatmul.msk.f32.gmra.mxu0 %vm662_vm0, %v6595_v62  ;;  %v6615_v46 = vld [vmem:[#allocation2 + $0x80] sm:$0xff] }
 0x2f0   : > { %v2753_v61 = vrot.slane %v2571_v27, 2  ;;  %v6600_v28 = vpop.f32.mrf.mxu1 }
 0x2f1   : > { %8122 = vst [vmem:[#allocation66_spill] sm:$0xff] %v6600_v28  ;;  %v1669_v32 = vsel %vm1651_vm4, %v1667_v19, %v1668_v63  ;;  %v8186_v28 = vld [vmem:[#allocation23_spill] sm:$0xff] }
 0x2f2   : > { %v1770_v22 = vadd.f32 %v1669_v32, %v8123_v37  ;;  %v2754_v16 = vsel %vm1651_vm4, %v2752_v11, %v2753_v61 }
 0x2f3   : > { %4695 = vmatmul.msk.f32.gmra.mxu3 %vm662_vm0, %v5150_v59  ;;  %4804 = vmatmul.msk.f32.gmra.mxu1 %vm662_vm0, %v6113_v21  ;;  %v6608_v24 = vadd.f32 %v2754_v16, %v2500_v49  ;;  %v2398_v21 = vsel %vm1292_vm3, %v2395_v12, %v2397_v52  ;;  %v8127_v49 = vld [vmem:[#allocation17_spill] sm:$0xff]  ;;  %v6633_v52 = vld [vmem:[#allocation2 + $0x88] sm:$0xff] }
 0x2f4   : > { %4836 = vmatmul.msk.f32.gmra.mxu2 %vm662_vm0, %v5150_v59  ;;  %v6612_v40 = vpop.f32.mrf.mxu0  ;;  %v2501_v32 = vadd.f32 %v2398_v21, %v2143_v55  ;;  %v5152_v55 = vld [vmem:[#allocation2 + $0xe8] sm:$0xff] }
 0x2f5   : > { %8124 = vst [vmem:[#allocation16_spill] sm:$0xff] %v6608_v24  ;;  %v8221_v24 = vld [vmem:[#allocation55_spill] sm:$0xff] }
 0x2f6   : > { %8125 = vst [vmem:[#allocation67_spill] sm:$0xff] %v6612_v40  ;;  %v1492_v31 = vpop.f32.mrf.mxu3 }
 0x2f7   : > { %v1670_v19 = vrot.slane %v1492_v31, 2  ;;  %v2574_v27 = vpop.f32.mrf.mxu2  ;;  %4918 = vmatmul.msk.f32.gmra.mxu0 %vm662_vm0, %v6615_v46 }
 0x2f8   : > { %v2755_v41 = vrot.slane %v2574_v27, 2  ;;  %v6620_v11 = vpop.f32.mrf.mxu1  ;;  %v2399_v27 = vrot.slane %v6368_v34, 1 }
 0x2f9   : > { %8126 = vst [vmem:[#allocation68_spill] sm:$0xff] %v6620_v11  ;;  %v1671_v30 = vsel %vm1651_vm4, %v1668_v63, %v1670_v19  ;;  %v2144_v19 = vadd.f32 %v6229_v13, %v1770_v22  ;;  %v8132_v22 = vld [vmem:[#allocation18_spill] sm:$0xff] }
 0x2fa   : > { %v1771_v37 = vadd.f32 %v1671_v30, %v8127_v49  ;;  %v2756_v54 = vsel %vm1651_vm4, %v2753_v61, %v2755_v41  ;;  %v6646_v41 = vld [vmem:[#allocation2 + $0x90] sm:$0xff] }
 0x2fb   : > { %4696 = vmatmul.msk.f32.gmra.mxu3 %vm662_vm0, %v5151_v39  ;;  %4805 = vmatmul.msk.f32.gmra.mxu1 %vm662_vm0, %v6125_v26  ;;  %v6628_v16 = vadd.f32 %v2756_v54, %v2501_v32  ;;  %v2400_v26 = vrot.slane %v6381_v3, 1 }
 0x2fc   : > { %4837 = vmatmul.msk.f32.gmra.mxu2 %vm662_vm0, %v5151_v39  ;;  %v6631_v12 = vpop.f32.mrf.mxu0 }
 0x2fd   : > { %8128 = vst [vmem:[#allocation17_spill] sm:$0xff] %v6628_v16  ;;  %v5174_v16 = vld [vmem:[#allocation2 + $0x48] sm:$0xff] }
 0x2fe   : > { %8129 = vst [vmem:[#allocation69_spill] sm:$0xff] %v6631_v12  ;;  %v1495_v59 = vpop.f32.mrf.mxu3  ;;  %v5153_v12 = vld [vmem:[#allocation2 + $0xf0] sm:$0xff] }
 0x2ff   : > { %v2577_v63 = vpop.f32.mrf.mxu2  ;;  %4919 = vmatmul.msk.f32.gmra.mxu0 %vm662_vm0, %v6633_v52  ;;  %v1672_v30 = vrot.slane %v1495_v59, 2 }
 0x300   : > { %v6637_v61 = vpop.f32.mrf.mxu1  ;;  %v2757_v54 = vrot.slane %v2577_v63, 2  ;;  %v2402_v63 = vrot.slane %v6394_v5, 1 }
 0x301   : > { %8130 = vst [vmem:[#allocation70_spill] sm:$0xff] %v6637_v61 }
 0x303   : > { %4697 = vmatmul.msk.f32.gmra.mxu3 %vm662_vm0, %v5152_v55  ;;  %4806 = vmatmul.msk.f32.gmra.mxu1 %vm662_vm0, %v6135_v45  ;;  %v2401_v45 = vsel %vm1292_vm3, %v2399_v27, %v2400_v26 }
 0x304   : > { %4838 = vmatmul.msk.f32.gmra.mxu2 %vm662_vm0, %v5152_v55  ;;  %v2112_v31 = vpop.f32.mrf.mxu0  ;;  %v2502_v13 = vadd.f32 %v2401_v45, %v2144_v19  ;;  %v2145_v19 = vadd.f32 %v6241_v23, %v1771_v37  ;;  %v5154_v37 = vld [vmem:[#allocation2 + $0xf8] sm:$0xff] }
 0x306   : > { %v1498_v21 = vpop.f32.mrf.mxu3 }
 0x307   : > { %v1673_v32 = vrot.slane %v1498_v21, 2  ;;  %v2580_v49 = vpop.f32.mrf.mxu2  ;;  %4920 = vmatmul.msk.f32.gmra.mxu0 %vm662_vm0, %v6646_v41 }
 0x308   : > { %v2758_v3 = vrot.slane %v2580_v49, 2  ;;  %v6651_v39 = vpop.f32.mrf.mxu1 }
 0x309   : > { %8131 = vst [vmem:[#allocation71_spill] sm:$0xff] %v6651_v39  ;;  %v1674_v55 = vsel %vm1651_vm4, %v1672_v30, %v1673_v32  ;;  %v6666_v30 = vld [vmem:[#allocation2 + $0x98] sm:$0xff] }
 0x30a   : > { %v1772_v34 = vadd.f32 %v1674_v55, %v8132_v22  ;;  %v2759_v31 = vsel %vm1651_vm4, %v2757_v54, %v2758_v3  ;;  %v8136_v22 = vld [vmem:[#allocation19_spill] sm:$0xff] }
 0x30b   : > { %4698 = vmatmul.msk.f32.gmra.mxu3 %vm662_vm0, %v5153_v12  ;;  %4807 = vmatmul.msk.f32.gmra.mxu1 %vm662_vm0, %v6151_v29  ;;  %v6659_v59 = vadd.f32 %v2759_v31, %v2502_v13  ;;  %v2403_v29 = vsel %vm1292_vm3, %v2400_v26, %v2402_v63  ;;  %v6684_v63 = vld [vmem:[#allocation2 + $0xa0] sm:$0xff] }
 0x30c   : > { %4839 = vmatmul.msk.f32.gmra.mxu2 %vm662_vm0, %v5153_v12  ;;  %v6663_v27 = vpop.f32.mrf.mxu0  ;;  %v3620_v12 = vld [vmem:[#allocation6 + $0x100] sm:$0xff]  ;;  %v2503_v13 = vadd.f32 %v2403_v29, %v2145_v19 }
 0x30d   : > { %8133 = vst [vmem:[#allocation18_spill] sm:$0xff] %v6659_v59  ;;  %3639 = vmatpush.msra.mxu1 %v3620_v12  ;;  %v7073_v59 = vld [vmem:[#allocation2 + $0x160] sm:$0xff] }
 0x30e   : > { %8134 = vst [vmem:[#allocation72_spill] sm:$0xff] %v6663_v27  ;;  %v1501_v21 = vpop.f32.mrf.mxu3 }
 0x30f   : > { %v1675_v49 = vrot.slane %v1501_v21, 2  ;;  %v2583_v45 = vpop.f32.mrf.mxu2  ;;  %4921 = vmatmul.msk.f32.gmra.mxu0 %vm662_vm0, %v6666_v30 }
 0x310   : > { %v2760_v54 = vrot.slane %v2583_v45, 2  ;;  %v6671_v55 = vpop.f32.mrf.mxu1  ;;  %v5155_v45 = vld [vmem:[#allocation2 + $0x100] sm:$0xff] }
 0x311   : > { %8135 = vst [vmem:[#allocation73_spill] sm:$0xff] %v6671_v55  ;;  %v1676_v5 = vsel %vm1651_vm4, %v1673_v32, %v1675_v49  ;;  %v6690_v49 = vld [vmem:[#allocation2 + $0x180] sm:$0xff]  ;;  %v5169_v55 = vld [vmem:[#allocation2 + $0x170] sm:$0xff] }
 0x312   : > { %v1773_v31 = vadd.f32 %v1676_v5, %v8136_v22  ;;  %v2761_v23 = vsel %vm1651_vm4, %v2758_v3, %v2760_v54  ;;  %v2146_v54 = vadd.f32 %v6265_v38, %v1772_v34  ;;  %v2404_v5 = vrot.slane %v6402_v35, 1  ;;  %v6708_v34 = vld [vmem:[#allocation2 + $0x188] sm:$0xff] }
 0x313   : > { %4699 = vmatmul.msk.f32.gmra.mxu3 %vm662_vm0, %v5154_v37  ;;  %4808 = vmatmul.msk.f32.gmra.mxu1 %vm662_vm0, %v6167_v53  ;;  %v6679_v21 = vadd.f32 %v2761_v23, %v2503_v13  ;;  %v2405_v53 = vrot.slane %v6418_v4, 1  ;;  %v6699_v13 = vld [vmem:[#allocation2 + $0xa8] sm:$0xff] }
 0x314   : > { %4840 = vmatmul.msk.f32.gmra.mxu2 %vm662_vm0, %v5154_v37  ;;  %v6682_v26 = vpop.f32.mrf.mxu0 }
 0x315   : > { %8137 = vst [vmem:[#allocation19_spill] sm:$0xff] %v6679_v21  ;;  %v5171_v21 = vld [vmem:[#allocation2 + $0x30] sm:$0xff] }
 0x316   : > { %8138 = vst [vmem:[#allocation74_spill] sm:$0xff] %v6682_v26  ;;  %v1504_v32 = vpop.f32.mrf.mxu3  ;;  %v2406_v26 = vsel %vm1292_vm3, %v2404_v5, %v2405_v53 }
 0x317   : > { %v2586_v19 = vpop.f32.mrf.mxu2  ;;  %4922 = vmatmul.msk.f32.gmra.mxu0 %vm662_vm0, %v6684_v63  ;;  %v1677_v22 = vrot.slane %v1504_v32, 2  ;;  %v2504_v38 = vadd.f32 %v2406_v26, %v2146_v54 }
 0x318   : > { %v6688_v3 = vpop.f32.mrf.mxu1  ;;  %v2762_v27 = vrot.slane %v2586_v19, 2  ;;  %v2407_v19 = vrot.slane %v6435_v25, 1 }
 0x319   : > { %8139 = vst [vmem:[#allocation75_spill] sm:$0xff] %v6688_v3 }
 0x31b   : > { %4700 = vmatmul.msk.f32.gmra.mxu3 %vm662_vm0, %v5155_v45  ;;  %4809 = vmatmul.msk.f32.gmra.mxu1 %vm662_vm0, %v6690_v49 }
 0x31c   : > { %4841 = vmatmul.msk.f32.gmra.mxu2 %vm662_vm0, %v5155_v45  ;;  %v2120_v29 = vpop.f32.mrf.mxu0 }
 0x31d   : > { %v5156_v29 = vld [vmem:[#allocation2 + $0x108] sm:$0xff] }
 0x31e   : > { %v1507_v12 = vpop.f32.mrf.mxu3 }
 0x31f   : > { %v1678_v23 = vrot.slane %v1507_v12, 2  ;;  %v2589_v37 = vpop.f32.mrf.mxu2  ;;  %4923 = vmatmul.msk.f32.gmra.mxu0 %vm662_vm0, %v6699_v13  ;;  %v8142_v12 = vld [vmem:[#allocation35_spill] sm:$0xff] }
 0x320   : > { %v2763_v4 = vrot.slane %v2589_v37, 2  ;;  %v6704_v40 = vpop.f32.mrf.mxu1  ;;  %v2147_v26 = vadd.f32 %v8142_v12, %v1773_v31  ;;  %v5157_v12 = vld [vmem:[#allocation2 + $0x110] sm:$0xff] }
 0x321   : > { %8140 = vst [vmem:[#allocation76_spill] sm:$0xff] %v6704_v40  ;;  %v1679_v45 = vsel %vm1651_vm4, %v1677_v22, %v1678_v23 }
 0x322   : > { %v1774_v35 = vadd.f32 %v1679_v45, %v6097_v42  ;;  %v2764_v32 = vsel %vm1651_vm4, %v2762_v27, %v2763_v4  ;;  %v6719_v42 = vld [vmem:[#allocation2 + $0xb0] sm:$0xff]  ;;  %v2408_v27 = vsel %vm1292_vm3, %v2405_v53, %v2407_v19  ;;  %v6737_v19 = vld [vmem:[#allocation2 + $0xb8] sm:$0xff] }
 0x323   : > { %4701 = vmatmul.msk.f32.gmra.mxu3 %vm662_vm0, %v5156_v29  ;;  %4810 = vmatmul.msk.f32.gmra.mxu1 %vm662_vm0, %v6708_v34  ;;  %v6714_v5 = vadd.f32 %v2764_v32, %v2504_v38  ;;  %v2505_v25 = vadd.f32 %v2408_v27, %v2147_v26  ;;  %v8144_v32 = vld [vmem:[#allocation20_spill] sm:$0xff]  ;;  %v8147_v27 = vld [vmem:[#allocation39_spill] sm:$0xff] }
 0x324   : > { %4842 = vmatmul.msk.f32.gmra.mxu2 %vm662_vm0, %v5156_v29 }
 0x325   : > { %8141 = vst [vmem:[#allocation77_spill] sm:$0xff] %v6714_v5 }
 0x326   : > { %v1510_v54 = vpop.f32.mrf.mxu3 }
 0x327   : > { %v1680_v22 = vrot.slane %v1510_v54, 2  ;;  %v2592_v37 = vpop.f32.mrf.mxu2  ;;  %4924 = vmatmul.msk.f32.gmra.mxu0 %vm662_vm0, %v6719_v42 }
 0x328   : > { %v2765_v45 = vrot.slane %v2592_v37, 2  ;;  %v6724_v2 = vpop.f32.mrf.mxu1  ;;  %v4084_v37 = vld [vmem:[%s8042_s3 + $0x18] sm:$0xff] }
 0x329   : > { %8143 = vst [vmem:[#allocation35_spill] sm:$0xff] %v6724_v2  ;;  %v1681_v38 = vsel %vm1651_vm4, %v1678_v23, %v1680_v22  ;;  %v2410_v22 = vrot.slane %v6463_v9, 1  ;;  %4193 = vmatpush.msra.mxu2 %v4084_v37 }
 0x32a   : > { %v1775_v29 = vadd.f32 %v1681_v38, %v8144_v32  ;;  %v2766_v31 = vsel %vm1651_vm4, %v2763_v4, %v2765_v45  ;;  %v5158_v4 = vld [vmem:[#allocation2 + $0x118] sm:$0xff]  ;;  %v2148_v45 = vadd.f32 %v8147_v27, %v1774_v35  ;;  %v2409_v38 = vrot.slane %v6445_v58, 1  ;;  %v6753_v32 = vld [vmem:[#allocation2 + $0xc0] sm:$0xff] }
 0x32b   : > { %4702 = vmatmul.msk.f32.gmra.mxu3 %vm662_vm0, %v5157_v12  ;;  %4811 = vmatmul.msk.f32.gmra.mxu1 %vm662_vm0, %v6728_v48  ;;  %v6734_v54 = vadd.f32 %v2766_v31, %v2505_v25  ;;  %v8149_v27 = vld [vmem:[#allocation21_spill] sm:$0xff] }
 0x32c   : > { %4843 = vmatmul.msk.f32.gmra.mxu2 %vm662_vm0, %v5157_v12 }
 0x32d   : > { %8145 = vst [vmem:[#allocation20_spill] sm:$0xff] %v6734_v54  ;;  %v7029_v54 = vld [vmem:[#allocation2 + $0x148] sm:$0xff] }
 0x32e   : > { %v1513_v53 = vpop.f32.mrf.mxu3 }
 0x32f   : > { %v2595_v23 = vpop.f32.mrf.mxu2  ;;  %4925 = vmatmul.msk.f32.gmra.mxu0 %vm662_vm0, %v6737_v19  ;;  %v1682_v31 = vrot.slane %v1513_v53, 2 }
 0x330   : > { %v6741_v26 = vpop.f32.mrf.mxu1  ;;  %v2767_v9 = vrot.slane %v2595_v23, 2  ;;  %v2412_v23 = vrot.slane %v6482_v43, 1 }
 0x331   : > { %8146 = vst [vmem:[#allocation78_spill] sm:$0xff] %v6741_v26 }
 0x333   : > { %4703 = vmatmul.msk.f32.gmra.mxu3 %vm662_vm0, %v5158_v4  ;;  %4956 = vmatmul.msk.f32.vlgmr.msra.gmra.mxu1 %vm662_vm0, %v6441_v1  ;;  %v2411_v1 = vsel %vm1292_vm3, %v2409_v38, %v2410_v22 }
 0x334   : > { %4844 = vmatmul.msk.f32.gmra.mxu2 %vm662_vm0, %v5158_v4  ;;  %v2506_v35 = vadd.f32 %v2411_v1, %v2148_v45 }
 0x336   : > { %v1516_v25 = vpop.f32.mrf.mxu3 }
 0x337   : > { %v1683_v12 = vrot.slane %v1516_v25, 2  ;;  %v2598_v0 = vpop.f32.mrf.mxu2  ;;  %4926 = vmatmul.msk.f32.gmra.mxu0 %vm662_vm0, %v6753_v32  ;;  %v6771_v25 = vpop.f32.mrf.mxu0 }
 0x338   : > { %v2768_v4 = vrot.slane %v2598_v0, 2  ;;  %v6758_v26 = vpop.f32.mrf.mxu1  ;;  %v8151_v0 = vld [vmem:[#allocation41_spill] sm:$0xff] }
 0x339   : > { %8148 = vst [vmem:[#allocation39_spill] sm:$0xff] %v6758_v26  ;;  %v1684_v37 = vsel %vm1651_vm4, %v1682_v31, %v1683_v12  ;;  %v2149_v38 = vadd.f32 %v8151_v0, %v1775_v29  ;;  %v6773_v31 = vld [vmem:[#allocation2 + $0xc8] sm:$0xff] }
 0x33a   : > { %v1776_v58 = vadd.f32 %v1684_v37, %v8149_v27  ;;  %v2769_v40 = vsel %vm1651_vm4, %v2767_v9, %v2768_v4  ;;  %v5160_v0 = vld [vmem:[#allocation2 + $0x128] sm:$0xff] }
 0x33b   : > { %4704 = vmatmul.msk.f32.gmra.mxu3 %vm662_vm0, %v5159_v50  ;;  %4957 = vmatmul.msk.f32.gmra.mxu1 %vm662_vm0, %v6457_v57  ;;  %v6766_v53 = vadd.f32 %v2769_v40, %v2506_v35  ;;  %v2413_v57 = vsel %vm1292_vm3, %v2410_v22, %v2412_v23  ;;  %v8153_v35 = vld [vmem:[#allocation22_spill] sm:$0xff]  ;;  %v6789_v23 = vld [vmem:[#allocation2 + $0xd0] sm:$0xff] }
 0x33c   : > { %4845 = vmatmul.msk.f32.gmra.mxu2 %vm662_vm0, %v5159_v50  ;;  %v2507_v50 = vadd.f32 %v2413_v57, %v2149_v38  ;;  %v5161_v38 = vld [vmem:[#allocation2 + $0x130] sm:$0xff]  ;;  %v8157_v57 = vld [vmem:[#allocation45_spill] sm:$0xff] }
 0x33d   : > { %8150 = vst [vmem:[#allocation21_spill] sm:$0xff] %v6766_v53 }
 0x33e   : > { %v1519_v45 = vpop.f32.mrf.mxu3 }
 0x33f   : > { %v1685_v1 = vrot.slane %v1519_v45, 2  ;;  %v2601_v9 = vpop.f32.mrf.mxu2  ;;  %4927 = vmatmul.msk.f32.gmra.mxu0 %vm662_vm0, %v6773_v31  ;;  %v8154_v45 = vld [vmem:[#allocation62_spill] sm:$0xff] }
 0x340   : > { %v2770_v40 = vrot.slane %v2601_v9, 2  ;;  %v6778_v37 = vpop.f32.mrf.mxu1 }
 0x341   : > { %8152 = vst [vmem:[#allocation41_spill] sm:$0xff] %v6778_v37  ;;  %v1686_v43 = vsel %vm1651_vm4, %v1683_v12, %v1685_v1  ;;  %v6793_v12 = vpop.f32.mrf.mxu0  ;;  %v2415_v1 = vrot.slane %v6518_v36, 1 }
 0x342   : > { %v1777_v29 = vadd.f32 %v1686_v43, %v8153_v35  ;;  %v2771_v27 = vsel %vm1651_vm4, %v2768_v4, %v2770_v40  ;;  %v2150_v40 = vadd.f32 %v8157_v57, %v1776_v58  ;;  %v2414_v43 = vrot.slane %v6498_v7, 1  ;;  %v6804_v35 = vld [vmem:[#allocation2 + $0xd8] sm:$0xff]  ;;  %v8158_v58 = vld [vmem:[#allocation25_spill] sm:$0xff] }
 0x343   : > { %4705 = vmatmul.msk.f32.gmra.mxu3 %vm662_vm0, %v5160_v0  ;;  %4958 = vmatmul.msk.f32.gmra.mxu1 %vm662_vm0, %v8154_v45  ;;  %v6786_v26 = vadd.f32 %v2771_v27, %v2507_v50 }
 0x344   : > { %4846 = vmatmul.msk.f32.gmra.mxu2 %vm662_vm0, %v5160_v0 }
 0x345   : > { %8155 = vst [vmem:[#allocation22_spill] sm:$0xff] %v6786_v26  ;;  %v7012_v26 = vld [vmem:[#allocation2 + $0x140] sm:$0xff] }
 0x346   : > { %v1522_v22 = vpop.f32.mrf.mxu3 }
 0x347   : > { %v2604_v9 = vpop.f32.mrf.mxu2  ;;  %4928 = vmatmul.msk.f32.gmra.mxu0 %vm662_vm0, %v6789_v23  ;;  %v1687_v27 = vrot.slane %v1522_v22, 2  ;;  %v5162_v22 = vld [vmem:[#allocation2 + $0x138] sm:$0xff] }
 0x348   : > { %v6795_v4 = vpop.f32.mrf.mxu1 }
 0x349   : > { %8156 = vst [vmem:[#allocation62_spill] sm:$0xff] %v6795_v4  ;;  %v2416_v4 = vsel %vm1292_vm3, %v2414_v43, %v2415_v1  ;;  %v6810_v2 = vpop.f32.mrf.mxu0 }
 0x34b   : > { %4706 = vmatmul.msk.f32.gmra.mxu3 %vm662_vm0, %v5161_v38  ;;  %4959 = vmatmul.msk.f32.gmra.mxu1 %vm662_vm0, %v6492_v56  ;;  %v2772_v56 = vrot.slane %v2604_v9, 2  ;;  %v2417_v9 = vrot.slane %v6535_v33, 1 }
 0x34c   : > { %4847 = vmatmul.msk.f32.gmra.mxu2 %vm662_vm0, %v5161_v38  ;;  %v2508_v38 = vadd.f32 %v2416_v4, %v2150_v40  ;;  %v8161_v4 = vld [vmem:[#allocation47_spill] sm:$0xff] }
 0x34d   : > { %v2151_v40 = vadd.f32 %v8161_v4, %v1777_v29 }
 0x34e   : > { %v1525_v50 = vpop.f32.mrf.mxu3 }
 0x34f   : > { %v1688_v0 = vrot.slane %v1525_v50, 2  ;;  %v2607_v45 = vpop.f32.mrf.mxu2  ;;  %4929 = vmatmul.msk.f32.gmra.mxu0 %vm662_vm0, %v6804_v35 }
 0x350   : > { %v2773_v37 = vrot.slane %v2607_v45, 2  ;;  %v6814_v3 = vpop.f32.mrf.mxu1 }
 0x351   : > { %v1689_v36 = vsel %vm1651_vm4, %v1687_v27, %v1688_v0  ;;  %8159 = vst [vmem:[#allocation45_spill] sm:$0xff] %v6814_v3  ;;  %v6824_v27 = vld [vmem:[#allocation2 + $0xe0] sm:$0xff]  ;;  %v6837_v4 = vpop.f32.mrf.mxu0 }
 0x352   : > { %v1778_v7 = vadd.f32 %v1689_v36, %v8158_v58  ;;  %v2774_v57 = vsel %vm1651_vm4, %v2772_v56, %v2773_v37  ;;  %v2418_v36 = vsel %vm1292_vm3, %v2415_v1, %v2417_v9  ;;  %v5163_v3 = vld [vmem:[#allocation2 + $0x140] sm:$0xff]  ;;  %v6842_v9 = vld [vmem:[#allocation2 + $0xe8] sm:$0xff] }
 0x353   : > { %4707 = vmatmul.msk.f32.gmra.mxu3 %vm662_vm0, %v5162_v22  ;;  %4960 = vmatmul.msk.f32.gmra.mxu1 %vm662_vm0, %v6513_v15  ;;  %v6819_v43 = vadd.f32 %v2774_v57, %v2508_v38  ;;  %v2509_v38 = vadd.f32 %v2418_v36, %v2151_v40  ;;  %v8162_v57 = vld [vmem:[#allocation26_spill] sm:$0xff]  ;;  %8165 = vst [vmem:[#allocation79_spill] sm:$0xff] %v6842_v9 }
 0x354   : > { %4848 = vmatmul.msk.f32.gmra.mxu2 %vm662_vm0, %v5162_v22 }
 0x355   : > { %8160 = vst [vmem:[#allocation25_spill] sm:$0xff] %v6819_v43 }
 0x356   : > { %v1528_v50 = vpop.f32.mrf.mxu3 }
 0x357   : > { %v1690_v45 = vrot.slane %v1528_v50, 2  ;;  %v2610_v56 = vpop.f32.mrf.mxu2  ;;  %4930 = vmatmul.msk.f32.gmra.mxu0 %vm662_vm0, %v6824_v27 }
 0x358   : > { %v2775_v58 = vrot.slane %v2610_v56, 2  ;;  %v6840_v1 = vpop.f32.mrf.mxu1 }
 0x359   : > { %v1691_v15 = vsel %vm1651_vm4, %v1688_v0, %v1690_v45  ;;  %8164 = vst [vmem:[#allocation26_spill] sm:$0xff] %v6840_v1  ;;  %v2419_v45 = vrot.slane %v6549_v6, 1  ;;  %v6853_v56 = vpop.f32.mrf.mxu0 }
 0x35a   : > { %v1779_v33 = vadd.f32 %v1691_v15, %v8162_v57  ;;  %v2776_v22 = vsel %vm1651_vm4, %v2773_v37, %v2775_v58  ;;  %v5164_v37 = vld [vmem:[#allocation2 + $0x148] sm:$0xff]  ;;  %v6855_v58 = vld [vmem:[#allocation2 + $0xf0] sm:$0xff] }
 0x35b   : > { %4708 = vmatmul.msk.f32.gmra.mxu3 %vm662_vm0, %v5163_v3  ;;  %4961 = vmatmul.msk.f32.gmra.mxu1 %vm662_vm0, %v6531_v18  ;;  %v6835_v29 = vadd.f32 %v2776_v22, %v2509_v38  ;;  %v2420_v18 = vrot.slane %v6569_v47, 1 }
 0x35c   : > { %4849 = vmatmul.msk.f32.gmra.mxu2 %vm662_vm0, %v5163_v3  ;;  %v8166_v3 = vld [vmem:[#allocation49_spill] sm:$0xff] }
 0x35d   : > { %8163 = vst [vmem:[#allocation47_spill] sm:$0xff] %v6835_v29  ;;  %v2152_v50 = vadd.f32 %v8166_v3, %v1778_v7  ;;  %v8169_v3 = vld [vmem:[#allocation29_spill] sm:$0xff] }
 0x35e   : > { %v1531_v0 = vpop.f32.mrf.mxu3  ;;  %8167 = vst [vmem:[#allocation49_spill] sm:$0xff] %v6855_v58 }
 0x35f   : > { %v2613_v40 = vpop.f32.mrf.mxu2  ;;  %4931 = vmatmul.msk.f32.gmra.mxu0 %vm662_vm0, %v6842_v9  ;;  %v1692_v15 = vrot.slane %v1531_v0, 2  ;;  %v5165_v0 = vld [vmem:[#allocation2 + $0x150] sm:$0xff] }
 0x360   : > { %v6857_v38 = vpop.f32.mrf.mxu1  ;;  %v2777_v47 = vrot.slane %v2613_v40, 2  ;;  %v8172_v40 = vld [vmem:[#allocation51_spill] sm:$0xff] }
 0x361   : > { %8168 = vst [vmem:[#allocation80_spill] sm:$0xff] %v6857_v38  ;;  %v6880_v38 = vpop.f32.mrf.mxu0 }
 0x363   : > { %4709 = vmatmul.msk.f32.gmra.mxu3 %vm662_vm0, %v5164_v37  ;;  %4962 = vmatmul.msk.f32.gmra.mxu1 %vm662_vm0, %v6544_v51  ;;  %v2421_v51 = vsel %vm1292_vm3, %v2419_v45, %v2420_v18  ;;  %v2422_v45 = vrot.slane %v6586_v60, 1 }
 0x364   : > { %4850 = vmatmul.msk.f32.gmra.mxu2 %vm662_vm0, %v5164_v37  ;;  %v2510_v6 = vadd.f32 %v2421_v51, %v2152_v50 }
 0x366   : > { %v1534_v36 = vpop.f32.mrf.mxu3 }
 0x367   : > { %v1693_v57 = vrot.slane %v1534_v36, 2  ;;  %v2616_v22 = vpop.f32.mrf.mxu2  ;;  %4932 = vmatmul.msk.f32.gmra.mxu0 %vm662_vm0, %v6855_v58 }
 0x368   : > { %v2778_v37 = vrot.slane %v2616_v22, 2  ;;  %v6875_v22 = vld [vmem:[#allocation2 + $0xf8] sm:$0xff] }
 0x369   : > { %v1694_v7 = vsel %vm1651_vm4, %v1692_v15, %v1693_v57  ;;  %v2153_v15 = vadd.f32 %v8172_v40, %v1779_v33 }
 0x36a   : > { %v6864_v1 = vadd.f32 %v1694_v7, %v8169_v3  ;;  %v2779_v39 = vsel %vm1651_vm4, %v2777_v47, %v2778_v37  ;;  %v2423_v47 = vsel %vm1292_vm3, %v2420_v18, %v2422_v45 }
 0x36b   : > { %4710 = vmatmul.msk.f32.gmra.mxu3 %vm662_vm0, %v5165_v0  ;;  %4963 = vmatmul.msk.f32.gmra.mxu1 %vm662_vm0, %v6564_v14  ;;  %v6870_v36 = vadd.f32 %v2779_v39, %v2510_v6  ;;  %v6882_v39 = vpop.f32.mrf.mxu1  ;;  %v2511_v6 = vadd.f32 %v2423_v47, %v2153_v15 }
 0x36c   : > { %8170 = vst [vmem:[#allocation29_spill] sm:$0xff] %v6864_v1  ;;  %4851 = vmatmul.msk.f32.gmra.mxu2 %vm662_vm0, %v5165_v0  ;;  %v8174_v0 = vld [vmem:[#allocation30_spill] sm:$0xff] }
 0x36d   : > { %8171 = vst [vmem:[#allocation81_spill] sm:$0xff] %v6870_v36  ;;  %v8187_v1 = vld [vmem:[#allocation38_spill] sm:$0xff] }
 0x36e   : > { %v1537_v50 = vpop.f32.mrf.mxu3  ;;  %8173 = vst [vmem:[#allocation51_spill] sm:$0xff] %v6882_v39  ;;  %v5168_v39 = vld [vmem:[#allocation2 + $0x168] sm:$0xff]  ;;  %v1425_v11 = vadd.f32 %v8187_v1, %v8186_v28  ;;  %v8191_v1 = vld [vmem:[#allocation24_spill] sm:$0xff] }
 0x36f   : > { %v1695_v51 = vrot.slane %v1537_v50, 2  ;;  %v2619_v7 = vpop.f32.mrf.mxu2  ;;  %4933 = vmatmul.msk.f32.gmra.mxu0 %vm662_vm0, %v6875_v22  ;;  %v5166_v50 = vld [vmem:[#allocation2 + $0x158] sm:$0xff] }
 0x370   : > { %v2780_v3 = vrot.slane %v2619_v7, 2  ;;  %v6895_v7 = vld [vmem:[#allocation2 + $0x100] sm:$0xff] }
 0x371   : > { %v1696_v60 = vsel %vm1651_vm4, %v1693_v57, %v1695_v51  ;;  %v6899_v57 = vpop.f32.mrf.mxu0  ;;  %v2939_v51 = vld [vmem:[#allocation6 + $0xd8] sm:$0xff] }
 0x372   : > { %v6886_v33 = vadd.f32 %v1696_v60, %v8174_v0  ;;  %v2781_v40 = vsel %vm1651_vm4, %v2778_v37, %v2780_v3  ;;  %8177 = vst [vmem:[#allocation83_spill] sm:$0xff] %v6899_v57  ;;  %v5167_v37 = vld [vmem:[#allocation2 + $0x160] sm:$0xff]  ;;  %3096 = vmatpush.msra.mxu3 %v2939_v51  ;;  %v6907_v3 = vld [vmem:[#allocation2 + $0x108] sm:$0xff] }
 0x373   : > { %4711 = vmatmul.msk.f32.gmra.mxu3 %vm662_vm0, %v5166_v50  ;;  %4964 = vmatmul.msk.f32.gmra.mxu1 %vm662_vm0, %v6582_v8  ;;  %v6892_v18 = vadd.f32 %v2781_v40, %v2511_v6  ;;  %v6901_v15 = vpop.f32.mrf.mxu1  ;;  %v8179_v40 = vld [vmem:[#allocation33_spill] sm:$0xff] }
 0x374   : > { %8175 = vst [vmem:[#allocation30_spill] sm:$0xff] %v6886_v33  ;;  %4852 = vmatmul.msk.f32.gmra.mxu2 %vm662_vm0, %v5166_v50 }
 0x375   : > { %8176 = vst [vmem:[#allocation82_spill] sm:$0xff] %v6892_v18 }
 0x376   : > { %v1540_v45 = vpop.f32.mrf.mxu3  ;;  %8178 = vst [vmem:[#allocation84_spill] sm:$0xff] %v6901_v15 }
 0x377   : > { %4934 = vmatmul.msk.f32.gmra.mxu0 %vm662_vm0, %v6895_v7  ;;  %v1697_v60 = vrot.slane %v1540_v45, 2 }
 0x37b   : > { %4712 = vmatmul.msk.f32.gmra.mxu3 %vm662_vm0, %v5167_v37  ;;  %4965 = vmatmul.msk.f32.gmra.mxu1 %vm662_vm0, %v6595_v62  ;;  %v6921_v45 = vpop.f32.mrf.mxu1 }
 0x37c   : > { %4853 = vmatmul.msk.f32.gmra.mxu2 %vm662_vm0, %v5167_v37  ;;  %v6919_v37 = vpop.f32.mrf.mxu0  ;;  %8181 = vst [vmem:[#allocation85_spill] sm:$0xff] %v6921_v45 }
 0x37e   : > { %v1543_v47 = vpop.f32.mrf.mxu3 }
 0x37f   : > { %v1698_v6 = vrot.slane %v1543_v47, 2  ;;  %4935 = vmatmul.msk.f32.gmra.mxu0 %vm662_vm0, %v6907_v3  ;;  %v6923_v47 = vld [vmem:[#allocation2 + $0x110] sm:$0xff] }
 0x381   : > { %v1699_v0 = vsel %vm1651_vm4, %v1697_v60, %v1698_v6  ;;  %v2938_v60 = vld [vmem:[#allocation6 + $0xd0] sm:$0xff] }
 0x382   : > { %v6913_v50 = vadd.f32 %v1699_v0, %v8179_v40  ;;  %3097 = vmatpush.msra.mxu3 %v2938_v60  ;;  %v8182_v40 = vld [vmem:[#allocation34_spill] sm:$0xff]  ;;  %v4083_v60 = vld [vmem:[%s8042_s3 + $0x10] sm:$0xff] }
 0x383   : > { %4713 = vmatmul.msk.f32.gmra.mxu3 %vm662_vm0, %v5168_v39  ;;  %4966 = vmatmul.msk.f32.gmra.mxu1 %vm662_vm0, %v6615_v46  ;;  %v6939_v61 = vpop.f32.mrf.mxu1 }
 0x384   : > { %8180 = vst [vmem:[#allocation33_spill] sm:$0xff] %v6913_v50  ;;  %4854 = vmatmul.msk.f32.gmra.mxu2 %vm662_vm0, %v5168_v39  ;;  %v6937_v33 = vpop.f32.mrf.mxu0 }
 0x385   : > { %8184 = vst [vmem:[#allocation86_spill] sm:$0xff] %v6937_v33  ;;  %4194 = vmatpush.msra.mxu2 %v4083_v60  ;;  %v8192_v60 = vld [vmem:[#allocation40_spill] sm:$0xff]  ;;  %v7096_v33 = vld [vmem:[#allocation2 + $0x170] sm:$0xff] }
 0x386   : > { %v1546_v51 = vpop.f32.mrf.mxu3  ;;  %8185 = vst [vmem:[#allocation87_spill] sm:$0xff] %v6939_v61 }
 0x387   : > { %v1700_v15 = vrot.slane %v1546_v51, 2  ;;  %4936 = vmatmul.msk.f32.gmra.mxu0 %vm662_vm0, %v6923_v47  ;;  %v6935_v51 = vld [vmem:[#allocation2 + $0x118] sm:$0xff] }
 0x389   : > { %v1701_v0 = vsel %vm1651_vm4, %v1698_v6, %v1700_v15  ;;  %v5170_v15 = vld [vmem:[#allocation2 + $0x178] sm:$0xff] }
 0x38a   : > { %v6929_v50 = vadd.f32 %v1701_v0, %v8182_v40  ;;  %v2937_v6 = vld [vmem:[#allocation6 + $0xc8] sm:$0xff]  ;;  %v6950_v40 = vld [vmem:[#allocation2 + $0x120] sm:$0xff] }
 0x38b   : > { %4714 = vmatmul.msk.f32.gmra.mxu3 %vm662_vm0, %v5169_v55  ;;  %4967 = vmatmul.msk.f32.gmra.mxu1 %vm662_vm0, %v6633_v52  ;;  %v6958_v36 = vpop.f32.mrf.mxu1 }
 0x38c   : > { %8183 = vst [vmem:[#allocation34_spill] sm:$0xff] %v6929_v50  ;;  %4855 = vmatmul.msk.f32.gmra.mxu2 %vm662_vm0, %v5169_v55  ;;  %3098 = vmatpush.msra.mxu3 %v2937_v6  ;;  %v6956_v18 = vpop.f32.mrf.mxu0  ;;  %v6968_v6 = vld [vmem:[#allocation2 + $0x128] sm:$0xff] }
 0x38d   : > { %8188 = vst [vmem:[#allocation23_spill] sm:$0xff] %v6956_v18 }
 0x38e   : > { %v1549_v45 = vpop.f32.mrf.mxu3  ;;  %8189 = vst [vmem:[#allocation38_spill] sm:$0xff] %v6958_v36 }
 0x38f   : > { %4937 = vmatmul.msk.f32.gmra.mxu0 %vm662_vm0, %v6935_v51  ;;  %v1702_v61 = vrot.slane %v1549_v45, 2 }
 0x393   : > { %4715 = vmatmul.msk.f32.gmra.mxu3 %vm662_vm0, %v5170_v15  ;;  %4968 = vmatmul.msk.f32.gmra.mxu1 %vm662_vm0, %v6646_v41  ;;  %v6979_v36 = vpop.f32.mrf.mxu1 }
 0x394   : > { %4856 = vmatmul.msk.f32.gmra.mxu2 %vm662_vm0, %v5170_v15  ;;  %8195 = vst [vmem:[#allocation89_spill] sm:$0xff] %v6979_v36 }
 0x396   : > { %v1552_v0 = vpop.f32.mrf.mxu3 }
 0x397   : > { %v1703_v50 = vrot.slane %v1552_v0, 2  ;;  %4938 = vmatmul.msk.f32.gmra.mxu0 %vm662_vm0, %v6950_v40  ;;  %v6977_v0 = vpop.f32.mrf.mxu0 }
 0x398   : > { %8194 = vst [vmem:[#allocation40_spill] sm:$0xff] %v6977_v0 }
 0x399   : > { %v1704_v29 = vsel %vm1651_vm4, %v1702_v61, %v1703_v50  ;;  %v1426_v61 = vadd.f32 %v8192_v60, %v8191_v1  ;;  %v6986_v1 = vld [vmem:[#allocation2 + $0x130] sm:$0xff]  ;;  %v6999_v60 = vld [vmem:[#allocation2 + $0x138] sm:$0xff] }
 0x39a   : > { %v6961_v43 = vadd.f32 %v1704_v29, %v1425_v11  ;;  %v2936_v11 = vld [vmem:[#allocation6 + $0xc0] sm:$0xff] }
 0x39b   : > { %4758 = vmatmul.msk.f32.vlgmr.msrb.gmra.mxu3 %vm662_vm0, %v5168_v39  ;;  %4969 = vmatmul.msk.f32.gmra.mxu1 %vm662_vm0, %v6666_v30 }
 0x39c   : > { %8190 = vst [vmem:[#allocation88_spill] sm:$0xff] %v6961_v43  ;;  %4857 = vmatmul.msk.f32.gmra.mxu2 %vm662_vm0, %v6690_v49  ;;  %3099 = vmatpush.msra.mxu3 %v2936_v11 }
 0x39e   : > { %v1555_v45 = vpop.f32.mrf.mxu3 }
 0x39f   : > { %v1705_v28 = vrot.slane %v1555_v45, 2  ;;  %4939 = vmatmul.msk.f32.gmra.mxu0 %vm662_vm0, %v6968_v6 }
 0x3a1   : > { %v1706_v29 = vsel %vm1651_vm4, %v1703_v50, %v1705_v28  ;;  %v6997_v50 = vpop.f32.mrf.mxu1 }
 0x3a2   : > { %v6975_v39 = vadd.f32 %v1706_v29, %v1426_v61  ;;  %8197 = vst [vmem:[#allocation91_spill] sm:$0xff] %v6997_v50  ;;  %v8198_v29 = vld [vmem:[#allocation27_spill] sm:$0xff] }
 0x3a3   : > { %4759 = vmatmul.msk.f32.gmra.mxu3 %vm662_vm0, %v5169_v55  ;;  %4970 = vmatmul.msk.f32.gmra.mxu1 %vm662_vm0, %v6684_v63  ;;  %v6995_v55 = vpop.f32.mrf.mxu0 }
 0x3a4   : > { %8193 = vst [vmem:[#allocation24_spill] sm:$0xff] %v6975_v39  ;;  %4858 = vmatmul.msk.f32.gmra.mxu2 %vm662_vm0, %v6708_v34 }
 0x3a5   : > { %8196 = vst [vmem:[#allocation90_spill] sm:$0xff] %v6995_v55 }
 0x3a6   : > { %v1558_v45 = vpop.f32.mrf.mxu3 }
 0x3a7   : > { %4940 = vmatmul.msk.f32.gmra.mxu0 %vm662_vm0, %v6986_v1  ;;  %v1707_v61 = vrot.slane %v1558_v45, 2 }
 0x3ab   : > { %4760 = vmatmul.msk.f32.gmra.mxu3 %vm662_vm0, %v5170_v15  ;;  %4971 = vmatmul.msk.f32.gmra.mxu1 %vm662_vm0, %v6699_v13  ;;  %v8199_v15 = vld [vmem:[#allocation44_spill] sm:$0xff]  ;;  %v7014_v45 = vpop.f32.mrf.mxu0 }
 0x3ac   : > { %4859 = vmatmul.msk.f32.gmra.mxu2 %vm662_vm0, %v6728_v48  ;;  %v1427_v36 = vadd.f32 %v8199_v15, %v8198_v29  ;;  %8201 = vst [vmem:[#allocation44_spill] sm:$0xff] %v7014_v45 }
 0x3ae   : > { %v1561_v28 = vpop.f32.mrf.mxu3 }
 0x3af   : > { %v1708_v11 = vrot.slane %v1561_v28, 2  ;;  %4941 = vmatmul.msk.f32.gmra.mxu0 %vm662_vm0, %v6999_v60  ;;  %v7016_v28 = vpop.f32.mrf.mxu1 }
 0x3b0   : > { %8202 = vst [vmem:[#allocation92_spill] sm:$0xff] %v7016_v28 }
 0x3b1   : > { %v1709_v39 = vsel %vm1651_vm4, %v1707_v61, %v1708_v11  ;;  %v8203_v61 = vld [vmem:[#allocation28_spill] sm:$0xff] }
 0x3b2   : > { %v7006_v43 = vadd.f32 %v1709_v39, %v1427_v36  ;;  %v8204_v36 = vld [vmem:[#allocation46_spill] sm:$0xff] }
 0x3b3   : > { %4761 = vmatmul.msk.f32.gmra.mxu3 %vm662_vm0, %v6690_v49  ;;  %4972 = vmatmul.msk.f32.gmra.mxu1 %vm662_vm0, %v6719_v42  ;;  %v1428_v39 = vadd.f32 %v8204_v36, %v8203_v61 }
 0x3b4   : > { %8200 = vst [vmem:[#allocation27_spill] sm:$0xff] %v7006_v43 }
 0x3b6   : > { %v1564_v50 = vpop.f32.mrf.mxu3 }
 0x3b7   : > { %v1710_v53 = vrot.slane %v1564_v50, 2  ;;  %4942 = vmatmul.msk.f32.gmra.mxu0 %vm662_vm0, %v7012_v26  ;;  %v7033_v50 = vpop.f32.mrf.mxu0  ;;  %v7035_v28 = vpop.f32.mrf.mxu1 }
 0x3b8   : > { %8206 = vst [vmem:[#allocation46_spill] sm:$0xff] %v7033_v50 }
 0x3b9   : > { %v1711_v29 = vsel %vm1651_vm4, %v1708_v11, %v1710_v53  ;;  %8207 = vst [vmem:[#allocation93_spill] sm:$0xff] %v7035_v28  ;;  %v7041_v11 = vld [vmem:[#allocation2 + $0x150] sm:$0xff] }
 0x3ba   : > { %v7023_v15 = vadd.f32 %v1711_v29, %v1428_v39  ;;  %v8208_v39 = vld [vmem:[#allocation31_spill] sm:$0xff]  ;;  %v8209_v29 = vld [vmem:[#allocation48_spill] sm:$0xff] }
 0x3bb   : > { %4762 = vmatmul.msk.f32.gmra.mxu3 %vm662_vm0, %v6708_v34  ;;  %4973 = vmatmul.msk.f32.gmra.mxu1 %vm662_vm0, %v6737_v19 }
 0x3bc   : > { %8205 = vst [vmem:[#allocation28_spill] sm:$0xff] %v7023_v15  ;;  %v1429_v15 = vadd.f32 %v8209_v29, %v8208_v39 }
 0x3be   : > { %v1567_v43 = vpop.f32.mrf.mxu3 }
 0x3bf   : > { %4943 = vmatmul.msk.f32.gmra.mxu0 %vm662_vm0, %v7029_v54  ;;  %v1712_v61 = vrot.slane %v1567_v43, 2  ;;  %v7050_v45 = vpop.f32.mrf.mxu0  ;;  %v7052_v50 = vpop.f32.mrf.mxu1 }
 0x3c0   : > { %8211 = vst [vmem:[#allocation48_spill] sm:$0xff] %v7050_v45 }
 0x3c3   : > { %4763 = vmatmul.msk.f32.gmra.mxu3 %vm662_vm0, %v6728_v48  ;;  %4974 = vmatmul.msk.f32.gmra.mxu1 %vm662_vm0, %v6753_v32 }
 0x3c6   : > { %v1570_v53 = vpop.f32.mrf.mxu3 }
 0x3c7   : > { %v1713_v36 = vrot.slane %v1570_v53, 2  ;;  %4944 = vmatmul.msk.f32.gmra.mxu0 %vm662_vm0, %v7041_v11  ;;  %v7057_v53 = vld [vmem:[#allocation2 + $0x158] sm:$0xff]  ;;  %v7071_v45 = vpop.f32.mrf.mxu1 }
 0x3c9   : > { %v1714_v5 = vsel %vm1651_vm4, %v1712_v61, %v1713_v36  ;;  %v8212_v61 = vld [vmem:[#allocation32_spill] sm:$0xff] }
 0x3ca   : > { %v7048_v28 = vadd.f32 %v1714_v5, %v1429_v15  ;;  %v8213_v5 = vld [vmem:[#allocation50_spill] sm:$0xff] }
 0x3cb   : > { %4860 = vmatmul.msk.f32.vlgmr.msra.gmra.mxu3 %vm662_vm0, %v5171_v21  ;;  %4975 = vmatmul.msk.f32.gmra.mxu1 %vm662_vm0, %v6773_v31  ;;  %v1430_v15 = vadd.f32 %v8213_v5, %v8212_v61  ;;  %v7069_v21 = vpop.f32.mrf.mxu0  ;;  %v5173_v61 = vld [vmem:[#allocation2 + $0x40] sm:$0xff] }
 0x3cc   : > { %8210 = vst [vmem:[#allocation31_spill] sm:$0xff] %v7048_v28  ;;  %v5172_v28 = vld [vmem:[#allocation2 + $0x38] sm:$0xff] }
 0x3cd   : > { %8215 = vst [vmem:[#allocation50_spill] sm:$0xff] %v7069_v21  ;;  %v8218_v21 = vld [vmem:[#allocation52_spill] sm:$0xff] }
 0x3ce   : > { %v1573_v43 = vpop.f32.mrf.mxu3 }
 0x3cf   : > { %v1715_v55 = vrot.slane %v1573_v43, 2  ;;  %4945 = vmatmul.msk.f32.gmra.mxu0 %vm662_vm0, %v7057_v53  ;;  %v7084_v5 = vpop.f32.mrf.mxu1 }
 0x3d1   : > { %v1716_v39 = vsel %vm1651_vm4, %v1713_v36, %v1715_v55 }
 0x3d2   : > { %v7064_v29 = vadd.f32 %v1716_v39, %v1430_v15 }
 0x3d3   : > { %4861 = vmatmul.msk.f32.gmra.mxu3 %vm662_vm0, %v5172_v28  ;;  %4976 = vmatmul.msk.f32.gmra.mxu1 %vm662_vm0, %v6789_v23  ;;  %v7080_v28 = vld [vmem:[#allocation2 + $0x168] sm:$0xff]  ;;  %v7082_v36 = vpop.f32.mrf.mxu0 }
 0x3d4   : > { %8214 = vst [vmem:[#allocation32_spill] sm:$0xff] %v7064_v29  ;;  %v8217_v29 = vld [vmem:[#allocation36_spill] sm:$0xff] }
 0x3d5   : > { %8216 = vst [vmem:[#allocation94_spill] sm:$0xff] %v7082_v36  ;;  %v1431_v18 = vadd.f32 %v8218_v21, %v8217_v29 }
 0x3d6   : > { %v1576_v43 = vpop.f32.mrf.mxu3 }
 0x3d7   : > { %4946 = vmatmul.msk.f32.gmra.mxu0 %vm662_vm0, %v7073_v59  ;;  %v1717_v15 = vrot.slane %v1576_v43, 2 }
 0x3db   : > { %4862 = vmatmul.msk.f32.gmra.mxu3 %vm662_vm0, %v5173_v61  ;;  %4977 = vmatmul.msk.f32.gmra.mxu1 %vm662_vm0, %v6804_v35  ;;  %v7102_v21 = vpop.f32.mrf.mxu0 }
 0x3dc   : > { %8222 = vst [vmem:[#allocation52_spill] sm:$0xff] %v7102_v21 }
 0x3de   : > { %v1579_v55 = vpop.f32.mrf.mxu3 }
 0x3df   : > { %v1718_v39 = vrot.slane %v1579_v55, 2  ;;  %4947 = vmatmul.msk.f32.gmra.mxu0 %vm662_vm0, %v7080_v28  ;;  %v8220_v55 = vld [vmem:[#allocation37_spill] sm:$0xff] }
 0x3e0   : > { %v1432_v29 = vadd.f32 %v8221_v24, %v8220_v55  ;;  %v7116_v24 = vpop.f32.mrf.mxu2 }
 0x3e1   : > { %v1719_v61 = vsel %vm1651_vm4, %v1717_v15, %v1718_v39  ;;  %8224 = vst [vmem:[#allocation55_spill] sm:$0xff] %v7116_v24  ;;  %v8227_v24 = vld [vmem:[#allocation58_spill] sm:$0xff] }
 0x3e2   : > { %v7091_v0 = vadd.f32 %v1719_v61, %v1431_v18  ;;  %v7104_v18 = vpop.f32.mrf.mxu1  ;;  %v5175_v61 = vld [vmem:[#allocation2 + $0x50] sm:$0xff] }
 0x3e3   : > { %4863 = vmatmul.msk.f32.gmra.mxu3 %vm662_vm0, %v5174_v16  ;;  %4978 = vmatmul.msk.f32.gmra.mxu1 %vm662_vm0, %v6824_v27  ;;  %v7118_v55 = vpop.f32.mrf.mxu0 }
 0x3e4   : > { %8219 = vst [vmem:[#allocation36_spill] sm:$0xff] %v7091_v0  ;;  %v7112_v0 = vld [vmem:[#allocation2 + $0x178] sm:$0xff] }
 0x3e5   : > { %8225 = vst [vmem:[#allocation95_spill] sm:$0xff] %v7118_v55 }
 0x3e6   : > { %v1582_v36 = vpop.f32.mrf.mxu3 }
 0x3e7   : > { %v1720_v43 = vrot.slane %v1582_v36, 2  ;;  %4948 = vmatmul.msk.f32.gmra.mxu0 %vm662_vm0, %v7096_v33 }
 0x3e8   : > { %v7133_v57 = vpop.f32.mrf.mxu2 }
 0x3e9   : > { %v1721_v15 = vsel %vm1651_vm4, %v1718_v39, %v1720_v43  ;;  %v5176_v39 = vld [vmem:[#allocation2 + $0x58] sm:$0xff]  ;;  %v4082_v43 = vld [vmem:[%s8042_s3 + $0x8] sm:$0xff] }
 0x3ea   : > { %v7107_v16 = vadd.f32 %v1721_v15, %v1432_v29  ;;  %v7120_v21 = vpop.f32.mrf.mxu1  ;;  %4195 = vmatpush.msra.mxu2 %v4082_v43 }
 0x3eb   : > { %4864 = vmatmul.msk.f32.gmra.mxu3 %vm662_vm0, %v5175_v61  ;;  %4979 = vmatmul.msk.f32.gmra.mxu1 %vm662_vm0, %v6842_v9  ;;  %v7138_v43 = vpop.f32.mrf.mxu0 }
 0x3ec   : > { %8223 = vst [vmem:[#allocation37_spill] sm:$0xff] %v7107_v16  ;;  %v8226_v16 = vld [vmem:[#allocation42_spill] sm:$0xff] }
 0x3ed   : > { %v1433_v55 = vadd.f32 %v8227_v24, %v8226_v16  ;;  %8228 = vst [vmem:[#allocation42_spill] sm:$0xff] %v7133_v57  ;;  %v8230_v16 = vld [vmem:[#allocation43_spill] sm:$0xff]  ;;  %v8231_v24 = vld [vmem:[#allocation60_spill] sm:$0xff] }
 0x3ee   : > { %v1585_v36 = vpop.f32.mrf.mxu3  ;;  %8229 = vst [vmem:[#allocation58_spill] sm:$0xff] %v7138_v43 }
 0x3ef   : > { %4949 = vmatmul.msk.f32.gmra.mxu0 %vm662_vm0, %v7112_v0  ;;  %v1722_v15 = vrot.slane %v1585_v36, 2 }
 0x3f2   : > { %v7140_v36 = vpop.f32.mrf.mxu1 }
 0x3f3   : > { %4865 = vmatmul.msk.f32.gmra.mxu3 %vm662_vm0, %v5176_v39  ;;  %4980 = vmatmul.msk.f32.gmra.mxu1 %vm662_vm0, %v6855_v58  ;;  %v5177_v58 = vld [vmem:[#allocation2 + $0x60] sm:$0xff]  ;;  %v7153_v43 = vpop.f32.mrf.mxu0 }
 0x3f4   : > { %8233 = vst [vmem:[#allocation60_spill] sm:$0xff] %v7153_v43 }
 0x3f6   : > { %v1588_v29 = vpop.f32.mrf.mxu3 }
 0x3f7   : > { %v1723_v61 = vrot.slane %v1588_v29, 2  ;;  %4950 = vmatmul.msk.f32.gmra.mxu0 %vm662_vm0, %v6690_v49 }
 0x3f9   : > { %v1724_v9 = vsel %vm1651_vm4, %v1722_v15, %v1723_v61 }
 0x3fa   : > { %v1792_v39 = vadd.f32 %v1724_v9, %v1433_v55  ;;  %v1434_v9 = vadd.f32 %v8231_v24, %v8230_v16 }
 0x3fb   : > { %4866 = vmatmul.msk.f32.gmra.mxu3 %vm662_vm0, %v5177_v58  ;;  %4981 = vmatmul.msk.f32.gmra.mxu1 %vm662_vm0, %v6875_v22  ;;  %v7151_v58 = vpop.f32.mrf.mxu2 }
 0x3fc   : > { %8232 = vst [vmem:[#allocation43_spill] sm:$0xff] %v7151_v58 }
 0x3fe   : > { %v1591_v29 = vpop.f32.mrf.mxu3 }
 0x3ff   : > { %v1725_v49 = vrot.slane %v1591_v29, 2  ;;  %4951 = vmatmul.msk.f32.gmra.mxu0 %vm662_vm0, %v6708_v34  ;;  %v7155_v29 = vpop.f32.mrf.mxu1 }
 0x401   : > { %v1726_v55 = vsel %vm1651_vm4, %v1723_v61, %v1725_v49 }
 0x402   : > { %v1793_v15 = vadd.f32 %v1726_v55, %v1434_v9  ;;  %v8235_v9 = vld [vmem:[#allocation53_spill] sm:$0xff] }
 0x403   : > { %4867 = vmatmul.msk.f32.gmra.mxu3 %vm662_vm0, %v6564_v14  ;;  %4982 = vmatmul.msk.f32.gmra.mxu1 %vm662_vm0, %v6895_v7  ;;  %v7163_v34 = vpop.f32.mrf.mxu2 }
 0x404   : > { %8234 = vst [vmem:[#allocation96_spill] sm:$0xff] %v7163_v34 }
 0x406   : > { %v1594_v57 = vpop.f32.mrf.mxu3 }
 0x407   : > { %4952 = vmatmul.msk.f32.gmra.mxu0 %vm662_vm0, %v6728_v48  ;;  %v1727_v61 = vrot.slane %v1594_v57, 2  ;;  %v7165_v16 = vpop.f32.mrf.mxu1  ;;  %v8236_v57 = vld [vmem:[#allocation56_spill] sm:$0xff] }
 0x40b   : > { %4868 = vmatmul.msk.f32.gmra.mxu3 %vm662_vm0, %v6582_v8  ;;  %4983 = vmatmul.msk.f32.gmra.mxu1 %vm662_vm0, %v6907_v3  ;;  %v7173_v58 = vpop.f32.mrf.mxu2 }
 0x40e   : > { %v1597_v14 = vpop.f32.mrf.mxu3 }
 0x40f   : > { %v1728_v49 = vrot.slane %v1597_v14, 2  ;;  %v7177_v43 = vpop.f32.mrf.mxu1 }
 0x411   : > { %v1729_v24 = vsel %vm1651_vm4, %v1727_v61, %v1728_v49 }
 0x412   : > { %v1794_v55 = vadd.f32 %v1729_v24, %v8235_v9 }
 0x413   : > { %4869 = vmatmul.msk.f32.gmra.mxu3 %vm662_vm0, %v6595_v62  ;;  %4984 = vmatmul.msk.f32.gmra.mxu1 %vm662_vm0, %v6923_v47  ;;  %v7185_v24 = vpop.f32.mrf.mxu2 }
 0x416   : > { %v1600_v48 = vpop.f32.mrf.mxu3 }
 0x417   : > { %v1730_v8 = vrot.slane %v1600_v48, 2 }
 0x419   : > { %v1731_v34 = vsel %vm1651_vm4, %v1728_v49, %v1730_v8 }
 0x41a   : > { %v1795_v14 = vadd.f32 %v1731_v34, %v8236_v57  ;;  %v7191_v34 = vpop.f32.mrf.mxu1  ;;  %v4081_v57 = vld [vmem:[%s8042_s3] sm:$0xff] }
 0x41b   : > { %4870 = vmatmul.msk.f32.gmra.mxu3 %vm662_vm0, %v6615_v46  ;;  %4985 = vmatmul.msk.f32.gmra.mxu1 %vm662_vm0, %v6935_v51  ;;  %v7199_v46 = vpop.f32.mrf.mxu2 }
 0x41c   : > { %4196 = vmatpush.msra.mxu2 %v4081_v57  ;;  %v3475_v57 = vrot.slane %v6771_v25, 1  ;;  %v7253_v25 = vld [vmem:[%s8046_s7] ss:$0 sm:$0xff] }
 0x41e   : > { %v2122_v62 = vpop.f32.mrf.mxu3 }
 0x41f   : > { %v7183_v61 = vadd.f32 %v2122_v62, %v1792_v39 }
 0x421   : > { %8237 = vst [vmem:[#allocation53_spill] sm:$0xff] %v7183_v61 }
 0x422   : > { %v7201_v48 = vpop.f32.mrf.mxu1 }
 0x423   : > { %4871 = vmatmul.msk.f32.gmra.mxu3 %vm662_vm0, %v6633_v52  ;;  %4986 = vmatmul.msk.f32.gmra.mxu1 %vm662_vm0, %v6950_v40 }
 0x426   : > { %v2125_v49 = vpop.f32.mrf.mxu3 }
 0x427   : > { %v7193_v9 = vadd.f32 %v2125_v49, %v1793_v15  ;;  %v7207_v15 = vpop.f32.mrf.mxu2 }
 0x429   : > { %8238 = vst [vmem:[#allocation56_spill] sm:$0xff] %v7193_v9 }
 0x42b   : > { %4872 = vmatmul.msk.f32.gmra.mxu3 %vm662_vm0, %v6646_v41  ;;  %4987 = vmatmul.msk.f32.gmra.mxu1 %vm662_vm0, %v6968_v6  ;;  %v7211_v41 = vpop.f32.mrf.mxu1 }
 0x42e   : > { %v2128_v39 = vpop.f32.mrf.mxu3 }
 0x42f   : > { %v7222_v49 = vpop.f32.mrf.mxu2 }
 0x433   : > { %4873 = vmatmul.msk.f32.gmra.mxu3 %vm662_vm0, %v6666_v30  ;;  %4988 = vmatmul.msk.f32.gmra.mxu1 %vm662_vm0, %v6986_v1 }
 0x436   : > { %v2130_v52 = vpop.f32.mrf.mxu3 }
 0x437   : > { %v7209_v8 = vadd.f32 %v2130_v52, %v1794_v55  ;;  %v7224_v55 = vpop.f32.mrf.mxu1  ;;  %v7230_v52 = vpop.f32.mrf.mxu2 }
 0x438   : > { %8241 = vst [vmem:[#allocation99_spill] sm:$0xff] %v7230_v52 }
 0x439   : > { %8239 = vst [vmem:[#allocation97_spill] sm:$0xff] %v7209_v8 }
 0x43b   : > { %4874 = vmatmul.msk.f32.gmra.mxu3 %vm662_vm0, %v6684_v63  ;;  %4989 = vmatmul.msk.f32.gmra.mxu1 %vm662_vm0, %v6999_v60  ;;  %v3476_v63 = vrot.slane %v6793_v12, 1 }
 0x43d   : > { %v3477_v8 = vsel %vm1292_vm3, %v3475_v57, %v3476_v63 }
 0x43e   : > { %v2133_v30 = vpop.f32.mrf.mxu3 }
 0x43f   : > { %v7220_v62 = vadd.f32 %v2133_v30, %v1795_v14  ;;  %v7237_v14 = vpop.f32.mrf.mxu1 }
 0x441   : > { %8240 = vst [vmem:[#allocation98_spill] sm:$0xff] %v7220_v62 }
 0x443   : > { %4875 = vmatmul.msk.f32.gmra.mxu3 %vm662_vm0, %v6699_v13  ;;  %4990 = vmatmul.msk.f32.gmra.mxu1 %vm662_vm0, %v7012_v26  ;;  %v3834_v13 = vrot.slane %v7071_v45, 2  ;;  %v7260_v45 = vpop.f32.mrf.mxu2 }
 0x446   : > { %v2136_v39 = vpop.f32.mrf.mxu3 }
 0x447   : > { %v3833_v39 = vrot.slane %v7052_v50, 2 }
 0x449   : > { %v3835_v12 = vsel %vm1651_vm4, %v3833_v39, %v3834_v13 }
 0x44b   : > { %4876 = vmatmul.msk.f32.gmra.mxu3 %vm662_vm0, %v6719_v42  ;;  %4991 = vmatmul.msk.f32.gmra.mxu1 %vm662_vm0, %v7029_v54  ;;  %v7247_v42 = vld [vmem:[%s8045_s6] ss:$0 sm:$0xff] }
 0x44e   : > { %v3101_v30 = vpop.f32.mrf.mxu3 }
 0x44f   : > { %v3229_v62 = vadd.f32 %v3101_v30, %v6506_v20  ;;  %v3478_v20 = vrot.slane %v6810_v2, 1 }
 0x451   : > { %v3587_v9 = vadd.f32 %v3477_v8, %v3229_v62  ;;  %v3836_v8 = vrot.slane %v7084_v5, 2  ;;  %v7264_v62 = vpop.f32.mrf.mxu1 }
 0x453   : > { %v3945_v61 = vadd.f32 %v3835_v12, %v3587_v9  ;;  %4877 = vmatmul.msk.f32.gmra.mxu3 %vm662_vm0, %v6737_v19  ;;  %4992 = vmatmul.msk.f32.gmra.mxu1 %vm662_vm0, %v7041_v11  ;;  %v3479_v19 = vsel %vm1292_vm3, %v3476_v63, %v3478_v20  ;;  %v3837_v52 = vsel %vm1651_vm4, %v3834_v13, %v3836_v8  ;;  %v3839_v13 = vrot.slane %v7120_v21, 2 }
 0x454   : > { %v3841_v21 = vrot.slane %v7140_v36, 2 }
 0x455   : > { %v3981_v50 = vmul.f32 %v7247_v42, %v3945_v61 }
 0x456   : > { %v3104_v9 = vpop.f32.mrf.mxu3 }
 0x457   : > { %v4017_v57 = vadd.f32 %v7253_v25, %v3981_v50  ;;  %v3230_v30 = vadd.f32 %v3104_v9, %v6526_v44  ;;  %v7276_v50 = vpop.f32.mrf.mxu2 }
 0x459   : > { %v4049_v39 = vmax.f32 %v4017_v57, 0.0  ;;  %v3588_v12 = vadd.f32 %v3479_v19, %v3230_v30  ;;  %v7279_v63 = vpop.f32.mrf.mxu1  ;;  %v3838_v57 = vrot.slane %v7104_v18, 2 }
 0x45b   : > { %v3946_v2 = vadd.f32 %v3837_v52, %v3588_v12  ;;  %4878 = vmatmul.msk.f32.gmra.mxu3 %vm662_vm0, %v6753_v32  ;;  %4993 = vmatmul.msk.f32.gmra.mxu1 %vm662_vm0, %v7057_v53  ;;  %v3481_v32 = vrot.slane %v6853_v56, 1  ;;  %v3480_v52 = vrot.slane %v6837_v4, 1 }
 0x45c   : > { %5004 = vmatmul.msk.f32.vlgmr.msra.gmra.mxu2 %vm662_vm0, %v4049_v39  ;;  %v3840_v39 = vsel %vm1651_vm4, %v3838_v57, %v3839_v13  ;;  %v8242_v57 = vld [vmem:[#allocation83_spill] sm:$0xff] }
 0x45d   : > { %v3982_v5 = vmul.f32 %v7247_v42, %v3946_v2  ;;  %v3482_v30 = vsel %vm1292_vm3, %v3480_v52, %v3481_v32 }
 0x45e   : > { %v3107_v61 = vpop.f32.mrf.mxu3 }
 0x45f   : > { %v4018_v44 = vadd.f32 %v7253_v25, %v3982_v5  ;;  %v7292_v19 = vpop.f32.mrf.mxu2 }
 0x461   : > { %v4050_v20 = vmax.f32 %v4018_v44, 0.0  ;;  %v7295_v12 = vpop.f32.mrf.mxu1 }
 0x463   : > { %4879 = vmatmul.msk.f32.gmra.mxu3 %vm662_vm0, %v6773_v31  ;;  %4994 = vmatmul.msk.f32.gmra.mxu1 %vm662_vm0, %v7073_v59 }
 0x464   : > { %5005 = vmatmul.msk.f32.gmra.mxu2 %vm662_vm0, %v4050_v20 }
 0x466   : > { %v3109_v8 = vpop.f32.mrf.mxu3 }
 0x467   : > { %v3231_v9 = vadd.f32 %v3109_v8, %v6557_v10  ;;  %v3483_v10 = vrot.slane %v6880_v38, 1  ;;  %v7308_v52 = vpop.f32.mrf.mxu2 }
 0x469   : > { %v3589_v31 = vadd.f32 %v3482_v30, %v3231_v9  ;;  %v3484_v61 = vsel %vm1292_vm3, %v3481_v32, %v3483_v10  ;;  %v3485_v30 = vrot.slane %v8242_v57, 1  ;;  %v8243_v10 = vld [vmem:[#allocation16_spill] sm:$0xff] }
 0x46b   : > { %v3947_v56 = vadd.f32 %v3840_v39, %v3589_v31  ;;  %4880 = vmatmul.msk.f32.gmra.mxu3 %vm662_vm0, %v6789_v23  ;;  %4995 = vmatmul.msk.f32.gmra.mxu1 %vm662_vm0, %v7080_v28  ;;  %v3842_v23 = vsel %vm1651_vm4, %v3839_v13, %v3841_v21  ;;  %v3844_v31 = vrot.slane %v7165_v16, 2  ;;  %v8245_v16 = vld [vmem:[#allocation86_spill] sm:$0xff] }
 0x46d   : > { %v3983_v4 = vmul.f32 %v7247_v42, %v3947_v56 }
 0x46e   : > { %v3112_v18 = vpop.f32.mrf.mxu3 }
 0x46f   : > { %v3232_v2 = vadd.f32 %v3112_v18, %v6577_v17  ;;  %v4019_v5 = vadd.f32 %v7253_v25, %v3983_v4  ;;  %v7315_v17 = vpop.f32.mrf.mxu1  ;;  %v7325_v13 = vpop.f32.mrf.mxu2 }
 0x471   : > { %v3590_v44 = vadd.f32 %v3484_v61, %v3232_v2  ;;  %v4051_v20 = vmax.f32 %v4019_v5, 0.0  ;;  %v8244_v5 = vld [vmem:[#allocation79_spill] sm:$0xff]  ;;  %v7337_v61 = vld [vmem:[#allocation2 + $0x180] sm:$0xff] }
 0x473   : > { %v3948_v8 = vadd.f32 %v3842_v23, %v3590_v44  ;;  %4881 = vmatmul.msk.f32.gmra.mxu3 %vm662_vm0, %v6804_v35  ;;  %4996 = vmatmul.msk.f32.gmra.mxu1 %vm662_vm0, %v7096_v33  ;;  %v3486_v35 = vrot.slane %v6919_v37, 1  ;;  %v3488_v44 = vrot.slane %v8245_v16, 1  ;;  %v8248_v16 = vld [vmem:[#allocation40_spill] sm:$0xff] }
 0x474   : > { %5006 = vmatmul.msk.f32.gmra.mxu2 %vm662_vm0, %v4051_v20 }
 0x475   : > { %v3984_v38 = vmul.f32 %v7247_v42, %v3948_v8  ;;  %v3487_v21 = vsel %vm1292_vm3, %v3485_v30, %v3486_v35 }
 0x476   : > { %v3115_v36 = vpop.f32.mrf.mxu3 }
 0x477   : > { %v4020_v32 = vadd.f32 %v7253_v25, %v3984_v38  ;;  %v7329_v56 = vpop.f32.mrf.mxu1  ;;  %v7344_v8 = vpop.f32.mrf.mxu2  ;;  %v8246_v38 = vld [vmem:[#allocation17_spill] sm:$0xff] }
 0x479   : > { %v4052_v9 = vmax.f32 %v4020_v32, 0.0 }
 0x47b   : > { %4882 = vmatmul.msk.f32.gmra.mxu3 %vm662_vm0, %v6824_v27  ;;  %4997 = vmatmul.msk.f32.gmra.mxu1 %vm662_vm0, %v7112_v0  ;;  %v3843_v27 = vrot.slane %v7155_v29, 2  ;;  %v3846_v29 = vrot.slane %v7177_v43, 2  ;;  %v7354_v43 = vld [vmem:[#allocation2 + $0x188] sm:$0xff] }
 0x47c   : > { %5007 = vmatmul.msk.f32.gmra.mxu2 %vm662_vm0, %v4052_v9  ;;  %v3489_v9 = vsel %vm1292_vm3, %v3486_v35, %v3488_v44  ;;  %v3491_v44 = vrot.slane %v8248_v16, 1 }
 0x47d   : > { %v3845_v37 = vsel %vm1651_vm4, %v3843_v27, %v3844_v31  ;;  %v8247_v27 = vld [vmem:[#allocation49_spill] sm:$0xff] }
 0x47e   : > { %v3117_v39 = vpop.f32.mrf.mxu3 }
 0x47f   : > { %v3233_v4 = vadd.f32 %v3117_v39, %v8243_v10  ;;  %v7349_v57 = vpop.f32.mrf.mxu1  ;;  %v3847_v10 = vsel %vm1651_vm4, %v3844_v31, %v3846_v29 }
 0x481   : > { %v3591_v18 = vadd.f32 %v3487_v21, %v3233_v4 }
 0x483   : > { %v3949_v2 = vadd.f32 %v3845_v37, %v3591_v18  ;;  %4883 = vmatmul.msk.f32.gmra.mxu3 %vm662_vm0, %v8244_v5  ;;  %4998 = vmatmul.msk.f32.gmra.mxu1 %vm662_vm0, %v7337_v61  ;;  %v7361_v37 = vpop.f32.mrf.mxu2  ;;  %v7367_v5 = vld [vmem:[#allocation2 + $0x190] sm:$0xff] }
 0x485   : > { %v3985_v20 = vmul.f32 %v7247_v42, %v3949_v2 }
 0x486   : > { %v3120_v23 = vpop.f32.mrf.mxu3 }
 0x487   : > { %v3234_v36 = vadd.f32 %v3120_v23, %v8246_v38  ;;  %v4021_v32 = vadd.f32 %v7253_v25, %v3985_v20  ;;  %v7363_v31 = vpop.f32.mrf.mxu1  ;;  %v8249_v20 = vld [vmem:[#allocation23_spill] sm:$0xff]  ;;  %v3849_v23 = vrot.slane %v7201_v48, 2 }
 0x488   : > { %v3490_v29 = vrot.slane %v8249_v20, 1 }
 0x489   : > { %v3592_v30 = vadd.f32 %v3489_v9, %v3234_v36  ;;  %v4053_v39 = vmax.f32 %v4021_v32, 0.0  ;;  %v8250_v36 = vld [vmem:[#allocation18_spill] sm:$0xff]  ;;  %v3848_v9 = vrot.slane %v7191_v34, 2 }
 0x48b   : > { %v3950_v4 = vadd.f32 %v3847_v10, %v3592_v30  ;;  %4884 = vmatmul.msk.f32.gmra.mxu3 %vm662_vm0, %v8247_v27  ;;  %4999 = vmatmul.msk.f32.gmra.mxu1 %vm662_vm0, %v7354_v43  ;;  %v7379_v10 = vpop.f32.mrf.mxu2  ;;  %v8251_v27 = vld [vmem:[#allocation90_spill] sm:$0xff] }
 0x48c   : > { %5008 = vmatmul.msk.f32.gmra.mxu2 %vm662_vm0, %v4053_v39  ;;  %v3850_v39 = vsel %vm1651_vm4, %v3848_v9, %v3849_v23 }
 0x48d   : > { %v3986_v21 = vmul.f32 %v7247_v42, %v3950_v4 }
 0x48e   : > { %v3123_v35 = vpop.f32.mrf.mxu3 }
 0x48f   : > { %v4022_v18 = vadd.f32 %v7253_v25, %v3986_v21  ;;  %v3493_v21 = vrot.slane %v8251_v27, 1  ;;  %v3851_v35 = vrot.slane %v7211_v41, 2 }
 0x491   : > { %v4054_v2 = vmax.f32 %v4022_v18, 0.0  ;;  %v3494_v20 = vsel %vm1292_vm3, %v3491_v44, %v3493_v21 }
 0x493   : > { %4885 = vmatmul.msk.f32.gmra.mxu3 %vm662_vm0, %v6875_v22  ;;  %5000 = vmatmul.msk.f32.gmra.mxu1 %vm662_vm0, %v7367_v5  ;;  %v3492_v22 = vsel %vm1292_vm3, %v3490_v29, %v3491_v44  ;;  %v8253_v44 = vld [vmem:[#allocation46_spill] sm:$0xff] }
 0x494   : > { %5009 = vmatmul.msk.f32.gmra.mxu2 %vm662_vm0, %v4054_v2  ;;  %v8252_v2 = vld [vmem:[#allocation19_spill] sm:$0xff] }
 0x496   : > { %v3125_v38 = vpop.f32.mrf.mxu3 }
 0x497   : > { %v3235_v32 = vadd.f32 %v3125_v38, %v8250_v36  ;;  %v3852_v36 = vsel %vm1651_vm4, %v3849_v23, %v3851_v35  ;;  %v3496_v23 = vrot.slane %v8253_v44, 1  ;;  %v7421_v44 = vpop.f32.mrf.mxu1 }
 0x499   : > { %v3593_v30 = vadd.f32 %v3492_v22, %v3235_v32 }
 0x49b   : > { %v3951_v4 = vadd.f32 %v3850_v39, %v3593_v30  ;;  %4886 = vmatmul.msk.f32.gmra.mxu3 %vm662_vm0, %v6895_v7  ;;  %v7393_v7 = vpop.f32.mrf.mxu2  ;;  %v8254_v39 = vld [vmem:[#allocation44_spill] sm:$0xff] }
 0x49d   : > { %v3987_v48 = vmul.f32 %v7247_v42, %v3951_v4  ;;  %v3495_v4 = vrot.slane %v8254_v39, 1 }
 0x49e   : > { %v3128_v18 = vpop.f32.mrf.mxu3 }
 0x49f   : > { %v3236_v34 = vadd.f32 %v3128_v18, %v8252_v2  ;;  %v4023_v16 = vadd.f32 %v7253_v25, %v3987_v48  ;;  %v8255_v48 = vld [vmem:[#allocation77_spill] sm:$0xff]  ;;  %v3853_v18 = vrot.slane %v7224_v55, 2  ;;  %v3497_v2 = vsel %vm1292_vm3, %v3495_v4, %v3496_v23 }
 0x4a1   : > { %v3594_v29 = vadd.f32 %v3494_v20, %v3236_v34  ;;  %v4055_v38 = vmax.f32 %v4023_v16, 0.0  ;;  %v8256_v20 = vld [vmem:[#allocation48_spill] sm:$0xff] }
 0x4a3   : > { %v3952_v32 = vadd.f32 %v3852_v36, %v3594_v29  ;;  %4887 = vmatmul.msk.f32.gmra.mxu3 %vm662_vm0, %v6907_v3  ;;  %5010 = vmatmul.msk.f32.gmra.mxu2 %vm662_vm0, %v4055_v38  ;;  %v3854_v3 = vrot.slane %v7237_v14, 2  ;;  %v7403_v21 = vpop.f32.mrf.mxu2  ;;  %v3498_v29 = vrot.slane %v8256_v20, 1  ;;  %v3856_v38 = vrot.slane %v7264_v62, 2 }
 0x4a4   : > { %v3859_v20 = vrot.slane %v7295_v12, 2 }
 0x4a5   : > { %v3988_v41 = vmul.f32 %v7247_v42, %v3952_v32  ;;  %v7414_v32 = vpop.f32.mrf.mxu0  ;;  %v3857_v4 = vsel %vm1651_vm4, %v3854_v3, %v3856_v38 }
 0x4a6   : > { %v3131_v9 = vpop.f32.mrf.mxu3 }
 0x4a7   : > { %v4024_v22 = vadd.f32 %v7253_v25, %v3988_v41  ;;  %v8257_v41 = vld [vmem:[#allocation20_spill] sm:$0xff] }
 0x4a9   : > { %v4056_v30 = vmax.f32 %v4024_v22, 0.0  ;;  %v3499_v22 = vsel %vm1292_vm3, %v3496_v23, %v3498_v29 }
 0x4ab   : > { %4888 = vmatmul.msk.f32.gmra.mxu3 %vm662_vm0, %v6923_v47  ;;  %5011 = vmatmul.msk.f32.gmra.mxu2 %vm662_vm0, %v4056_v30  ;;  %v3855_v47 = vsel %vm1651_vm4, %v3853_v18, %v3854_v3  ;;  %v7419_v30 = vpop.f32.mrf.mxu2 }
 0x4ad   : > { %v7429_v23 = vpop.f32.mrf.mxu0 }
 0x4ae   : > { %v3133_v27 = vpop.f32.mrf.mxu3 }
 0x4af   : > { %v3237_v35 = vadd.f32 %v3133_v27, %v8255_v48 }
 0x4b1   : > { %v3595_v34 = vadd.f32 %v3497_v2, %v3237_v35 }
 0x4b3   : > { %v3953_v16 = vadd.f32 %v3855_v47, %v3595_v34  ;;  %4889 = vmatmul.msk.f32.gmra.mxu3 %vm662_vm0, %v6935_v51  ;;  %v7431_v2 = vpop.f32.mrf.mxu2  ;;  %v7433_v34 = vpop.f32.mrf.mxu1  ;;  %v8259_v47 = vld [vmem:[#allocation50_spill] sm:$0xff] }
 0x4b5   : > { %v3989_v14 = vmul.f32 %v7247_v42, %v3953_v16  ;;  %v3500_v16 = vrot.slane %v8259_v47, 1 }
 0x4b6   : > { %v3136_v36 = vpop.f32.mrf.mxu3 }
 0x4b7   : > { %v3238_v55 = vadd.f32 %v3136_v36, %v8257_v41  ;;  %v4025_v9 = vadd.f32 %v7253_v25, %v3989_v14  ;;  %v8260_v14 = vld [vmem:[#allocation21_spill] sm:$0xff]  ;;  %v3858_v36 = vrot.slane %v7279_v63, 2  ;;  %v3861_v63 = vrot.slane %v7315_v17, 2 }
 0x4b9   : > { %v3596_v51 = vadd.f32 %v3499_v22, %v3238_v55  ;;  %v4057_v39 = vmax.f32 %v4025_v9, 0.0  ;;  %v3860_v9 = vsel %vm1651_vm4, %v3858_v36, %v3859_v20  ;;  %v7445_v22 = vpop.f32.mrf.mxu0 }
 0x4bb   : > { %v3954_v27 = vadd.f32 %v3857_v4, %v3596_v51  ;;  %4890 = vmatmul.msk.f32.gmra.mxu3 %vm662_vm0, %v6950_v40  ;;  %5012 = vmatmul.msk.f32.gmra.mxu2 %vm662_vm0, %v4057_v39  ;;  %v8258_v40 = vld [vmem:[#allocation94_spill] sm:$0xff]  ;;  %v8261_v51 = vld [vmem:[#allocation52_spill] sm:$0xff]  ;;  %v7450_v4 = vpop.f32.mrf.mxu2  ;;  %v7452_v12 = vpop.f32.mrf.mxu1 }
 0x4bc   : > { %v3501_v3 = vrot.slane %v8258_v40, 1  ;;  %v3503_v39 = vrot.slane %v8261_v51, 1 }
 0x4bd   : > { %v3990_v62 = vmul.f32 %v7247_v42, %v3954_v27 }
 0x4be   : > { %v3139_v48 = vpop.f32.mrf.mxu3  ;;  %v3502_v41 = vsel %vm1292_vm3, %v3500_v16, %v3501_v3  ;;  %v3504_v40 = vsel %vm1292_vm3, %v3501_v3, %v3503_v39  ;;  %v3864_v39 = vrot.slane %v7349_v57, 2 }
 0x4bf   : > { %v4026_v35 = vadd.f32 %v7253_v25, %v3990_v62  ;;  %v8262_v48 = vld [vmem:[#allocation22_spill] sm:$0xff] }
 0x4c1   : > { %v4058_v18 = vmax.f32 %v4026_v35, 0.0 }
 0x4c3   : > { %4891 = vmatmul.msk.f32.gmra.mxu3 %vm662_vm0, %v6968_v6  ;;  %5013 = vmatmul.msk.f32.gmra.mxu2 %vm662_vm0, %v4058_v18  ;;  %v7466_v36 = vpop.f32.mrf.mxu2 }
 0x4c6   : > { %v3141_v29 = vpop.f32.mrf.mxu3 }
 0x4c7   : > { %v3239_v38 = vadd.f32 %v3141_v29, %v8260_v14  ;;  %v7463_v14 = vpop.f32.mrf.mxu0 }
 0x4c9   : > { %v3597_v55 = vadd.f32 %v3502_v41, %v3239_v38  ;;  %v7468_v41 = vpop.f32.mrf.mxu1 }
 0x4cb   : > { %v3955_v6 = vadd.f32 %v3860_v9, %v3597_v55  ;;  %4892 = vmatmul.msk.f32.gmra.mxu3 %vm662_vm0, %v6986_v1  ;;  %v3862_v1 = vsel %vm1651_vm4, %v3859_v20, %v3861_v63  ;;  %v7478_v9 = vld [vmem:[%s8047_s8] ss:$0 sm:$0xff] }
 0x4cc   : > { %v7485_v63 = vld [vmem:[%s8048_s9] ss:$0 sm:$0xff] }
 0x4cd   : > { %v3991_v27 = vmul.f32 %v7247_v42, %v3955_v6  ;;  %v8264_v6 = vld [vmem:[#allocation95_spill] sm:$0xff] }
 0x4ce   : > { %v3144_v62 = vpop.f32.mrf.mxu3  ;;  %v3505_v51 = vrot.slane %v8264_v6, 1  ;;  %v3866_v6 = vrot.slane %v7363_v31, 2 }
 0x4cf   : > { %v3240_v35 = vadd.f32 %v3144_v62, %v8262_v48  ;;  %v4027_v18 = vadd.f32 %v7253_v25, %v3991_v27  ;;  %v8265_v62 = vld [vmem:[#allocation25_spill] sm:$0xff] }
 0x4d1   : > { %v3598_v47 = vadd.f32 %v3504_v40, %v3240_v35  ;;  %v4059_v16 = vmax.f32 %v4027_v18, 0.0  ;;  %v3863_v18 = vrot.slane %v7329_v56, 2 }
 0x4d3   : > { %v3956_v29 = vadd.f32 %v3862_v1, %v3598_v47  ;;  %4893 = vmatmul.msk.f32.gmra.mxu3 %vm662_vm0, %v6999_v60  ;;  %5014 = vmatmul.msk.f32.gmra.mxu2 %vm662_vm0, %v4059_v16  ;;  %v8263_v60 = vld [vmem:[#allocation58_spill] sm:$0xff]  ;;  %v7493_v16 = vpop.f32.mrf.mxu1  ;;  %v3865_v1 = vsel %vm1651_vm4, %v3863_v18, %v3864_v39 }
 0x4d4   : > { %v3506_v20 = vrot.slane %v8263_v60, 1 }
 0x4d5   : > { %v3992_v17 = vmul.f32 %v7247_v42, %v3956_v29 }
 0x4d6   : > { %v3147_v38 = vpop.f32.mrf.mxu3  ;;  %v3507_v40 = vsel %vm1292_vm3, %v3505_v51, %v3506_v20 }
 0x4d7   : > { %v4028_v3 = vadd.f32 %v7253_v25, %v3992_v17  ;;  %v8266_v38 = vld [vmem:[#allocation60_spill] sm:$0xff] }
 0x4d9   : > { %v4060_v55 = vmax.f32 %v4028_v3, 0.0  ;;  %v3508_v3 = vrot.slane %v8266_v38, 1 }
 0x4db   : > { %4894 = vmatmul.msk.f32.gmra.mxu3 %vm662_vm0, %v7012_v26  ;;  %5015 = vmatmul.msk.f32.gmra.mxu2 %vm662_vm0, %v4060_v55  ;;  %v7487_v26 = vpop.f32.mrf.mxu0  ;;  %v5181_v55 = vld [vmem:[%s5515_s20] sm:$0xff] }
 0x4de   : > { %v3149_v27 = vpop.f32.mrf.mxu3 }
 0x4df   : > { %v3241_v48 = vadd.f32 %v3149_v27, %v8265_v62  ;;  %v4198_v35 = vpop.f32.mrf.mxu2  ;;  %v8267_v62 = vld [vmem:[#allocation47_spill] sm:$0xff] }
 0x4e0   : > { %v4298_v47 = vmul.f32 %v7478_v9, %v4198_v35 }
 0x4e1   : > { %v3599_v57 = vadd.f32 %v3507_v40, %v3241_v48 }
 0x4e2   : > { %v4334_v29 = vadd.f32 %v7485_v63, %v4298_v47 }
 0x4e3   : > { %v3957_v17 = vadd.f32 %v3865_v1, %v3599_v57  ;;  %4895 = vmatmul.msk.f32.gmra.mxu3 %vm662_vm0, %v7029_v54  ;;  %v3509_v54 = vsel %vm1292_vm3, %v3506_v20, %v3508_v3  ;;  %v7512_v47 = vpop.f32.mrf.mxu0  ;;  %v3867_v1 = vsel %vm1651_vm4, %v3864_v39, %v3866_v6  ;;  %v5182_v20 = vld [vmem:[%s5515_s20 + $0x8] sm:$0xff] }
 0x4e4   : > { %v4366_v56 = vadd.f32 %v5181_v55, %v4334_v29 }
 0x4e5   : > { %v3993_v60 = vmul.f32 %v7247_v42, %v3957_v17  ;;  %v7516_v17 = vpop.f32.mrf.mxu1 }
 0x4e6   : > { %v4398_v51 = vmax.f32 %v4366_v56, 0.0  ;;  %v3152_v27 = vpop.f32.mrf.mxu3 }
 0x4e7   : > { %v3242_v48 = vadd.f32 %v3152_v27, %v8267_v62  ;;  %v4201_v35 = vpop.f32.mrf.mxu2  ;;  %v4029_v18 = vadd.f32 %v7253_v25, %v3993_v60  ;;  %v3510_v62 = vrot.slane %v7414_v32, 1  ;;  %v3513_v32 = vrot.slane %v7445_v22, 1 }
 0x4e8   : > { %4430 = vst [vmem:[%s7507_s11] sm:$0xff] %v4398_v51  ;;  %v4299_v40 = vmul.f32 %v7478_v9, %v4201_v35 }
 0x4e9   : > { %v3600_v31 = vadd.f32 %v3509_v54, %v3242_v48  ;;  %v4061_v57 = vmax.f32 %v4029_v18, 0.0  ;;  %v3869_v48 = vrot.slane %v7433_v34, 2  ;;  %v8268_v18 = vld [vmem:[#allocation81_spill] sm:$0xff] }
 0x4ea   : > { %v4335_v29 = vadd.f32 %v7485_v63, %v4299_v40  ;;  %v5183_v34 = vld [vmem:[%s5515_s20 + $0x10] sm:$0xff] }
 0x4eb   : > { %v3958_v38 = vadd.f32 %v3867_v1, %v3600_v31  ;;  %4896 = vmatmul.msk.f32.gmra.mxu3 %vm662_vm0, %v7041_v11  ;;  %5016 = vmatmul.msk.f32.gmra.mxu2 %vm662_vm0, %v4061_v57  ;;  %v7525_v6 = vpop.f32.mrf.mxu0  ;;  %v3511_v11 = vrot.slane %v7429_v23, 1  ;;  %v3868_v31 = vrot.slane %v7421_v44, 2 }
 0x4ec   : > { %v4367_v3 = vadd.f32 %v5182_v20, %v4335_v29 }
 0x4ed   : > { %v3994_v55 = vmul.f32 %v7247_v42, %v3958_v38  ;;  %v7531_v27 = vpop.f32.mrf.mxu1  ;;  %v3512_v57 = vsel %vm1292_vm3, %v3510_v62, %v3511_v11  ;;  %v3870_v23 = vsel %vm1651_vm4, %v3868_v31, %v3869_v48  ;;  %v3514_v22 = vsel %vm1292_vm3, %v3511_v11, %v3513_v32  ;;  %v8270_v11 = vld [vmem:[#allocation68_spill] sm:$0xff] }
 0x4ee   : > { %v4399_v56 = vmax.f32 %v4367_v3, 0.0  ;;  %v3155_v60 = vpop.f32.mrf.mxu3 }
 0x4ef   : > { %v4030_v51 = vadd.f32 %v7253_v25, %v3994_v55  ;;  %v3871_v55 = vrot.slane %v7452_v12, 2 }
 0x4f0   : > { %4431 = vst [vmem:[%s7507_s11 + $0x8] sm:$0xff] %v4399_v56 }
 0x4f1   : > { %v4062_v39 = vmax.f32 %v4030_v51, 0.0  ;;  %v3872_v31 = vsel %vm1651_vm4, %v3869_v48, %v3871_v55  ;;  %v8272_v55 = vld [vmem:[#allocation29_spill] sm:$0xff] }
 0x4f3   : > { %4897 = vmatmul.msk.f32.gmra.mxu3 %vm662_vm0, %v7057_v53  ;;  %5017 = vmatmul.msk.f32.gmra.mxu2 %vm662_vm0, %v4062_v39  ;;  %v7545_v3 = vpop.f32.mrf.mxu0  ;;  %v8269_v39 = vld [vmem:[#allocation82_spill] sm:$0xff] }
 0x4f5   : > { %v7549_v51 = vpop.f32.mrf.mxu1 }
 0x4f6   : > { %v3157_v35 = vpop.f32.mrf.mxu3 }
 0x4f7   : > { %v3243_v54 = vadd.f32 %v3157_v35, %v8268_v18  ;;  %v4204_v40 = vpop.f32.mrf.mxu2 }
 0x4f8   : > { %v4300_v53 = vmul.f32 %v7478_v9, %v4204_v40 }
 0x4f9   : > { %v3601_v1 = vadd.f32 %v3512_v57, %v3243_v54 }
 0x4fa   : > { %v4336_v29 = vadd.f32 %v7485_v63, %v4300_v53  ;;  %v5184_v53 = vld [vmem:[%s5515_s20 + $0x18] sm:$0xff] }
 0x4fb   : > { %v3959_v38 = vadd.f32 %v3870_v23, %v3601_v1  ;;  %4898 = vmatmul.msk.f32.gmra.mxu3 %vm662_vm0, %v7073_v59  ;;  %v7565_v48 = vpop.f32.mrf.mxu0 }
 0x4fc   : > { %v4368_v20 = vadd.f32 %v5183_v34, %v4336_v29  ;;  %v2425_v29 = vrot.slane %v8270_v11, 1 }
 0x4fd   : > { %v3995_v44 = vmul.f32 %v7247_v42, %v3959_v38  ;;  %v8271_v38 = vld [vmem:[#allocation42_spill] sm:$0xff] }
 0x4fe   : > { %v4400_v56 = vmax.f32 %v4368_v20, 0.0  ;;  %v3160_v60 = vpop.f32.mrf.mxu3  ;;  %v2783_v32 = vrot.slane %v8271_v38, 2  ;;  %v3515_v38 = vrot.slane %v7463_v14, 1 }
 0x4ff   : > { %v3244_v62 = vadd.f32 %v3160_v60, %v8269_v39  ;;  %v4207_v35 = vpop.f32.mrf.mxu2  ;;  %v4031_v59 = vadd.f32 %v7253_v25, %v3995_v44 }
 0x500   : > { %4432 = vst [vmem:[%s7507_s11 + $0x10] sm:$0xff] %v4400_v56  ;;  %v4301_v18 = vmul.f32 %v7478_v9, %v4207_v35  ;;  %v8273_v56 = vld [vmem:[#allocation54_spill] sm:$0xff] }
 0x501   : > { %v3602_v54 = vadd.f32 %v3514_v22, %v3244_v62  ;;  %v4063_v40 = vmax.f32 %v4031_v59, 0.0  ;;  %v2154_v60 = vadd.f32 %v8273_v56, %v8272_v55  ;;  %v8275_v62 = vld [vmem:[#allocation55_spill] sm:$0xff]  ;;  %v7573_v59 = vld [vmem:[#allocation2 + $0x198] sm:$0xff]  ;;  %v7575_v22 = vpop.f32.mrf.mxu1  ;;  %v8278_v56 = vld [vmem:[#allocation30_spill] sm:$0xff] }
 0x502   : > { %v4337_v12 = vadd.f32 %v7485_v63, %v4301_v18  ;;  %v2782_v35 = vrot.slane %v8275_v62, 2  ;;  %4953 = vmatmul.msk.f32.gmra.mxu0 %vm662_vm0, %v7573_v59  ;;  %5001 = vmatmul.msk.f32.gmra.mxu1 %vm662_vm0, %v7573_v59  ;;  %v7596_v62 = vld [vmem:[#allocation2 + $0x1a0] sm:$0xff] }
 0x503   : > { %v3960_v57 = vadd.f32 %v3872_v31, %v3602_v54  ;;  %4899 = vmatmul.msk.f32.gmra.mxu3 %vm662_vm0, %v7080_v28  ;;  %5018 = vmatmul.msk.f32.gmra.mxu2 %vm662_vm0, %v4063_v40  ;;  %v8274_v28 = vld [vmem:[#allocation66_spill] sm:$0xff] }
 0x504   : > { %v4369_v1 = vadd.f32 %v5184_v53, %v4337_v12  ;;  %v2424_v39 = vrot.slane %v8274_v28, 1  ;;  %v2784_v40 = vsel %vm1651_vm4, %v2782_v35, %v2783_v32  ;;  %v3516_v12 = vrot.slane %v7487_v26, 1  ;;  %v8276_v53 = vld [vmem:[#allocation70_spill] sm:$0xff]  ;;  %v8279_v28 = vld [vmem:[#allocation57_spill] sm:$0xff]  ;;  %v7598_v35 = vpop.f32.mrf.mxu0 }
 0x505   : > { %v3996_v23 = vmul.f32 %v7247_v42, %v3960_v57 }
 0x506   : > { %v4401_v34 = vmax.f32 %v4369_v1, 0.0  ;;  %v3163_v20 = vpop.f32.mrf.mxu3  ;;  %v2426_v54 = vsel %vm1292_vm3, %v2424_v39, %v2425_v29  ;;  %v2427_v1 = vrot.slane %v8276_v53, 1  ;;  %v3873_v39 = vrot.slane %v7468_v41, 2 }
 0x507   : > { %v4032_v44 = vadd.f32 %v7253_v25, %v3996_v23  ;;  %v2512_v31 = vadd.f32 %v2426_v54, %v2154_v60  ;;  %v8277_v23 = vld [vmem:[#allocation43_spill] sm:$0xff]  ;;  %v3517_v60 = vsel %vm1292_vm3, %v3515_v38, %v3516_v12  ;;  %v3518_v53 = vrot.slane %v7512_v47, 1 }
 0x508   : > { %4433 = vst [vmem:[%s7507_s11 + $0x18] sm:$0xff] %v4401_v34  ;;  %v2785_v11 = vrot.slane %v8277_v23, 2  ;;  %v3874_v34 = vrot.slane %v7493_v16, 2  ;;  %v5185_v23 = vld [vmem:[%s5515_s20 + $0x20] sm:$0xff] }
 0x509   : > { %v4064_v18 = vmax.f32 %v4032_v44, 0.0  ;;  %v2870_v57 = vadd.f32 %v2784_v40, %v2512_v31  ;;  %v7608_v40 = vpop.f32.mrf.mxu1 }
 0x50a   : > { %4954 = vmatmul.msk.f32.gmra.mxu0 %vm662_vm0, %v7596_v62  ;;  %5002 = vmatmul.msk.f32.gmra.mxu1 %vm662_vm0, %v7596_v62  ;;  %v3875_v16 = vsel %vm1651_vm4, %v3873_v39, %v3874_v34  ;;  %v2786_v54 = vsel %vm1651_vm4, %v2783_v32, %v2785_v11 }
 0x50b   : > { %4900 = vmatmul.msk.f32.gmra.mxu3 %vm662_vm0, %v7096_v33  ;;  %5019 = vmatmul.msk.f32.gmra.mxu2 %vm662_vm0, %v4064_v18  ;;  %v2155_v33 = vadd.f32 %v8279_v28, %v8278_v56  ;;  %v2428_v18 = vsel %vm1292_vm3, %v2425_v29, %v2427_v1  ;;  %v7617_v28 = vld [vmem:[#allocation2 + $0x1a8] sm:$0xff] }
 0x50e   : > { %v3165_v20 = vpop.f32.mrf.mxu3 }
 0x50f   : > { %v3245_v44 = vadd.f32 %v3165_v20, %v2870_v57  ;;  %v4210_v55 = vpop.f32.mrf.mxu2  ;;  %v2513_v57 = vadd.f32 %v2428_v18, %v2155_v33 }
 0x510   : > { %v4302_v26 = vmul.f32 %v7478_v9, %v4210_v55  ;;  %v3876_v55 = vrot.slane %v7516_v17, 2 }
 0x511   : > { %v3603_v14 = vadd.f32 %v3517_v60, %v3245_v44  ;;  %v2871_v44 = vadd.f32 %v2786_v54, %v2513_v57  ;;  %v8280_v54 = vld [vmem:[#allocation73_spill] sm:$0xff] }
 0x512   : > { %v4338_v41 = vadd.f32 %v7485_v63, %v4302_v26  ;;  %4955 = vmatmul.msk.f32.gmra.mxu0 %vm662_vm0, %v7617_v28  ;;  %5003 = vmatmul.msk.f32.gmra.mxu1 %vm662_vm0, %v7617_v28  ;;  %v3877_v17 = vsel %vm1651_vm4, %v3874_v34, %v3876_v55  ;;  %v7628_v26 = vpop.f32.mrf.mxu0  ;;  %v2788_v34 = vrot.slane %v7173_v58, 2 }
 0x513   : > { %v3961_v31 = vadd.f32 %v3875_v16, %v3603_v14  ;;  %4901 = vmatmul.msk.f32.gmra.mxu3 %vm662_vm0, %v7112_v0  ;;  %v3519_v0 = vsel %vm1292_vm3, %v3516_v12, %v3518_v53  ;;  %v5186_v12 = vld [vmem:[%s5515_s20 + $0x28] sm:$0xff] }
 0x514   : > { %v4370_v38 = vadd.f32 %v5185_v23, %v4338_v41  ;;  %v7634_v41 = vpop.f32.mrf.mxu1 }
 0x515   : > { %v3997_v20 = vmul.f32 %v7247_v42, %v3961_v31  ;;  %v2430_v31 = vrot.slane %v8280_v54, 1 }
 0x516   : > { %v4402_v29 = vmax.f32 %v4370_v38, 0.0  ;;  %v3168_v1 = vpop.f32.mrf.mxu3  ;;  %v8281_v38 = vld [vmem:[#allocation33_spill] sm:$0xff] }
 0x517   : > { %v3246_v32 = vadd.f32 %v3168_v1, %v2871_v44  ;;  %v4213_v11 = vpop.f32.mrf.mxu2  ;;  %v4033_v56 = vadd.f32 %v7253_v25, %v3997_v20  ;;  %v8282_v20 = vld [vmem:[#allocation59_spill] sm:$0xff] }
 0x518   : > { %4434 = vst [vmem:[%s7507_s11 + $0x20] sm:$0xff] %v4402_v29  ;;  %v4303_v47 = vmul.f32 %v7478_v9, %v4213_v11  ;;  %v2156_v44 = vadd.f32 %v8282_v20, %v8281_v38  ;;  %v8284_v29 = vld [vmem:[#allocation96_spill] sm:$0xff]  ;;  %v3878_v38 = vrot.slane %v7531_v27, 2  ;;  %v3523_v27 = vrot.slane %v7565_v48, 1 }
 0x519   : > { %v3604_v33 = vadd.f32 %v3519_v0, %v3246_v32  ;;  %v4065_v39 = vmax.f32 %v4033_v56, 0.0  ;;  %v2787_v1 = vrot.slane %v8284_v29, 2  ;;  %v3521_v0 = vrot.slane %v7545_v3, 1  ;;  %v8286_v3 = vld [vmem:[#allocation34_spill] sm:$0xff]  ;;  %v5187_v29 = vld [vmem:[%s5515_s20 + $0x30] sm:$0xff] }
 0x51a   : > { %v4339_v60 = vadd.f32 %v7485_v63, %v4303_v47  ;;  %v7651_v47 = vpop.f32.mrf.mxu0 }
 0x51b   : > { %v3962_v14 = vadd.f32 %v3877_v17, %v3604_v33  ;;  %4902 = vmatmul.msk.f32.gmra.mxu3 %vm662_vm0, %v7337_v61  ;;  %5020 = vmatmul.msk.f32.gmra.mxu2 %vm662_vm0, %v4065_v39  ;;  %v8283_v61 = vld [vmem:[#allocation71_spill] sm:$0xff]  ;;  %v2789_v56 = vsel %vm1651_vm4, %v2787_v1, %v2788_v34 }
 0x51c   : > { %v4371_v16 = vadd.f32 %v5186_v12, %v4339_v60  ;;  %v2429_v55 = vrot.slane %v8283_v61, 1  ;;  %v8285_v39 = vld [vmem:[#allocation75_spill] sm:$0xff]  ;;  %v2790_v60 = vrot.slane %v7185_v24, 2  ;;  %v3879_v12 = vrot.slane %v7549_v51, 2 }
 0x51d   : > { %v3998_v18 = vmul.f32 %v7247_v42, %v3962_v14  ;;  %v2432_v17 = vrot.slane %v8285_v39, 1  ;;  %v3520_v14 = vrot.slane %v7525_v6, 1 }
 0x51e   : > { %v4403_v57 = vmax.f32 %v4371_v16, 0.0  ;;  %v3171_v53 = vpop.f32.mrf.mxu3  ;;  %v2431_v11 = vsel %vm1292_vm3, %v2429_v55, %v2430_v31  ;;  %v2791_v61 = vsel %vm1651_vm4, %v2788_v34, %v2790_v60 }
 0x51f   : > { %v4034_v23 = vadd.f32 %v7253_v25, %v3998_v18  ;;  %v2514_v58 = vadd.f32 %v2431_v11, %v2156_v44  ;;  %v8287_v53 = vld [vmem:[#allocation61_spill] sm:$0xff]  ;;  %v3522_v20 = vsel %vm1292_vm3, %v3520_v14, %v3521_v0  ;;  %v3880_v44 = vsel %vm1651_vm4, %v3878_v38, %v3879_v12  ;;  %v8288_v38 = vld [vmem:[#allocation35_spill] sm:$0xff] }
 0x520   : > { %4435 = vst [vmem:[%s7507_s11 + $0x28] sm:$0xff] %v4403_v57  ;;  %v2433_v51 = vsel %vm1292_vm3, %v2430_v31, %v2432_v17  ;;  %v3524_v14 = vsel %vm1292_vm3, %v3521_v0, %v3523_v27 }
 0x521   : > { %v4066_v32 = vmax.f32 %v4034_v23, 0.0  ;;  %v2872_v33 = vadd.f32 %v2789_v56, %v2514_v58  ;;  %v2157_v23 = vadd.f32 %v8287_v53, %v8286_v3  ;;  %v5188_v3 = vld [vmem:[%s5515_s20 + $0x38] sm:$0xff] }
 0x522   : > { %v7674_v17 = vpop.f32.mrf.mxu0 }
 0x523   : > { %4903 = vmatmul.msk.f32.gmra.mxu3 %vm662_vm0, %v7354_v43  ;;  %5021 = vmatmul.msk.f32.gmra.mxu2 %vm662_vm0, %v4066_v32  ;;  %v7657_v43 = vpop.f32.mrf.mxu1  ;;  %v2515_v32 = vadd.f32 %v2433_v51, %v2157_v23  ;;  %v8290_v51 = vld [vmem:[#allocation63_spill] sm:$0xff] }
 0x525   : > { %v2873_v58 = vadd.f32 %v2791_v61, %v2515_v32 }
 0x526   : > { %v3173_v16 = vpop.f32.mrf.mxu3  ;;  %v4216_v18 = vpop.f32.mrf.mxu2 }
 0x527   : > { %v3247_v54 = vadd.f32 %v3173_v16, %v2872_v33  ;;  %v4304_v57 = vmul.f32 %v7478_v9, %v4216_v18  ;;  %v3881_v33 = vrot.slane %v7575_v22, 2 }
 0x529   : > { %v3605_v24 = vadd.f32 %v3522_v20, %v3247_v54  ;;  %v4340_v6 = vadd.f32 %v7485_v63, %v4304_v57  ;;  %v3882_v22 = vsel %vm1651_vm4, %v3879_v12, %v3881_v33  ;;  %v2435_v20 = vrot.slane %v8288_v38, 1  ;;  %v8289_v12 = vld [vmem:[#allocation88_spill] sm:$0xff]  ;;  %v5189_v38 = vld [vmem:[%s5515_s20 + $0x40] sm:$0xff] }
 0x52a   : > { %v2158_v61 = vadd.f32 %v8290_v51, %v8289_v12 }
 0x52b   : > { %v3963_v55 = vadd.f32 %v3880_v44, %v3605_v24  ;;  %v4372_v1 = vadd.f32 %v5187_v29, %v4340_v6  ;;  %4904 = vmatmul.msk.f32.gmra.mxu3 %vm662_vm0, %v7367_v5  ;;  %v7680_v48 = vpop.f32.mrf.mxu1  ;;  %v2793_v24 = vrot.slane %v7207_v15, 2 }
 0x52d   : > { %v3999_v11 = vmul.f32 %v7247_v42, %v3963_v55  ;;  %v4404_v56 = vmax.f32 %v4372_v1, 0.0  ;;  %v8291_v55 = vld [vmem:[#allocation76_spill] sm:$0xff]  ;;  %v7697_v1 = vpop.f32.mrf.mxu0 }
 0x52e   : > { %v3176_v39 = vpop.f32.mrf.mxu3  ;;  %v4219_v31 = vpop.f32.mrf.mxu2  ;;  %v2434_v29 = vrot.slane %v8291_v55, 1 }
 0x52f   : > { %4436 = vst [vmem:[%s7507_s11 + $0x30] sm:$0xff] %v4404_v56  ;;  %v3248_v34 = vadd.f32 %v3176_v39, %v2873_v58  ;;  %v4305_v60 = vmul.f32 %v7478_v9, %v4219_v31  ;;  %v4035_v5 = vadd.f32 %v7253_v25, %v3999_v11  ;;  %v3526_v58 = vrot.slane %v7628_v26, 1  ;;  %v8292_v39 = vld [vmem:[#allocation78_spill] sm:$0xff] }
 0x530   : > { %v2436_v27 = vsel %vm1292_vm3, %v2434_v29, %v2435_v20  ;;  %v2795_v31 = vrot.slane %v7222_v49, 2  ;;  %v3883_v26 = vrot.slane %v7608_v40, 2  ;;  %v3528_v40 = vrot.slane %v7651_v47, 1 }
 0x531   : > { %v3606_v16 = vadd.f32 %v3524_v14, %v3248_v34  ;;  %v4341_v18 = vadd.f32 %v7485_v63, %v4305_v60  ;;  %v4067_v54 = vmax.f32 %v4035_v5, 0.0  ;;  %v2516_v15 = vadd.f32 %v2436_v27, %v2158_v61 }
 0x532   : > { %v3525_v34 = vrot.slane %v7598_v35, 1  ;;  %v3884_v60 = vrot.slane %v7634_v41, 2  ;;  %v2796_v41 = vsel %vm1651_vm4, %v2793_v24, %v2795_v31 }
 0x533   : > { %v3964_v57 = vadd.f32 %v3882_v22, %v3606_v16  ;;  %v4373_v53 = vadd.f32 %v5188_v3, %v4341_v18  ;;  %4905 = vmatmul.msk.f32.gmra.mxu3 %vm662_vm0, %v7573_v59  ;;  %5022 = vmatmul.msk.f32.gmra.mxu2 %vm662_vm0, %v4067_v54  ;;  %v2792_v59 = vrot.slane %v7199_v46, 2  ;;  %v7701_v56 = vpop.f32.mrf.mxu1  ;;  %v2437_v46 = vrot.slane %v8292_v39, 1  ;;  %v8293_v18 = vld [vmem:[#allocation24_spill] sm:$0xff] }
 0x534   : > { %v8294_v54 = vld [vmem:[#allocation64_spill] sm:$0xff]  ;;  %v3885_v35 = vsel %vm1651_vm4, %v3883_v26, %v3884_v60 }
 0x535   : > { %v4000_v23 = vmul.f32 %v7247_v42, %v3964_v57  ;;  %v4405_v0 = vmax.f32 %v4373_v53, 0.0  ;;  %v2794_v11 = vsel %vm1651_vm4, %v2792_v59, %v2793_v24  ;;  %v2159_v22 = vadd.f32 %v8294_v54, %v8293_v18  ;;  %v8296_v54 = vld [vmem:[#allocation27_spill] sm:$0xff] }
 0x536   : > { %v3179_v6 = vpop.f32.mrf.mxu3  ;;  %v2874_v33 = vadd.f32 %v2794_v11, %v2516_v15  ;;  %v3527_v57 = vsel %vm1292_vm3, %v3525_v34, %v3526_v58  ;;  %v2438_v53 = vsel %vm1292_vm3, %v2435_v20, %v2437_v46  ;;  %v3886_v24 = vrot.slane %v7657_v43, 2  ;;  %v5190_v46 = vld [vmem:[%s5515_s20 + $0x48] sm:$0xff] }
 0x537   : > { %4437 = vst [vmem:[%s7507_s11 + $0x38] sm:$0xff] %v4405_v0  ;;  %v4036_v44 = vadd.f32 %v7253_v25, %v4000_v23  ;;  %v7720_v23 = vpop.f32.mrf.mxu0 }
 0x539   : > { %v4068_v32 = vmax.f32 %v4036_v44, 0.0  ;;  %v2517_v44 = vadd.f32 %v2438_v53, %v2159_v22  ;;  %v8297_v22 = vld [vmem:[#allocation65_spill] sm:$0xff] }
 0x53a   : > { %v2160_v26 = vadd.f32 %v8297_v22, %v8296_v54 }
 0x53b   : > { %4906 = vmatmul.msk.f32.gmra.mxu3 %vm662_vm0, %v7596_v62  ;;  %5023 = vmatmul.msk.f32.gmra.mxu2 %vm662_vm0, %v4068_v32  ;;  %v7726_v12 = vpop.f32.mrf.mxu1  ;;  %v2875_v61 = vadd.f32 %v2796_v41, %v2517_v44  ;;  %v2800_v44 = vrot.slane %v7276_v50, 2 }
 0x53e   : > { %v3181_v5 = vpop.f32.mrf.mxu3  ;;  %v4222_v14 = vpop.f32.mrf.mxu2 }
 0x53f   : > { %v3249_v16 = vadd.f32 %v3181_v5, %v2874_v33  ;;  %v4306_v62 = vmul.f32 %v7478_v9, %v4222_v14  ;;  %v3887_v33 = vsel %vm1651_vm4, %v3884_v60, %v3886_v24  ;;  %v7738_v31 = vpop.f32.mrf.mxu0  ;;  %v8295_v14 = vld [vmem:[#allocation41_spill] sm:$0xff] }
 0x541   : > { %v3607_v3 = vadd.f32 %v3527_v57, %v3249_v16  ;;  %v4342_v49 = vadd.f32 %v7485_v63, %v4306_v62  ;;  %v2440_v16 = vrot.slane %v8295_v14, 1  ;;  %v8298_v57 = vld [vmem:[#allocation39_spill] sm:$0xff] }
 0x543   : > { %v3965_v0 = vadd.f32 %v3885_v35, %v3607_v3  ;;  %v4374_v6 = vadd.f32 %v5189_v38, %v4342_v49  ;;  %4907 = vmatmul.msk.f32.gmra.mxu3 %vm662_vm0, %v7617_v28  ;;  %v3529_v28 = vsel %vm1292_vm3, %v3526_v58, %v3528_v40  ;;  %v2798_v58 = vrot.slane %v7260_v45, 2  ;;  %v7743_v18 = vpop.f32.mrf.mxu1  ;;  %v8299_v49 = vld [vmem:[#allocation99_spill] sm:$0xff] }
 0x544   : > { %v2439_v3 = vrot.slane %v8298_v57, 1  ;;  %v2797_v35 = vrot.slane %v8299_v49, 2  ;;  %v3530_v40 = vrot.slane %v7674_v17, 1 }
 0x545   : > { %v4001_v51 = vmul.f32 %v7247_v42, %v3965_v0  ;;  %v4406_v20 = vmax.f32 %v4374_v6, 0.0  ;;  %v3531_v0 = vrot.slane %v7697_v1, 1  ;;  %v8300_v6 = vld [vmem:[#allocation62_spill] sm:$0xff] }
 0x546   : > { %v3184_v55 = vpop.f32.mrf.mxu3  ;;  %v4225_v29 = vpop.f32.mrf.mxu2  ;;  %v2799_v41 = vsel %vm1651_vm4, %v2797_v35, %v2798_v58 }
 0x547   : > { %4438 = vst [vmem:[%s7507_s11 + $0x40] sm:$0xff] %v4406_v20  ;;  %v3250_v59 = vadd.f32 %v3184_v55, %v2875_v61  ;;  %v4307_v32 = vmul.f32 %v7478_v9, %v4225_v29  ;;  %v4037_v27 = vadd.f32 %v7253_v25, %v4001_v51  ;;  %v3889_v51 = vrot.slane %v7701_v56, 2  ;;  %v7759_v24 = vpop.f32.mrf.mxu0 }
 0x549   : > { %v3608_v47 = vadd.f32 %v3529_v28, %v3250_v59  ;;  %v4343_v11 = vadd.f32 %v7485_v63, %v4307_v32  ;;  %v4069_v15 = vmax.f32 %v4037_v27, 0.0  ;;  %v8301_v59 = vld [vmem:[#allocation28_spill] sm:$0xff]  ;;  %v8302_v32 = vld [vmem:[#allocation15_spill] sm:$0xff]  ;;  %v3888_v27 = vrot.slane %v7680_v48, 2 }
 0x54a   : > { %v2161_v1 = vadd.f32 %v8302_v32, %v8301_v59  ;;  %v3532_v28 = vsel %vm1292_vm3, %v3530_v40, %v3531_v0  ;;  %v3533_v48 = vrot.slane %v7720_v23, 1  ;;  %v7786_v23 = vld [vmem:[%s8046_s7] ss:$0 sm:$0xff]  ;;  %v2803_v40 = vrot.slane %v7308_v52, 2 }
 0x54b   : > { %v3966_v39 = vadd.f32 %v3887_v33, %v3608_v47  ;;  %v4375_v43 = vadd.f32 %v5190_v46, %v4343_v11  ;;  %5024 = vmatmul.msk.f32.gmra.mxu2 %vm662_vm0, %v4069_v15  ;;  %v7766_v50 = vpop.f32.mrf.mxu1  ;;  %v3890_v47 = vsel %vm1651_vm4, %v3888_v27, %v3889_v51  ;;  %v2801_v15 = vsel %vm1651_vm4, %v2798_v58, %v2800_v44  ;;  %v8306_v59 = vld [vmem:[#allocation45_spill] sm:$0xff] }
 0x54c   : > { %v3534_v57 = vsel %vm1292_vm3, %v3531_v0, %v3533_v48  ;;  %v8303_v0 = vld [vmem:[#allocation26_spill] sm:$0xff]  ;;  %v2444_v32 = vrot.slane %v8306_v59, 1 }
 0x54d   : > { %v4002_v34 = vmul.f32 %v7247_v42, %v3966_v39  ;;  %v4407_v5 = vmax.f32 %v4375_v43, 0.0  ;;  %v2441_v42 = vsel %vm1292_vm3, %v2439_v3, %v2440_v16  ;;  %v5191_v39 = vld [vmem:[%s5515_s20 + $0x50] sm:$0xff]  ;;  %v2445_v44 = vrot.slane %v8303_v0, 1 }
 0x54e   : > { %v3187_v62 = vpop.f32.mrf.mxu3  ;;  %v2518_v45 = vadd.f32 %v2441_v42, %v2160_v26 }
 0x54f   : > { %4439 = vst [vmem:[%s7507_s11 + $0x48] sm:$0xff] %v4407_v5  ;;  %v4038_v60 = vadd.f32 %v7253_v25, %v4002_v34  ;;  %v2442_v25 = vrot.slane %v8300_v6, 1  ;;  %v7777_v34 = vld [vmem:[%s8045_s6] ss:$0 sm:$0xff]  ;;  %v7790_v3 = vpop.f32.mrf.mxu0 }
 0x550   : > { %v2876_v38 = vadd.f32 %v2799_v41, %v2518_v45  ;;  %v5194_v45 = vld [vmem:[%s5515_s20 + $0x58] sm:$0xff] }
 0x551   : > { %v4070_v53 = vmax.f32 %v4038_v60, 0.0  ;;  %v2443_v11 = vsel %vm1292_vm3, %v2440_v16, %v2442_v25  ;;  %v3891_v60 = vrot.slane %v7726_v12, 2 }
 0x552   : > { %v2519_v43 = vadd.f32 %v2443_v11, %v2161_v1  ;;  %v2802_v1 = vrot.slane %v7292_v19, 2  ;;  %v3535_v19 = vrot.slane %v7738_v31, 1 }
 0x553   : > { %5025 = vmatmul.msk.f32.gmra.mxu2 %vm662_vm0, %v4070_v53  ;;  %v3892_v53 = vsel %vm1651_vm4, %v3889_v51, %v3891_v60  ;;  %v7794_v42 = vpop.f32.mrf.mxu1  ;;  %v8305_v51 = vld [vmem:[#allocation67_spill] sm:$0xff]  ;;  %v8308_v60 = vld [vmem:[#allocation32_spill] sm:$0xff] }
 0x554   : > { %v2877_v62 = vadd.f32 %v2801_v15, %v2519_v43  ;;  %v3894_v43 = vrot.slane %v7766_v50, 2 }
 0x556   : > { %v3189_v20 = vpop.f32.mrf.mxu3  ;;  %v4228_v61 = vpop.f32.mrf.mxu2 }
 0x557   : > { %v3251_v55 = vadd.f32 %v3189_v20, %v2876_v38  ;;  %v4308_v29 = vmul.f32 %v7478_v9, %v4228_v61 }
 0x559   : > { %v3609_v17 = vadd.f32 %v3532_v28, %v3251_v55  ;;  %v4344_v56 = vadd.f32 %v7485_v63, %v4308_v29  ;;  %v8304_v55 = vld [vmem:[#allocation31_spill] sm:$0xff]  ;;  %v2446_v28 = vsel %vm1292_vm3, %v2444_v32, %v2445_v44  ;;  %v5196_v32 = vld [vmem:[%s5515_s20 + $0x68] sm:$0xff] }
 0x55a   : > { %v2162_v29 = vadd.f32 %v8305_v51, %v8304_v55 }
 0x55b   : > { %v3967_v33 = vadd.f32 %v3890_v47, %v3609_v17  ;;  %v4376_v46 = vadd.f32 %v5191_v39, %v4344_v56  ;;  %v2804_v17 = vsel %vm1651_vm4, %v2802_v1, %v2803_v40  ;;  %v7809_v56 = vpop.f32.mrf.mxu0  ;;  %v3536_v47 = vrot.slane %v7759_v24, 1  ;;  %v7813_v11 = vpop.f32.mrf.mxu1 }
 0x55c   : > { %v2520_v52 = vadd.f32 %v2446_v28, %v2162_v29 }
 0x55d   : > { %v4003_v5 = vmul.f32 %v7777_v34, %v3967_v33  ;;  %v4408_v14 = vmax.f32 %v4376_v46, 0.0  ;;  %v8307_v33 = vld [vmem:[#allocation80_spill] sm:$0xff]  ;;  %v2805_v46 = vrot.slane %v7325_v13, 2 }
 0x55e   : > { %v3192_v16 = vpop.f32.mrf.mxu3  ;;  %v4231_v58 = vpop.f32.mrf.mxu2  ;;  %v2878_v15 = vadd.f32 %v2804_v17, %v2520_v52  ;;  %v2447_v39 = vrot.slane %v8307_v33, 1  ;;  %v8310_v17 = vld [vmem:[#allocation84_spill] sm:$0xff] }
 0x55f   : > { %4440 = vst [vmem:[%s7507_s11 + $0x50] sm:$0xff] %v4408_v14  ;;  %v3252_v54 = vadd.f32 %v3192_v16, %v2877_v62  ;;  %v4309_v22 = vmul.f32 %v7478_v9, %v4231_v58  ;;  %v4039_v26 = vadd.f32 %v7786_v23, %v4003_v5  ;;  %v8309_v16 = vld [vmem:[#allocation69_spill] sm:$0xff]  ;;  %v3893_v58 = vrot.slane %v7743_v18, 2 }
 0x560   : > { %v2163_v24 = vadd.f32 %v8309_v16, %v8308_v60  ;;  %v2448_v31 = vsel %vm1292_vm3, %v2445_v44, %v2447_v39  ;;  %v2806_v50 = vsel %vm1651_vm4, %v2803_v40, %v2805_v46  ;;  %v2450_v52 = vrot.slane %v8310_v17, 1  ;;  %v8311_v46 = vld [vmem:[#allocation36_spill] sm:$0xff] }
 0x561   : > { %v3610_v12 = vadd.f32 %v3534_v57, %v3252_v54  ;;  %v4345_v49 = vadd.f32 %v7485_v63, %v4309_v22  ;;  %v4071_v35 = vmax.f32 %v4039_v26, 0.0  ;;  %v3537_v54 = vsel %vm1292_vm3, %v3535_v19, %v3536_v47  ;;  %v8312_v19 = vld [vmem:[#allocation72_spill] sm:$0xff] }
 0x562   : > { %v3895_v26 = vsel %vm1651_vm4, %v3893_v58, %v3894_v43 }
 0x563   : > { %v3968_v41 = vadd.f32 %v3892_v53, %v3610_v12  ;;  %v4377_v38 = vadd.f32 %v5194_v45, %v4345_v49  ;;  %5026 = vmatmul.msk.f32.gmra.mxu2 %vm662_vm0, %v4071_v35  ;;  %v5195_v12 = vld [vmem:[%s5515_s20 + $0x60] sm:$0xff]  ;;  %v2521_v35 = vadd.f32 %v2448_v31, %v2163_v24  ;;  %v3538_v53 = vrot.slane %v7790_v3, 1  ;;  %v7834_v44 = vpop.f32.mrf.mxu1 }
 0x564   : > { %v3540_v31 = vrot.slane %v7809_v56, 1 }
 0x565   : > { %v4004_v6 = vmul.f32 %v7777_v34, %v3968_v41  ;;  %v4409_v25 = vmax.f32 %v4377_v38, 0.0  ;;  %v7830_v41 = vpop.f32.mrf.mxu0  ;;  %v2879_v38 = vadd.f32 %v2806_v50, %v2521_v35  ;;  %v3539_v3 = vsel %vm1292_vm3, %v3536_v47, %v3538_v53  ;;  %v8315_v35 = vld [vmem:[#allocation37_spill] sm:$0xff]  ;;  %v8316_v53 = vld [vmem:[#allocation74_spill] sm:$0xff] }
 0x566   : > { %v3195_v20 = vpop.f32.mrf.mxu3  ;;  %v3541_v58 = vrot.slane %v7830_v41, 1  ;;  %v3898_v41 = vrot.slane %v7813_v11, 2 }
 0x567   : > { %4441 = vst [vmem:[%s7507_s11 + $0x58] sm:$0xff] %v4409_v25  ;;  %v4040_v61 = vadd.f32 %v7786_v23, %v4004_v6  ;;  %v3896_v6 = vrot.slane %v7794_v42, 2 }
 0x569   : > { %v4072_v27 = vmax.f32 %v4040_v61, 0.0  ;;  %v3897_v59 = vsel %vm1651_vm4, %v3894_v43, %v3896_v6  ;;  %v2164_v43 = vadd.f32 %v8312_v19, %v8311_v46  ;;  %v5198_v19 = vld [vmem:[%s5515_s20 + $0x78] sm:$0xff] }
 0x56b   : > { %5027 = vmatmul.msk.f32.gmra.mxu2 %vm662_vm0, %v4072_v27 }
 0x56d   : > { %v3406_v47 = vpop.f32.mrf.mxu0 }
 0x56e   : > { %v3197_v48 = vpop.f32.mrf.mxu3  ;;  %v4234_v5 = vpop.f32.mrf.mxu2  ;;  %v3543_v11 = vrot.slane %v3406_v47, 1 }
 0x56f   : > { %v3253_v14 = vadd.f32 %v3197_v48, %v2878_v15  ;;  %v4310_v62 = vmul.f32 %v7478_v9, %v4234_v5  ;;  %v2808_v15 = vrot.slane %v7361_v37, 2  ;;  %v8313_v48 = vld [vmem:[#allocation51_spill] sm:$0xff] }
 0x570   : > { %v2449_v5 = vrot.slane %v8313_v48, 1  ;;  %v3544_v17 = vsel %vm1292_vm3, %v3541_v58, %v3543_v11  ;;  %v8317_v48 = vld [vmem:[#allocation38_spill] sm:$0xff] }
 0x571   : > { %v3611_v22 = vadd.f32 %v3537_v54, %v3253_v14  ;;  %v4346_v13 = vadd.f32 %v7485_v63, %v4310_v62  ;;  %v2807_v14 = vrot.slane %v7344_v8, 2  ;;  %v3764_v62 = vpop.f32.mrf.mxu1  ;;  %v3899_v8 = vrot.slane %v7834_v44, 2 }
 0x572   : > { %v2451_v16 = vsel %vm1292_vm3, %v2449_v5, %v2450_v52  ;;  %v2455_v5 = vrot.slane %v8317_v48, 1 }
 0x573   : > { %v3969_v57 = vadd.f32 %v3895_v26, %v3611_v22  ;;  %v4378_v49 = vadd.f32 %v5195_v12, %v4346_v13  ;;  %v2809_v24 = vsel %vm1651_vm4, %v2807_v14, %v2808_v15  ;;  %v2522_v37 = vadd.f32 %v2451_v16, %v2164_v43  ;;  %v8314_v22 = vld [vmem:[#allocation85_spill] sm:$0xff]  ;;  %v8318_v16 = vld [vmem:[#allocation87_spill] sm:$0xff] }
 0x574   : > { %v2452_v13 = vrot.slane %v8314_v22, 1  ;;  %v2810_v26 = vrot.slane %v7379_v10, 2  ;;  %v3900_v6 = vsel %vm1651_vm4, %v3898_v41, %v3899_v8 }
 0x575   : > { %v4005_v18 = vmul.f32 %v7777_v34, %v3969_v57  ;;  %v4410_v45 = vmax.f32 %v4378_v49, 0.0  ;;  %v2880_v54 = vadd.f32 %v2809_v24, %v2522_v37  ;;  %v2454_v24 = vrot.slane %v8318_v16, 1 }
 0x576   : > { %v3200_v25 = vpop.f32.mrf.mxu3  ;;  %v4237_v0 = vpop.f32.mrf.mxu2 }
 0x577   : > { %4442 = vst [vmem:[%s7507_s11 + $0x60] sm:$0xff] %v4410_v45  ;;  %v3254_v40 = vadd.f32 %v3200_v25, %v2879_v38  ;;  %v4311_v20 = vmul.f32 %v7478_v9, %v4237_v0  ;;  %v4041_v61 = vadd.f32 %v7786_v23, %v4005_v18  ;;  %v2165_v18 = vadd.f32 %v8316_v53, %v8315_v35  ;;  %v7866_v38 = vpop.f32.mrf.mxu0 }
 0x578   : > { %v3542_v45 = vsel %vm1292_vm3, %v3540_v31, %v3541_v58  ;;  %v2453_v25 = vsel %vm1292_vm3, %v2450_v52, %v2452_v13  ;;  %v2811_v0 = vsel %vm1651_vm4, %v2808_v15, %v2810_v26  ;;  %v2456_v22 = vsel %vm1292_vm3, %v2454_v24, %v2455_v5  ;;  %v8319_v13 = vld [vmem:[#allocation53_spill] sm:$0xff] }
 0x579   : > { %v3612_v55 = vadd.f32 %v3539_v3, %v3254_v40  ;;  %v4347_v51 = vadd.f32 %v7485_v63, %v4311_v20  ;;  %v4073_v29 = vmax.f32 %v4041_v61, 0.0  ;;  %v3767_v44 = vpop.f32.mrf.mxu1  ;;  %v5197_v20 = vld [vmem:[%s5515_s20 + $0x70] sm:$0xff]  ;;  %v2523_v3 = vadd.f32 %v2453_v25, %v2165_v18 }
 0x57a   : > { %v2524_v26 = vadd.f32 %v2456_v22, %v8319_v13  ;;  %v3545_v18 = vrot.slane %v7866_v38, 1  ;;  %v2818_v13 = vrot.slane %v7450_v4, 2 }
 0x57b   : > { %v3970_v42 = vadd.f32 %v3897_v59, %v3612_v55  ;;  %v4379_v1 = vadd.f32 %v5196_v32, %v4347_v51  ;;  %5028 = vmatmul.msk.f32.gmra.mxu2 %vm662_vm0, %v4073_v29  ;;  %v2881_v29 = vadd.f32 %v2811_v0, %v2523_v3  ;;  %v3901_v59 = vrot.slane %v3764_v62, 2 }
 0x57c   : > { %v3903_v0 = vrot.slane %v3767_v44, 2 }
 0x57d   : > { %v4006_v27 = vmul.f32 %v7777_v34, %v3970_v42  ;;  %v4411_v28 = vmax.f32 %v4379_v1, 0.0  ;;  %v3902_v47 = vsel %vm1651_vm4, %v3899_v8, %v3901_v59  ;;  %v2812_v8 = vrot.slane %v7393_v7, 2 }
 0x57e   : > { %v3203_v33 = vpop.f32.mrf.mxu3  ;;  %v2815_v7 = vrot.slane %v7419_v30, 2 }
 0x57f   : > { %4443 = vst [vmem:[%s7507_s11 + $0x68] sm:$0xff] %v4411_v28  ;;  %v4042_v39 = vadd.f32 %v7786_v23, %v4006_v27 }
 0x581   : > { %v4074_v60 = vmax.f32 %v4042_v39, 0.0  ;;  %v3412_v39 = vpop.f32.mrf.mxu0  ;;  %v3770_v14 = vpop.f32.mrf.mxu1 }
 0x583   : > { %5029 = vmatmul.msk.f32.gmra.mxu2 %vm662_vm0, %v4074_v60 }
 0x586   : > { %v3205_v50 = vpop.f32.mrf.mxu3  ;;  %v4240_v57 = vpop.f32.mrf.mxu2 }
 0x587   : > { %v3255_v12 = vadd.f32 %v3205_v50, %v2880_v54  ;;  %v4312_v49 = vmul.f32 %v7478_v9, %v4240_v57  ;;  %v2813_v54 = vrot.slane %v7403_v21, 2  ;;  %v8320_v50 = vld [vmem:[#allocation89_spill] sm:$0xff]  ;;  %v3904_v21 = vrot.slane %v3770_v14, 2  ;;  %v5200_v14 = vld [vmem:[%s5515_s20 + $0x88] sm:$0xff] }
 0x588   : > { %v2457_v57 = vrot.slane %v8320_v50, 1 }
 0x589   : > { %v3613_v10 = vadd.f32 %v3542_v45, %v3255_v12  ;;  %v4348_v56 = vadd.f32 %v7485_v63, %v4312_v49  ;;  %v3546_v12 = vrot.slane %v3412_v39, 1  ;;  %v2814_v49 = vsel %vm1651_vm4, %v2812_v8, %v2813_v54  ;;  %v3415_v35 = vpop.f32.mrf.mxu0 }
 0x58a   : > { %v2882_v53 = vadd.f32 %v2814_v49, %v2524_v26  ;;  %v2458_v25 = vsel %vm1292_vm3, %v2455_v5, %v2457_v57  ;;  %v3905_v11 = vsel %vm1651_vm4, %v3903_v0, %v3904_v21  ;;  %v3548_v59 = vrot.slane %v3415_v35, 1  ;;  %v8325_v49 = vld [vmem:[#allocation93_spill] sm:$0xff] }
 0x58b   : > { %v3971_v40 = vadd.f32 %v3900_v6, %v3613_v10  ;;  %v4380_v61 = vadd.f32 %v5197_v20, %v4348_v56  ;;  %v3773_v10 = vpop.f32.mrf.mxu1  ;;  %v8321_v20 = vld [vmem:[#allocation56_spill] sm:$0xff]  ;;  %v2462_v35 = vrot.slane %v8325_v49, 1 }
 0x58c   : > { %v3549_v39 = vsel %vm1292_vm3, %v3546_v12, %v3548_v59 }
 0x58d   : > { %v4007_v55 = vmul.f32 %v7777_v34, %v3971_v40  ;;  %v4412_v51 = vmax.f32 %v4380_v61, 0.0  ;;  %v3547_v40 = vsel %vm1292_vm3, %v3545_v18, %v3546_v12  ;;  %v2525_v61 = vadd.f32 %v2458_v25, %v8321_v20  ;;  %v8326_v20 = vld [vmem:[#allocation98_spill] sm:$0xff] }
 0x58e   : > { %v3208_v42 = vpop.f32.mrf.mxu3  ;;  %v4243_v32 = vpop.f32.mrf.mxu2  ;;  %v2817_v12 = vrot.slane %v7431_v2, 2  ;;  %v2820_v25 = vrot.slane %v7466_v36, 2  ;;  %v5203_v36 = vld [vmem:[%s5515_s20 + $0x90] sm:$0xff] }
 0x58f   : > { %4444 = vst [vmem:[%s7507_s11 + $0x70] sm:$0xff] %v4412_v51  ;;  %v3256_v1 = vadd.f32 %v3208_v42, %v2881_v29  ;;  %v4313_v27 = vmul.f32 %v7478_v9, %v4243_v32  ;;  %v4043_v28 = vadd.f32 %v7786_v23, %v4007_v55  ;;  %v5199_v51 = vld [vmem:[%s5515_s20 + $0x80] sm:$0xff]  ;;  %v2816_v42 = vsel %vm1651_vm4, %v2813_v54, %v2815_v7  ;;  %v7928_v7 = vld [vmem:[%s8047_s8] ss:$0 sm:$0xff] }
 0x591   : > { %v3614_v52 = vadd.f32 %v3544_v17, %v3256_v1  ;;  %v4349_v15 = vadd.f32 %v7485_v63, %v4313_v27  ;;  %v4075_v33 = vmax.f32 %v4043_v28, 0.0  ;;  %v3418_v44 = vpop.f32.mrf.mxu0  ;;  %v2883_v1 = vadd.f32 %v2816_v42, %v2525_v61 }
 0x592   : > { %v3906_v27 = vrot.slane %v3773_v10, 2 }
 0x593   : > { %v3972_v46 = vadd.f32 %v3902_v47, %v3614_v52  ;;  %v4381_v43 = vadd.f32 %v5198_v19, %v4349_v15  ;;  %5030 = vmatmul.msk.f32.gmra.mxu2 %vm662_vm0, %v4075_v33  ;;  %v3776_v33 = vpop.f32.mrf.mxu1 }
 0x594   : > { %v3907_v48 = vsel %vm1651_vm4, %v3904_v21, %v3906_v27  ;;  %v2819_v21 = vsel %vm1651_vm4, %v2817_v12, %v2818_v13 }
 0x595   : > { %v4008_v62 = vmul.f32 %v7777_v34, %v3972_v46  ;;  %v4413_v60 = vmax.f32 %v4381_v43, 0.0 }
 0x596   : > { %v3211_v37 = vpop.f32.mrf.mxu3 }
 0x597   : > { %4445 = vst [vmem:[%s7507_s11 + $0x78] sm:$0xff] %v4413_v60  ;;  %v4044_v58 = vadd.f32 %v7786_v23, %v4008_v62  ;;  %v8322_v60 = vld [vmem:[#allocation92_spill] sm:$0xff]  ;;  %v8323_v37 = vld [vmem:[#allocation91_spill] sm:$0xff] }
 0x598   : > { %v2460_v16 = vrot.slane %v8322_v60, 1 }
 0x599   : > { %v4076_v31 = vmax.f32 %v4044_v58, 0.0  ;;  %v2459_v58 = vrot.slane %v8323_v37, 1  ;;  %v3421_v22 = vpop.f32.mrf.mxu0 }
 0x59a   : > { %v3551_v18 = vrot.slane %v3421_v22, 1  ;;  %v2463_v0 = vsel %vm1292_vm3, %v2460_v16, %v2462_v35 }
 0x59b   : > { %5031 = vmatmul.msk.f32.gmra.mxu2 %vm662_vm0, %v4076_v31  ;;  %v2461_v26 = vsel %vm1292_vm3, %v2459_v58, %v2460_v16  ;;  %v8324_v31 = vld [vmem:[#allocation97_spill] sm:$0xff]  ;;  %v3779_v50 = vpop.f32.mrf.mxu1  ;;  %v2527_v61 = vadd.f32 %v2463_v0, %v8326_v20 }
 0x59c   : > { %v2526_v8 = vadd.f32 %v2461_v26, %v8324_v31  ;;  %v3909_v10 = vrot.slane %v3779_v50, 2 }
 0x59e   : > { %v3213_v41 = vpop.f32.mrf.mxu3  ;;  %v4246_v45 = vpop.f32.mrf.mxu2 }
 0x59f   : > { %v3257_v56 = vadd.f32 %v3213_v41, %v2882_v53  ;;  %v4314_v6 = vmul.f32 %v7478_v9, %v4246_v45  ;;  %v3550_v53 = vrot.slane %v3418_v44, 1  ;;  %v2884_v41 = vadd.f32 %v2819_v21, %v2526_v8  ;;  %v5206_v8 = vld [vmem:[%s5515_s20 + $0xa8] sm:$0xff] }
 0x5a0   : > { %v3908_v45 = vrot.slane %v3776_v33, 2 }
 0x5a1   : > { %v3615_v3 = vadd.f32 %v3547_v40, %v3257_v56  ;;  %v4350_v38 = vadd.f32 %v7485_v63, %v4314_v6  ;;  %v3552_v40 = vsel %vm1292_vm3, %v3550_v53, %v3551_v18  ;;  %v5207_v53 = vld [vmem:[%s5515_s20 + $0xb0] sm:$0xff] }
 0x5a3   : > { %v3973_v55 = vadd.f32 %v3905_v11, %v3615_v3  ;;  %v4382_v29 = vadd.f32 %v5199_v51, %v4350_v38  ;;  %v3424_v3 = vpop.f32.mrf.mxu0  ;;  %v7938_v11 = vld [vmem:[%s8048_s9] ss:$0 sm:$0xff]  ;;  %v3910_v51 = vsel %vm1651_vm4, %v3908_v45, %v3909_v10  ;;  %v3782_v42 = vpop.f32.mrf.mxu1 }
 0x5a5   : > { %v4009_v30 = vmul.f32 %v7777_v34, %v3973_v55  ;;  %v4414_v32 = vmax.f32 %v4382_v29, 0.0 }
 0x5a6   : > { %v3216_v28 = vpop.f32.mrf.mxu3  ;;  %v4249_v17 = vpop.f32.mrf.mxu2 }
 0x5a7   : > { %4446 = vst [vmem:[%s7507_s11 + $0x80] sm:$0xff] %v4414_v32  ;;  %v3258_v52 = vadd.f32 %v3216_v28, %v2883_v1  ;;  %v4315_v15 = vmul.f32 %v7478_v9, %v4249_v17  ;;  %v4045_v47 = vadd.f32 %v7786_v23, %v4009_v30  ;;  %v3553_v30 = vrot.slane %v3424_v3, 1 }
 0x5a8   : > { %v2821_v32 = vsel %vm1651_vm4, %v2818_v13, %v2820_v25  ;;  %v3911_v28 = vrot.slane %v3782_v42, 2 }
 0x5a9   : > { %v3616_v46 = vadd.f32 %v3549_v39, %v3258_v52  ;;  %v4351_v19 = vadd.f32 %v7485_v63, %v4315_v15  ;;  %v4077_v43 = vmax.f32 %v4045_v47, 0.0  ;;  %v2885_v27 = vadd.f32 %v2821_v32, %v2527_v61  ;;  %v5211_v32 = vld [vmem:[%s5515_s20 + $0xd0] sm:$0xff] }
 0x5aa   : > { %v3554_v39 = vsel %vm1292_vm3, %v3551_v18, %v3553_v30 }
 0x5ab   : > { %v3974_v5 = vadd.f32 %v3907_v48, %v3616_v46  ;;  %v4383_v62 = vadd.f32 %v5200_v14, %v4351_v19  ;;  %5032 = vmatmul.msk.f32.gmra.mxu2 %vm662_vm0, %v4077_v43  ;;  %v3912_v48 = vsel %vm1651_vm4, %v3909_v10, %v3911_v28  ;;  %v5204_v14 = vld [vmem:[%s5515_s20 + $0x98] sm:$0xff] }
 0x5ad   : > { %v4010_v9 = vmul.f32 %v7777_v34, %v3974_v5  ;;  %v4415_v24 = vmax.f32 %v4383_v62, 0.0 }
 0x5ae   : > { %v3219_v54 = vpop.f32.mrf.mxu3 }
 0x5af   : > { %4447 = vst [vmem:[%s7507_s11 + $0x88] sm:$0xff] %v4415_v24  ;;  %v4046_v63 = vadd.f32 %v7786_v23, %v4010_v9 }
 0x5b1   : > { %v4078_v57 = vmax.f32 %v4046_v63, 0.0  ;;  %v5205_v63 = vld [vmem:[%s5515_s20 + $0xa0] sm:$0xff] }
 0x5b3   : > { %5033 = vmatmul.msk.f32.gmra.mxu2 %vm662_vm0, %v4078_v57 }
 0x5b6   : > { %v3221_v4 = vpop.f32.mrf.mxu3  ;;  %v4252_v56 = vpop.f32.mrf.mxu2 }
 0x5b7   : > { %v3259_v6 = vadd.f32 %v3221_v4, %v2884_v41  ;;  %v4316_v2 = vmul.f32 %v7928_v7, %v4252_v56  ;;  %v5208_v4 = vld [vmem:[%s5515_s20 + $0xb8] sm:$0xff] }
 0x5b9   : > { %v3617_v38 = vadd.f32 %v3552_v40, %v3259_v6  ;;  %v4352_v55 = vadd.f32 %v7938_v11, %v4316_v2  ;;  %v5209_v40 = vld [vmem:[%s5515_s20 + $0xc0] sm:$0xff] }
 0x5bb   : > { %v3975_v29 = vadd.f32 %v3910_v51, %v3617_v38  ;;  %v4384_v59 = vadd.f32 %v5203_v36, %v4352_v55  ;;  %v5210_v51 = vld [vmem:[%s5515_s20 + $0xc8] sm:$0xff] }
 0x5bd   : > { %v4011_v44 = vmul.f32 %v7777_v34, %v3975_v29  ;;  %v4416_v1 = vmax.f32 %v4384_v59, 0.0 }
 0x5be   : > { %v3224_v17 = vpop.f32.mrf.mxu3  ;;  %v4255_v52 = vpop.f32.mrf.mxu2 }
 0x5bf   : > { %4448 = vst [vmem:[%s7507_s11 + $0x90] sm:$0xff] %v4416_v1  ;;  %v3260_v15 = vadd.f32 %v3224_v17, %v2885_v27  ;;  %v4317_v33 = vmul.f32 %v7928_v7, %v4255_v52  ;;  %v4047_v47 = vadd.f32 %v7786_v23, %v4011_v44  ;;  %v5212_v52 = vld [vmem:[%s5515_s20 + $0xd8] sm:$0xff] }
 0x5c1   : > { %v3618_v46 = vadd.f32 %v3554_v39, %v3260_v15  ;;  %v4353_v19 = vadd.f32 %v7938_v11, %v4317_v33  ;;  %v4079_v43 = vmax.f32 %v4047_v47, 0.0 }
 0x5c3   : > { %v3976_v5 = vadd.f32 %v3912_v48, %v3618_v46  ;;  %v4385_v62 = vadd.f32 %v5204_v14, %v4353_v19  ;;  %5034 = vmatmul.msk.f32.gmra.mxu2 %vm662_vm0, %v4079_v43  ;;  %v5213_v19 = vld [vmem:[%s5515_s20 + $0xe0] sm:$0xff] }
 0x5c5   : > { %v4012_v60 = vmul.f32 %v7777_v34, %v3976_v5  ;;  %v4417_v16 = vmax.f32 %v4385_v62, 0.0 }
 0x5c6   : > { %v3227_v9 = vpop.f32.mrf.mxu3 }
 0x5c7   : > { %4449 = vst [vmem:[%s7507_s11 + $0x98] sm:$0xff] %v4417_v16  ;;  %v4048_v24 = vadd.f32 %v7786_v23, %v4012_v60  ;;  %v5214_v60 = vld [vmem:[%s5515_s20 + $0xe8] sm:$0xff] }
 0x5c9   : > { %v4080_v37 = vmax.f32 %v4048_v24, 0.0 }
 0x5cb   : > { %5035 = vmatmul.msk.f32.gmra.mxu2 %vm662_vm0, %v4080_v37 }
 0x5ce   : > { %v4258_v58 = vpop.f32.mrf.mxu2 }
 0x5cf   : > { %v4318_v54 = vmul.f32 %v7928_v7, %v4258_v58 }
 0x5d1   : > { %v4354_v22 = vadd.f32 %v7938_v11, %v4318_v54  ;;  %v5215_v54 = vld [vmem:[%s5515_s20 + $0xf0] sm:$0xff] }
 0x5d3   : > { %v4386_v13 = vadd.f32 %v5205_v63, %v4354_v22 }
 0x5d5   : > { %v4418_v26 = vmax.f32 %v4386_v13, 0.0 }
 0x5d6   : > { %v4261_v34 = vpop.f32.mrf.mxu2 }
 0x5d7   : > { %4450 = vst [vmem:[%s7507_s11 + $0xa0] sm:$0xff] %v4418_v26  ;;  %v4319_v31 = vmul.f32 %v7928_v7, %v4261_v34 }
 0x5d9   : > { %v4355_v23 = vadd.f32 %v7938_v11, %v4319_v31  ;;  %v5216_v31 = vld [vmem:[%s5515_s20 + $0xf8] sm:$0xff] }
 0x5db   : > { %v4387_v50 = vadd.f32 %v5206_v8, %v4355_v23 }
 0x5dd   : > { %v4419_v57 = vmax.f32 %v4387_v50, 0.0 }
 0x5df   : > { %4451 = vst [vmem:[%s7507_s11 + $0xa8] sm:$0xff] %v4419_v57 }
 0x5e6   : > { %v4264_v12 = vpop.f32.mrf.mxu2 }
 0x5e7   : > { %v4320_v49 = vmul.f32 %v7928_v7, %v4264_v12 }
 0x5e9   : > { %v4356_v35 = vadd.f32 %v7938_v11, %v4320_v49 }
 0x5eb   : > { %v4388_v18 = vadd.f32 %v5207_v53, %v4356_v35 }
 0x5ed   : > { %v4420_v21 = vmax.f32 %v4388_v18, 0.0 }
 0x5ee   : > { %v4267_v41 = vpop.f32.mrf.mxu2 }
 0x5ef   : > { %4452 = vst [vmem:[%s7507_s11 + $0xb0] sm:$0xff] %v4420_v21  ;;  %v4321_v45 = vmul.f32 %v7928_v7, %v4267_v41 }
 0x5f1   : > { %v4357_v10 = vadd.f32 %v7938_v11, %v4321_v45 }
 0x5f3   : > { %v4389_v56 = vadd.f32 %v5208_v4, %v4357_v10 }
 0x5f5   : > { %v4421_v6 = vmax.f32 %v4389_v56, 0.0 }
 0x5f7   : > { %4453 = vst [vmem:[%s7507_s11 + $0xb8] sm:$0xff] %v4421_v6 }
 0x5fe   : > { %v4270_v2 = vpop.f32.mrf.mxu2 }
 0x5ff   : > { %v4322_v25 = vmul.f32 %v7928_v7, %v4270_v2 }
 0x601   : > { %v4358_v0 = vadd.f32 %v7938_v11, %v4322_v25 }
 0x603   : > { %v4390_v20 = vadd.f32 %v5209_v40, %v4358_v0 }
 0x605   : > { %v4422_v61 = vmax.f32 %v4390_v20, 0.0 }
 0x606   : > { %v4273_v3 = vpop.f32.mrf.mxu2 }
 0x607   : > { %4454 = vst [vmem:[%s7507_s11 + $0xc0] sm:$0xff] %v4422_v61  ;;  %v4323_v38 = vmul.f32 %v7928_v7, %v4273_v3 }
 0x609   : > { %v4359_v55 = vadd.f32 %v7938_v11, %v4323_v38 }
 0x60b   : > { %v4391_v29 = vadd.f32 %v5210_v51, %v4359_v55 }
 0x60d   : > { %v4423_v36 = vmax.f32 %v4391_v29, 0.0 }
 0x60f   : > { %4455 = vst [vmem:[%s7507_s11 + $0xc8] sm:$0xff] %v4423_v36 }
 0x616   : > { %v4276_v59 = vpop.f32.mrf.mxu2 }
 0x617   : > { %v4324_v42 = vmul.f32 %v7928_v7, %v4276_v59 }
 0x619   : > { %v4360_v30 = vadd.f32 %v7938_v11, %v4324_v42 }
 0x61b   : > { %v4392_v44 = vadd.f32 %v5211_v32, %v4360_v30 }
 0x61d   : > { %v4424_v1 = vmax.f32 %v4392_v44, 0.0 }
 0x61e   : > { %v4279_v27 = vpop.f32.mrf.mxu2 }
 0x61f   : > { %4456 = vst [vmem:[%s7507_s11 + $0xd0] sm:$0xff] %v4424_v1  ;;  %v4325_v28 = vmul.f32 %v7928_v7, %v4279_v27 }
 0x621   : > { %v4361_v17 = vadd.f32 %v7938_v11, %v4325_v28 }
 0x623   : > { %v4393_v15 = vadd.f32 %v5212_v52, %v4361_v17 }
 0x625   : > { %v4425_v33 = vmax.f32 %v4393_v15, 0.0 }
 0x627   : > { %4457 = vst [vmem:[%s7507_s11 + $0xd8] sm:$0xff] %v4425_v33 }
 0x62e   : > { %v4282_v47 = vpop.f32.mrf.mxu2 }
 0x62f   : > { %v4326_v39 = vmul.f32 %v7928_v7, %v4282_v47 }
 0x631   : > { %v4362_v46 = vadd.f32 %v7938_v11, %v4326_v39 }
 0x633   : > { %v4394_v43 = vadd.f32 %v5213_v19, %v4362_v46 }
 0x635   : > { %v4426_v48 = vmax.f32 %v4394_v43, 0.0 }
 0x636   : > { %v4285_v5 = vpop.f32.mrf.mxu2 }
 0x637   : > { %4458 = vst [vmem:[%s7507_s11 + $0xe0] sm:$0xff] %v4426_v48  ;;  %v4327_v14 = vmul.f32 %v7928_v7, %v4285_v5 }
 0x639   : > { %v4363_v62 = vadd.f32 %v7938_v11, %v4327_v14 }
 0x63b   : > { %v4395_v16 = vadd.f32 %v5214_v60, %v4363_v62 }
 0x63d   : > { %v4427_v9 = vmax.f32 %v4395_v16, 0.0 }
 0x63f   : > { %4459 = vst [vmem:[%s7507_s11 + $0xe8] sm:$0xff] %v4427_v9 }
 0x646   : > { %v4288_v24 = vpop.f32.mrf.mxu2 }
 0x647   : > { %v4328_v37 = vmul.f32 %v7928_v7, %v4288_v24 }
 0x649   : > { %v4364_v58 = vadd.f32 %v7938_v11, %v4328_v37 }
 0x64b   : > { %v4396_v22 = vadd.f32 %v5215_v54, %v4364_v58 }
 0x64d   : > { %v4428_v63 = vmax.f32 %v4396_v22, 0.0 }
 0x64e   : > { %v4291_v13 = vpop.f32.mrf.mxu2 }
 0x64f   : > { %4460 = vst [vmem:[%s7507_s11 + $0xf0] sm:$0xff] %v4428_v63  ;;  %v4329_v26 = vmul.f32 %v7928_v7, %v4291_v13 }
 0x651   : > { %v4365_v34 = vadd.f32 %v7938_v11, %v4329_v26 }
 0x653   : > { %v4397_v23 = vadd.f32 %v5216_v31, %v4365_v34 }
 0x655   : > { %v4429_v8 = vmax.f32 %v4397_v23, 0.0 }
 0x657   : > { %4461 = vst [vmem:[%s7507_s11 + $0xf8] sm:$0xff] %v4429_v8 }
 0x658   : > { %5304 = shalt.err (!%p5301_p10)
}
 0x659   : > { %s5353_s2 = smov 128   ;;  %s5354_s20 = smov 8  }
 0x65a   : > { %5061 = dma.vmem_to_hbm [thread:$0]  (%p5479_p3), %s4476_s15, 4096, %s4478_s22, %s4463_s17, %s5353_s2, %s5353_s2, %s5354_s20  }
 0x65b PF: > { %s4492_s28 = sand.u32 1, %s5335_s13   ;;  %p8328_p12 = scmp.ge.s32.totalorder %s5347_s16, 2 }
 0x65c   : > { %s4493_s29 = scalar_lea.sflag [#allocation5], %s4492_s28 }
 0x65d   : > { %p5072_p13 = pnand %p8328_p12, %p5445_p6 }
 0x65f   : > { %p5073_p0 = pneg %p5072_p13 }
 0x661   : > { %5330 = dma.done.wait (%p5073_p0), %s4493_s29, 4096  }
 0x662   : > { %5332 = vsyncadd (%p5073_p0), %s4493_s29, 4294963200  ;;  %s8329_s26 = sld [smem:[#allocation12_spill]]  ;;  %p24_p5 = scmp.ge.s32.totalorder %s5463_s27, 4  }
 0x663   : > { %s8330_s15 = sld [smem:[#allocation14_spill]]  ;;  %s8331_s13 = smov %s5339_s14 }
 0x664   : > { %s8333_s16 = smov %s5463_s27  ;;  %26 = sbr.rel (!%p24_p5) target bundleno = 8 (0x8), region = 120 }
 0x668   : > { %s8332_s14 = smov %s8329_s26 }
 0x669   :  { %4499 = vsyncpa [#allocation4], 1 }
 0x66a   :  { %4501 = vsyncpa [#allocation4 + $0x1], 1 }
 0x66b   :  { %4502 = vsyncpa [#allocation7], 1 }
 0x66c   :  { %4503 = vsyncpa [#allocation5], 1 }
 0x66d   :  { %4505 = vsyncpa [#allocation5 + $0x1], 1 }

</bundles_post_ra>
